<compile_context>
chip_gen: v5e
topology: v5e:2x2
jax: 0.10.0
libtpu: 0.0.40
codegen_flags: <defaults>
</compile_context>

<pallas_src>
import functools

import jax
import jax.numpy as jnp
from jax.experimental import pallas as pl
from jax.experimental.pallas import tpu as pltpu

_VMEM_LIMIT = 32 * 1024 * 1024   # safe on v5e/v6e/v7x; far above actual use
_LANE = 128
_ROW_ALIGN = 16                  # bf16 sublane packing => 16-row alignment
_NEG = -1e30


def _round_up(x, m):
    return ((x + m - 1) // m) * m


# ------------------- tiled matmul + bias (+ ReLU) Pallas kernel --------------

def _matmul_kernel(x_ref, w_ref, b_ref, o_ref, *, relu):
    acc = jnp.dot(x_ref[...], w_ref[...], preferred_element_type=jnp.float32)
    acc = acc + b_ref[...]
    if relu:
        acc = jnp.maximum(acc, 0.0)
    o_ref[...] = acc


def matmul_bias_act(x, w, b, *, relu, tile_m_cap=512):
    """y = x @ w + b (optionally ReLU).

    x:(M,K) cast to bf16, w:(K,N) cast to bf16 and zero-padded to a multiple
    of 128 lanes, bias in f32.  Returns (M, Np) f32; caller slices [:, :N].
    Grid tiles M with "parallel" semantics (2 TCs on v7x).
    """
    M, K = x.shape
    N = w.shape[1]
    Np = _round_up(max(N, _LANE), _LANE)
    tile_m = min(tile_m_cap, _round_up(M, _ROW_ALIGN))
    Mp = _round_up(M, tile_m)

    x_p = x.astype(jnp.bfloat16)
    if Mp != M:
        x_p = jnp.pad(x_p, ((0, Mp - M), (0, 0)))
    w_p = jnp.pad(w.astype(jnp.bfloat16), ((0, 0), (0, Np - N)))
    b_p = jnp.pad(b.astype(jnp.float32), (0, Np - N)).reshape(1, Np)

    out = pl.pallas_call(
        functools.partial(_matmul_kernel, relu=relu),
        out_shape=jax.ShapeDtypeStruct((Mp, Np), jnp.float32),
        grid=(Mp // tile_m,),
        in_specs=[
            pl.BlockSpec((tile_m, K), lambda i: (i, 0)),
            pl.BlockSpec((K, Np), lambda i: (0, 0)),
            pl.BlockSpec((1, Np), lambda i: (0, 0)),
        ],
        out_specs=pl.BlockSpec((tile_m, Np), lambda i: (i, 0)),
        compiler_params=pltpu.CompilerParams(
            dimension_semantics=("parallel",),
            vmem_limit_bytes=_VMEM_LIMIT),
    )(x_p, w_p, b_p)
    return out[:M]


# ------------------------------ conv as matmul -------------------------------

def conv2d_pallas(x_nhwc, w, b, *, stride, relu=True):
    """x: (B,H,W,Cin) NHWC; w: (Cout,Cin,kh,kw) PyTorch layout; valid padding."""
    B, H, W, Cin = x_nhwc.shape
    Cout, _, kh, kw = w.shape
    OH = (H - kh) // stride + 1
    OW = (W - kw) // stride + 1
    # im2col with the feature axis already last, order (kh, kw, Cin): just
    # strided slices + lane-concat (no large transpose pass).
    taps = []
    for i in range(kh):
        for j in range(kw):
            taps.append(x_nhwc[:, i:i + stride * OH:stride,
                               j:j + stride * OW:stride, :])
    patches = jnp.concatenate(taps, axis=-1).reshape(B * OH * OW, kh * kw * Cin)
    # Reorder PyTorch weights (Cout,Cin,kh,kw) -> (kh*kw*Cin, Cout) to match.
    w2 = jnp.transpose(w, (2, 3, 1, 0)).reshape(kh * kw * Cin, Cout)
    out = matmul_bias_act(patches, w2, b, relu=relu)       # (B*OH*OW, Np)
    return out.reshape(B, OH, OW, -1)[..., :Cout]          # lane-dense -> slice


# --------------------------- fused post-conv head ----------------------------

def _head_kernel(*refs, n_mlp, act_dim, with_loss):
    n_out = 2 if with_loss else 1
    ins = refs[:len(refs) - n_out]
    outs = refs[len(refs) - n_out:]
    it = iter(ins)
    feat = next(it)[...]                       # (tb, 3136) bf16
    rtg = next(it)[...]                        # (tb, 1)    f32
    act = next(it)[...] if with_loss else None  # (tb, 1)   int32
    enc_w = next(it)[...]                      # (3136, E)  bf16
    enc_b = next(it)[...]                      # (1, E)
    ret_w = next(it)[...]                      # (1, E)
    ret_b = next(it)[...]                      # (1, E)
    g_s = next(it)[...]                        # LayerNorm gamma/beta, split
    b_s = next(it)[...]
    g_r = next(it)[...]
    b_r = next(it)[...]
    w0_s = next(it)[...]                       # Linear(2E,H) split into halves
    w0_r = next(it)[...]
    b0 = next(it)[...]
    hidden = [(next(it)[...], next(it)[...]) for _ in range(n_mlp - 1)]
    out_w = next(it)[...]                      # (H, Ap) zero-padded to 128
    out_b = next(it)[...]                      # (1, Ap)

    f32 = jnp.float32
    # state_encoder final Linear(3136, E)
    s_emb = jnp.dot(feat, enc_w, preferred_element_type=f32) + enc_b
    # ret_emb: Linear(1, E)  (avoid a K=1 matmul)
    r_emb = rtg * ret_w + ret_b
    # LayerNorm over concat([s_emb, r_emb], -1), written without the concat.
    E = s_emb.shape[-1]
    inv = 1.0 / float(2 * E)
    mu = (jnp.sum(s_emb, axis=-1, keepdims=True)
          + jnp.sum(r_emb, axis=-1, keepdims=True)) * inv
    sc = s_emb - mu
    rc = r_emb - mu
    var = (jnp.sum(sc * sc, axis=-1, keepdims=True)
           + jnp.sum(rc * rc, axis=-1, keepdims=True)) * inv
    rstd = jax.lax.rsqrt(var + 1e-5)
    xs = sc * rstd * g_s + b_s
    xr = rc * rstd * g_r + b_r
    # Linear(2E, H) on the (virtual) concat = sum of two partial matmuls.
    x = (jnp.dot(xs, w0_s, preferred_element_type=f32)
         + jnp.dot(xr, w0_r, preferred_element_type=f32) + b0)
    x = jnp.maximum(x, 0.0)
    # TODO(synk): Dropout is identity (eval mode).
    for w, bb in hidden:
        x = jnp.maximum(jnp.dot(x, w, preferred_element_type=f32) + bb, 0.0)
    logits = jnp.dot(x, out_w, preferred_element_type=f32) + out_b   # (tb, Ap)
    outs[0][...] = logits

    if with_loss:
        col = jax.lax.broadcasted_iota(jnp.int32, logits.shape, 1)
        valid = col < act_dim
        lm = jnp.where(valid, logits, _NEG)            # mask padded lanes
        m = jnp.max(lm, axis=-1, keepdims=True)
        z = lm - m
        ez = jnp.where(valid, jnp.exp(z), 0.0)
        lse = jnp.log(jnp.sum(ez, axis=-1, keepdims=True))
        logp = z - lse
        onehot = (col == act).astype(f32)
        nll = -jnp.sum(onehot * logp, axis=-1, keepdims=True)        # (tb, 1)
        outs[1][...] = jnp.broadcast_to(nll, outs[1].shape)


def rvs_head(params, enc_w_hwc, feat, rtg, actions, *, tile_b_cap=256):
    """Fused: enc Linear + ret_emb + LayerNorm + MLP + logits (+ per-row NLL)."""
    B, K = feat.shape
    E = params["enc_b"].shape[0]
    H = params["mlp_b"][0].shape[0]
    A = params["out_b"].shape[0]
    Ap = _round_up(max(A, _LANE), _LANE)
    with_loss = actions is not None

    tile_b = min(tile_b_cap, _round_up(B, _ROW_ALIGN))
    Bp = _round_up(B, tile_b)

    def pad_rows(a):
        return a if a.shape[0] == Bp else jnp.pad(
            a, ((0, Bp - a.shape[0]),) + ((0, 0),) * (a.ndim - 1))

    # batch-tiled inputs
    feat_p = pad_rows(feat.astype(jnp.bfloat16))
    rtg_p = pad_rows(rtg.astype(jnp.float32).reshape(B, 1))
    inputs = [feat_p, rtg_p]
    in_specs = [pl.BlockSpec((tile_b, K), lambda i: (i, 0)),
                pl.BlockSpec((tile_b, 1), lambda i: (i, 0))]
    if with_loss:
        act_p = pad_rows(actions.reshape(B, 1).astype(jnp.int32))
        inputs.append(act_p)
        in_specs.append(pl.BlockSpec((tile_b, 1), lambda i: (i, 0)))

    # resident weights (full blocks, fetched once, stay in VMEM across grid)
    f32 = jnp.float32
    ln_g, ln_b = params["ln_g"].astype(f32), params["ln_b"].astype(f32)
    w0, b0 = params["mlp_w"][0].astype(f32), params["mlp_b"][0].astype(f32)
    weights = [
        enc_w_hwc.astype(jnp.bfloat16),
        params["enc_b"].astype(f32).reshape(1, E),
        params["ret_w"].astype(f32).reshape(1, E),
        params["ret_b"].astype(f32).reshape(1, E),
        ln_g[:E].reshape(1, E), ln_b[:E].reshape(1, E),
        ln_g[E:].reshape(1, E), ln_b[E:].reshape(1, E),
        w0[:E], w0[E:], b0.reshape(1, H),
    ]
    for w, b in zip(params["mlp_w"][1:], params["mlp_b"][1:]):
        weights += [w.astype(f32), b.astype(f32).reshape(1, -1)]
    out_w = jnp.pad(params["out_w"].astype(f32), ((0, 0), (0, Ap - A)))
    out_b = jnp.pad(params["out_b"].astype(f32), (0, Ap - A)).reshape(1, Ap)
    weights += [out_w, out_b]
    inputs += weights
    in_specs += [pl.BlockSpec(w.shape, lambda i: (0, 0)) for w in weights]

    out_shapes = [jax.ShapeDtypeStruct((Bp, Ap), jnp.float32)]
    out_specs = [pl.BlockSpec((tile_b, Ap), lambda i: (i, 0))]
    if with_loss:
        out_shapes.append(jax.ShapeDtypeStruct((Bp, _LANE), jnp.float32))
        out_specs.append(pl.BlockSpec((tile_b, _LANE), lambda i: (i, 0)))

    outs = pl.pallas_call(
        functools.partial(_head_kernel, n_mlp=len(params["mlp_w"]),
                          act_dim=A, with_loss=with_loss),
        out_shape=out_shapes,
        grid=(Bp // tile_b,),
        in_specs=in_specs,
        out_specs=out_specs,
        compiler_params=pltpu.CompilerParams(
            dimension_semantics=("parallel",),
            vmem_limit_bytes=_VMEM_LIMIT),
    )(*inputs)

    logits = outs[0][:B, :A]
    if with_loss:
        loss = jnp.mean(outs[1][:B, 0])   # reduction='mean'
        return logits, loss
    return logits, None


# ------------------------------- parameters ---------------------------------

def init_params(key, n_embed, act_dim, hidden_size, n_layer):
    ks = iter(jax.random.split(key, 32))
    std = 0.02  # _init_weights: Linear weight ~ N(0, 0.02), bias = 0
    p = {}
    # state_encoder conv stack (PyTorch default init -> synthetic small normal)
    p["c1w"] = jax.random.normal(next(ks), (32, 4, 8, 8), jnp.float32) * 0.05
    p["c1b"] = jnp.zeros((32,), jnp.float32)
    p["c2w"] = jax.random.normal(next(ks), (64, 32, 4, 4), jnp.float32) * 0.04
    p["c2b"] = jnp.zeros((64,), jnp.float32)
    p["c3w"] = jax.random.normal(next(ks), (64, 64, 3, 3), jnp.float32) * 0.04
    p["c3b"] = jnp.zeros((64,), jnp.float32)
    # Linear(3136, n_embed) stored as (in, out), rows in PyTorch (C,H,W) order
    p["enc_w"] = jax.random.normal(next(ks), (3136, n_embed), jnp.float32) * std
    p["enc_b"] = jnp.zeros((n_embed,), jnp.float32)
    # ret_emb Linear(1, n_embed)
    p["ret_w"] = jax.random.normal(next(ks), (1, n_embed), jnp.float32) * std
    p["ret_b"] = jnp.zeros((n_embed,), jnp.float32)
    # LayerNorm(2*n_embed)
    p["ln_g"] = jnp.ones((2 * n_embed,), jnp.float32)
    p["ln_b"] = jnp.zeros((2 * n_embed,), jnp.float32)
    # MLP: Linear(2E,H), (n_layer-1) x Linear(H,H), Linear(H,act_dim)
    mlp_w, mlp_b = [], []
    mlp_w.append(jax.random.normal(next(ks), (2 * n_embed, hidden_size),
                                   jnp.float32) * std)
    mlp_b.append(jnp.zeros((hidden_size,), jnp.float32))
    for _ in range(n_layer - 1):
        mlp_w.append(jax.random.normal(next(ks), (hidden_size, hidden_size),
                                       jnp.float32) * std)
        mlp_b.append(jnp.zeros((hidden_size,), jnp.float32))
    p["mlp_w"], p["mlp_b"] = mlp_w, mlp_b
    p["out_w"] = jax.random.normal(next(ks), (hidden_size, act_dim),
                                   jnp.float32) * std
    p["out_b"] = jnp.zeros((act_dim,), jnp.float32)
    return p


# --------------------------------- forward -----------------------------------

def _rvs_forward_impl(params, states, actions, rtg):
    # states: (B, 4, H, W) NCHW (PyTorch layout) -> NHWC once at the boundary.
    x = jnp.transpose(states, (0, 2, 3, 1)).astype(jnp.float32)
    x = conv2d_pallas(x, params["c1w"], params["c1b"], stride=4, relu=True)
    x = conv2d_pallas(x, params["c2w"], params["c2b"], stride=2, relu=True)
    x = conv2d_pallas(x, params["c3w"], params["c3b"], stride=1, relu=True)
    B, OH, OW, C = x.shape
    feat = x.reshape(B, OH * OW * C)            # NHWC flatten (h, w, c)
    E = params["enc_b"].shape[0]
    # Reorder Linear(3136, E) rows from PyTorch (C,H,W)-flatten order to the
    # NHWC (H,W,C)-flatten order used above (one-time tiny transform).
    enc_w_hwc = (params["enc_w"].reshape(C, OH, OW, E)
                 .transpose(1, 2, 0, 3).reshape(OH * OW * C, E))
    return rvs_head(params, enc_w_hwc, feat, rtg, actions)


rvs_forward = jax.jit(_rvs_forward_impl)


# ----------------------------------- main -------------------------------------

if __name__ == "__main__":
    n_embed, act_dim, hidden_size, n_layer = 32, 6, 32, 2
    B = 2  # batch; spatial 84x84 is implied by the 3136-wide Flatten->Linear

    key = jax.random.PRNGKey(0)
    kp, k_s, k_r, k_a = jax.random.split(key, 4)
    params = init_params(kp, n_embed, act_dim, hidden_size, n_layer)

    states = jax.random.normal(k_s, (B, 4, 84, 84), jnp.float32)   # NCHW
    rtg = jax.random.normal(k_r, (B, 1), jnp.float32)
    actions = jax.random.randint(k_a, (B,), 0, act_dim, jnp.int32)

    logits, loss = rvs_forward(params, states, actions, rtg)
    jax.block_until_ready((logits, loss))
    assert logits.shape == (B, act_dim)
    assert loss.shape == ()
    print("KERNEL_OK")
</pallas_src>

<mosaic_0001>
module attributes {stable_mosaic.version = 11 : i64} {
  func.func @_matmul_kernel(%arg0: i32, %arg1: memref<512x256xbf16, #tpu.memory_space<vmem>>, %arg2: memref<256x128xbf16, #tpu.memory_space<vmem>>, %arg3: memref<1x128xf32, #tpu.memory_space<vmem>>, %arg4: memref<512x128xf32, #tpu.memory_space<vmem>>) attributes {dimension_semantics = [#tpu.dimension_semantics<parallel>], iteration_bounds = array<i64: 2>, scalar_prefetch = 0 : i64, scratch_operands = 0 : i64, tpu.core_type = #tpu.core_type<tc>, window_params = [{transform_indices = @transform_0, window_bounds = array<i64: 512, 256>}, {pipeline_mode = #tpu.pipeline_mode<synchronous>, transform_indices = @transform_1, window_bounds = array<i64: 256, 128>}, {pipeline_mode = #tpu.pipeline_mode<synchronous>, transform_indices = @transform_2, window_bounds = array<i64: 1, 128>}, {transform_indices = @transform_3, window_bounds = array<i64: 512, 128>}]} {
    %c0 = arith.constant 0 : index
    %c0_0 = arith.constant 0 : index
    %0 = vector.load %arg1[%c0, %c0_0] : memref<512x256xbf16, #tpu.memory_space<vmem>>, vector<512x256xbf16>
    %c0_1 = arith.constant 0 : index
    %c0_2 = arith.constant 0 : index
    %1 = vector.load %arg2[%c0_1, %c0_2] : memref<256x128xbf16, #tpu.memory_space<vmem>>, vector<256x128xbf16>
    %cst = arith.constant dense<0.000000e+00> : vector<512x128xf32>
    %2 = tpu.matmul %0, %1, %cst {dimension_numbers = #tpu.dot_dimension_numbers<[1], [0], [0], [1], [0, 0, 1, 1], [], []>} : vector<512x256xbf16>, vector<256x128xbf16>, vector<512x128xf32> -> vector<512x128xf32>
    %c0_3 = arith.constant 0 : index
    %c0_4 = arith.constant 0 : index
    %3 = vector.load %arg3[%c0_3, %c0_4] : memref<1x128xf32, #tpu.memory_space<vmem>>, vector<1x128xf32>
    %4 = vector.broadcast %3 : vector<1x128xf32> to vector<512x128xf32>
    %5 = arith.addf %2, %4 : vector<512x128xf32>
    %cst_5 = arith.constant 0.000000e+00 : f32
    %6 = vector.broadcast %cst_5 : f32 to vector<512x128xf32>
    %7 = arith.maximumf %5, %6 : vector<512x128xf32>
    %c0_6 = arith.constant 0 : index
    %c0_7 = arith.constant 0 : index
    %8 = vector.load %arg4[%c0_6, %c0_7] : memref<512x128xf32, #tpu.memory_space<vmem>>, vector<512x128xf32>
    tpu.vector_store %arg4[%c0_6, %c0_7], %7 {strides = array<i32>} : memref<512x128xf32, #tpu.memory_space<vmem>>, vector<512x128xf32>,
    return
  }
  func.func @transform_0(%arg0: i32) -> (i32, i32) {
    %c0_i32 = arith.constant 0 : i32
    %c0_i32_0 = arith.constant 0 : i32
    return %arg0, %c0_i32 : i32, i32
  }
  func.func @transform_1(%arg0: i32) -> (i32, i32) {
    %c0_i32 = arith.constant 0 : i32
    %c0_i32_0 = arith.constant 0 : i32
    %c0_i32_1 = arith.constant 0 : i32
    return %c0_i32, %c0_i32_0 : i32, i32
  }
  func.func @transform_2(%arg0: i32) -> (i32, i32) {
    %c0_i32 = arith.constant 0 : i32
    %c0_i32_0 = arith.constant 0 : i32
    %c0_i32_1 = arith.constant 0 : i32
    return %c0_i32, %c0_i32_0 : i32, i32
  }
  func.func @transform_3(%arg0: i32) -> (i32, i32) {
    %c0_i32 = arith.constant 0 : i32
    %c0_i32_0 = arith.constant 0 : i32
    return %arg0, %c0_i32 : i32, i32
  }
}

module attributes {stable_mosaic.version = 11 : i64} {
  func.func @_matmul_kernel(%arg0: i32, %arg1: memref<176x512xbf16, #tpu.memory_space<vmem>>, %arg2: memref<512x128xbf16, #tpu.memory_space<vmem>>, %arg3: memref<1x128xf32, #tpu.memory_space<vmem>>, %arg4: memref<176x128xf32, #tpu.memory_space<vmem>>) attributes {dimension_semantics = [#tpu.dimension_semantics<parallel>], iteration_bounds = array<i64: 1>, scalar_prefetch = 0 : i64, scratch_operands = 0 : i64, tpu.core_type = #tpu.core_type<tc>, window_params = [{transform_indices = @transform_0, window_bounds = array<i64: 176, 512>}, {pipeline_mode = #tpu.pipeline_mode<synchronous>, transform_indices = @transform_1, window_bounds = array<i64: 512, 128>}, {pipeline_mode = #tpu.pipeline_mode<synchronous>, transform_indices = @transform_2, window_bounds = array<i64: 1, 128>}, {transform_indices = @transform_3, window_bounds = array<i64: 176, 128>}]} {
    %c0 = arith.constant 0 : index
    %c0_0 = arith.constant 0 : index
    %0 = vector.load %arg1[%c0, %c0_0] : memref<176x512xbf16, #tpu.memory_space<vmem>>, vector<176x512xbf16>
    %c0_1 = arith.constant 0 : index
    %c0_2 = arith.constant 0 : index
    %1 = vector.load %arg2[%c0_1, %c0_2] : memref<512x128xbf16, #tpu.memory_space<vmem>>, vector<512x128xbf16>
    %cst = arith.constant dense<0.000000e+00> : vector<176x128xf32>
    %2 = tpu.matmul %0, %1, %cst {dimension_numbers = #tpu.dot_dimension_numbers<[1], [0], [0], [1], [0, 0, 1, 1], [], []>} : vector<176x512xbf16>, vector<512x128xbf16>, vector<176x128xf32> -> vector<176x128xf32>
    %c0_3 = arith.constant 0 : index
    %c0_4 = arith.constant 0 : index
    %3 = vector.load %arg3[%c0_3, %c0_4] : memref<1x128xf32, #tpu.memory_space<vmem>>, vector<1x128xf32>
    %4 = vector.broadcast %3 : vector<1x128xf32> to vector<176x128xf32>
    %5 = arith.addf %2, %4 : vector<176x128xf32>
    %cst_5 = arith.constant 0.000000e+00 : f32
    %6 = vector.broadcast %cst_5 : f32 to vector<176x128xf32>
    %7 = arith.maximumf %5, %6 : vector<176x128xf32>
    %c0_6 = arith.constant 0 : index
    %c0_7 = arith.constant 0 : index
    %8 = vector.load %arg4[%c0_6, %c0_7] : memref<176x128xf32, #tpu.memory_space<vmem>>, vector<176x128xf32>
    tpu.vector_store %arg4[%c0_6, %c0_7], %7 {strides = array<i32>} : memref<176x128xf32, #tpu.memory_space<vmem>>, vector<176x128xf32>,
    return
  }
  func.func @transform_0(%arg0: i32) -> (i32, i32) {
    %c0_i32 = arith.constant 0 : i32
    %c0_i32_0 = arith.constant 0 : i32
    return %arg0, %c0_i32 : i32, i32
  }
  func.func @transform_1(%arg0: i32) -> (i32, i32) {
    %c0_i32 = arith.constant 0 : i32
    %c0_i32_0 = arith.constant 0 : i32
    %c0_i32_1 = arith.constant 0 : i32
    return %c0_i32, %c0_i32_0 : i32, i32
  }
  func.func @transform_2(%arg0: i32) -> (i32, i32) {
    %c0_i32 = arith.constant 0 : i32
    %c0_i32_0 = arith.constant 0 : i32
    %c0_i32_1 = arith.constant 0 : i32
    return %c0_i32, %c0_i32_0 : i32, i32
  }
  func.func @transform_3(%arg0: i32) -> (i32, i32) {
    %c0_i32 = arith.constant 0 : i32
    %c0_i32_0 = arith.constant 0 : i32
    return %arg0, %c0_i32 : i32, i32
  }
}

module attributes {stable_mosaic.version = 11 : i64} {
  func.func @_matmul_kernel(%arg0: i32, %arg1: memref<112x576xbf16, #tpu.memory_space<vmem>>, %arg2: memref<576x128xbf16, #tpu.memory_space<vmem>>, %arg3: memref<1x128xf32, #tpu.memory_space<vmem>>, %arg4: memref<112x128xf32, #tpu.memory_space<vmem>>) attributes {dimension_semantics = [#tpu.dimension_semantics<parallel>], iteration_bounds = array<i64: 1>, scalar_prefetch = 0 : i64, scratch_operands = 0 : i64, tpu.core_type = #tpu.core_type<tc>, window_params = [{transform_indices = @transform_0, window_bounds = array<i64: 112, 576>}, {pipeline_mode = #tpu.pipeline_mode<synchronous>, transform_indices = @transform_1, window_bounds = array<i64: 576, 128>}, {pipeline_mode = #tpu.pipeline_mode<synchronous>, transform_indices = @transform_2, window_bounds = array<i64: 1, 128>}, {transform_indices = @transform_3, window_bounds = array<i64: 112, 128>}]} {
    %c0 = arith.constant 0 : index
    %c0_0 = arith.constant 0 : index
    %0 = vector.load %arg1[%c0, %c0_0] : memref<112x576xbf16, #tpu.memory_space<vmem>>, vector<112x576xbf16>
    %c0_1 = arith.constant 0 : index
    %c0_2 = arith.constant 0 : index
    %1 = vector.load %arg2[%c0_1, %c0_2] : memref<576x128xbf16, #tpu.memory_space<vmem>>, vector<576x128xbf16>
    %cst = arith.constant dense<0.000000e+00> : vector<112x128xf32>
    %2 = tpu.matmul %0, %1, %cst {dimension_numbers = #tpu.dot_dimension_numbers<[1], [0], [0], [1], [0, 0, 1, 1], [], []>} : vector<112x576xbf16>, vector<576x128xbf16>, vector<112x128xf32> -> vector<112x128xf32>
    %c0_3 = arith.constant 0 : index
    %c0_4 = arith.constant 0 : index
    %3 = vector.load %arg3[%c0_3, %c0_4] : memref<1x128xf32, #tpu.memory_space<vmem>>, vector<1x128xf32>
    %4 = vector.broadcast %3 : vector<1x128xf32> to vector<112x128xf32>
    %5 = arith.addf %2, %4 : vector<112x128xf32>
    %cst_5 = arith.constant 0.000000e+00 : f32
    %6 = vector.broadcast %cst_5 : f32 to vector<112x128xf32>
    %7 = arith.maximumf %5, %6 : vector<112x128xf32>
    %c0_6 = arith.constant 0 : index
    %c0_7 = arith.constant 0 : index
    %8 = vector.load %arg4[%c0_6, %c0_7] : memref<112x128xf32, #tpu.memory_space<vmem>>, vector<112x128xf32>
    tpu.vector_store %arg4[%c0_6, %c0_7], %7 {strides = array<i32>} : memref<112x128xf32, #tpu.memory_space<vmem>>, vector<112x128xf32>,
    return
  }
  func.func @transform_0(%arg0: i32) -> (i32, i32) {
    %c0_i32 = arith.constant 0 : i32
    %c0_i32_0 = arith.constant 0 : i32
    return %arg0, %c0_i32 : i32, i32
  }
  func.func @transform_1(%arg0: i32) -> (i32, i32) {
    %c0_i32 = arith.constant 0 : i32
    %c0_i32_0 = arith.constant 0 : i32
    %c0_i32_1 = arith.constant 0 : i32
    return %c0_i32, %c0_i32_0 : i32, i32
  }
  func.func @transform_2(%arg0: i32) -> (i32, i32) {
    %c0_i32 = arith.constant 0 : i32
    %c0_i32_0 = arith.constant 0 : i32
    %c0_i32_1 = arith.constant 0 : i32
    return %c0_i32, %c0_i32_0 : i32, i32
  }
  func.func @transform_3(%arg0: i32) -> (i32, i32) {
    %c0_i32 = arith.constant 0 : i32
    %c0_i32_0 = arith.constant 0 : i32
    return %arg0, %c0_i32 : i32, i32
  }
}

module attributes {stable_mosaic.version = 11 : i64} {
  func.func @_head_kernel(%arg0: i32, %arg1: memref<16x3136xbf16, #tpu.memory_space<vmem>>, %arg2: memref<16x1xf32, #tpu.memory_space<vmem>>, %arg3: memref<16x1xi32, #tpu.memory_space<vmem>>, %arg4: memref<3136x32xbf16, #tpu.memory_space<vmem>>, %arg5: memref<1x32xf32, #tpu.memory_space<vmem>>, %arg6: memref<1x32xf32, #tpu.memory_space<vmem>>, %arg7: memref<1x32xf32, #tpu.memory_space<vmem>>, %arg8: memref<1x32xf32, #tpu.memory_space<vmem>>, %arg9: memref<1x32xf32, #tpu.memory_space<vmem>>, %arg10: memref<1x32xf32, #tpu.memory_space<vmem>>, %arg11: memref<1x32xf32, #tpu.memory_space<vmem>>, %arg12: memref<32x32xf32, #tpu.memory_space<vmem>>, %arg13: memref<32x32xf32, #tpu.memory_space<vmem>>, %arg14: memref<1x32xf32, #tpu.memory_space<vmem>>, %arg15: memref<32x32xf32, #tpu.memory_space<vmem>>, %arg16: memref<1x32xf32, #tpu.memory_space<vmem>>, %arg17: memref<32x128xf32, #tpu.memory_space<vmem>>, %arg18: memref<1x128xf32, #tpu.memory_space<vmem>>, %arg19: memref<16x128xf32, #tpu.memory_space<vmem>>, %arg20: memref<16x128xf32, #tpu.memory_space<vmem>>) attributes {dimension_semantics = [#tpu.dimension_semantics<parallel>], iteration_bounds = array<i64: 1>, scalar_prefetch = 0 : i64, scratch_operands = 0 : i64, tpu.core_type = #tpu.core_type<tc>, window_params = [{transform_indices = @transform_0, window_bounds = array<i64: 16, 3136>}, {transform_indices = @transform_1, window_bounds = array<i64: 16, 1>}, {transform_indices = @transform_2, window_bounds = array<i64: 16, 1>}, {pipeline_mode = #tpu.pipeline_mode<synchronous>, transform_indices = @transform_3, window_bounds = array<i64: 3136, 32>}, {pipeline_mode = #tpu.pipeline_mode<synchronous>, transform_indices = @transform_4, window_bounds = array<i64: 1, 32>}, {pipeline_mode = #tpu.pipeline_mode<synchronous>, transform_indices = @transform_5, window_bounds = array<i64: 1, 32>}, {pipeline_mode = #tpu.pipeline_mode<synchronous>, transform_indices = @transform_6, window_bounds = array<i64: 1, 32>}, {pipeline_mode = #tpu.pipeline_mode<synchronous>, transform_indices = @transform_7, window_bounds = array<i64: 1, 32>}, {pipeline_mode = #tpu.pipeline_mode<synchronous>, transform_indices = @transform_8, window_bounds = array<i64: 1, 32>}, {pipeline_mode = #tpu.pipeline_mode<synchronous>, transform_indices = @transform_9, window_bounds = array<i64: 1, 32>}, {pipeline_mode = #tpu.pipeline_mode<synchronous>, transform_indices = @transform_10, window_bounds = array<i64: 1, 32>}, {pipeline_mode = #tpu.pipeline_mode<synchronous>, transform_indices = @transform_11, window_bounds = array<i64: 32, 32>}, {pipeline_mode = #tpu.pipeline_mode<synchronous>, transform_indices = @transform_12, window_bounds = array<i64: 32, 32>}, {pipeline_mode = #tpu.pipeline_mode<synchronous>, transform_indices = @transform_13, window_bounds = array<i64: 1, 32>}, {pipeline_mode = #tpu.pipeline_mode<synchronous>, transform_indices = @transform_14, window_bounds = array<i64: 32, 32>}, {pipeline_mode = #tpu.pipeline_mode<synchronous>, transform_indices = @transform_15, window_bounds = array<i64: 1, 32>}, {pipeline_mode = #tpu.pipeline_mode<synchronous>, transform_indices = @transform_16, window_bounds = array<i64: 32, 128>}, {pipeline_mode = #tpu.pipeline_mode<synchronous>, transform_indices = @transform_17, window_bounds = array<i64: 1, 128>}, {transform_indices = @transform_18, window_bounds = array<i64: 16, 128>}, {transform_indices = @transform_19, window_bounds = array<i64: 16, 128>}]} {
    %c0 = arith.constant 0 : index
    %c0_0 = arith.constant 0 : index
    %0 = vector.load %arg1[%c0, %c0_0] : memref<16x3136xbf16, #tpu.memory_space<vmem>>, vector<16x3136xbf16>
    %c0_1 = arith.constant 0 : index
    %c0_2 = arith.constant 0 : index
    %1 = vector.load %arg2[%c0_1, %c0_2] : memref<16x1xf32, #tpu.memory_space<vmem>>, vector<16x1xf32>
    %c0_3 = arith.constant 0 : index
    %c0_4 = arith.constant 0 : index
    %2 = vector.load %arg3[%c0_3, %c0_4] : memref<16x1xi32, #tpu.memory_space<vmem>>, vector<16x1xi32>
    %c0_5 = arith.constant 0 : index
    %c0_6 = arith.constant 0 : index
    %3 = vector.load %arg4[%c0_5, %c0_6] : memref<3136x32xbf16, #tpu.memory_space<vmem>>, vector<3136x32xbf16>
    %c0_7 = arith.constant 0 : index
    %c0_8 = arith.constant 0 : index
    %4 = vector.load %arg5[%c0_7, %c0_8] : memref<1x32xf32, #tpu.memory_space<vmem>>, vector<1x32xf32>
    %c0_9 = arith.constant 0 : index
    %c0_10 = arith.constant 0 : index
    %5 = vector.load %arg6[%c0_9, %c0_10] : memref<1x32xf32, #tpu.memory_space<vmem>>, vector<1x32xf32>
    %c0_11 = arith.constant 0 : index
    %c0_12 = arith.constant 0 : index
    %6 = vector.load %arg7[%c0_11, %c0_12] : memref<1x32xf32, #tpu.memory_space<vmem>>, vector<1x32xf32>
    %c0_13 = arith.constant 0 : index
    %c0_14 = arith.constant 0 : index
    %7 = vector.load %arg8[%c0_13, %c0_14] : memref<1x32xf32, #tpu.memory_space<vmem>>, vector<1x32xf32>
    %c0_15 = arith.constant 0 : index
    %c0_16 = arith.constant 0 : index
    %8 = vector.load %arg9[%c0_15, %c0_16] : memref<1x32xf32, #tpu.memory_space<vmem>>, vector<1x32xf32>
    %c0_17 = arith.constant 0 : index
    %c0_18 = arith.constant 0 : index
    %9 = vector.load %arg10[%c0_17, %c0_18] : memref<1x32xf32, #tpu.memory_space<vmem>>, vector<1x32xf32>
    %c0_19 = arith.constant 0 : index
    %c0_20 = arith.constant 0 : index
    %10 = vector.load %arg11[%c0_19, %c0_20] : memref<1x32xf32, #tpu.memory_space<vmem>>, vector<1x32xf32>
    %c0_21 = arith.constant 0 : index
    %c0_22 = arith.constant 0 : index
    %11 = vector.load %arg12[%c0_21, %c0_22] : memref<32x32xf32, #tpu.memory_space<vmem>>, vector<32x32xf32>
    %c0_23 = arith.constant 0 : index
    %c0_24 = arith.constant 0 : index
    %12 = vector.load %arg13[%c0_23, %c0_24] : memref<32x32xf32, #tpu.memory_space<vmem>>, vector<32x32xf32>
    %c0_25 = arith.constant 0 : index
    %c0_26 = arith.constant 0 : index
    %13 = vector.load %arg14[%c0_25, %c0_26] : memref<1x32xf32, #tpu.memory_space<vmem>>, vector<1x32xf32>
    %c0_27 = arith.constant 0 : index
    %c0_28 = arith.constant 0 : index
    %14 = vector.load %arg15[%c0_27, %c0_28] : memref<32x32xf32, #tpu.memory_space<vmem>>, vector<32x32xf32>
    %c0_29 = arith.constant 0 : index
    %c0_30 = arith.constant 0 : index
    %15 = vector.load %arg16[%c0_29, %c0_30] : memref<1x32xf32, #tpu.memory_space<vmem>>, vector<1x32xf32>
    %c0_31 = arith.constant 0 : index
    %c0_32 = arith.constant 0 : index
    %16 = vector.load %arg17[%c0_31, %c0_32] : memref<32x128xf32, #tpu.memory_space<vmem>>, vector<32x128xf32>
    %c0_33 = arith.constant 0 : index
    %c0_34 = arith.constant 0 : index
    %17 = vector.load %arg18[%c0_33, %c0_34] : memref<1x128xf32, #tpu.memory_space<vmem>>, vector<1x128xf32>
    %cst = arith.constant dense<0.000000e+00> : vector<16x32xf32>
    %18 = tpu.matmul %0, %3, %cst {dimension_numbers = #tpu.dot_dimension_numbers<[1], [0], [0], [1], [0, 0, 1, 1], [], []>} : vector<16x3136xbf16>, vector<3136x32xbf16>, vector<16x32xf32> -> vector<16x32xf32>
    %19 = vector.broadcast %4 : vector<1x32xf32> to vector<16x32xf32>
    %20 = arith.addf %18, %19 : vector<16x32xf32>
    %21 = vector.broadcast %1 : vector<16x1xf32> to vector<16x32xf32>
    %22 = vector.broadcast %5 : vector<1x32xf32> to vector<16x32xf32>
    %23 = arith.mulf %21, %22 : vector<16x32xf32>
    %24 = vector.broadcast %6 : vector<1x32xf32> to vector<16x32xf32>
    %25 = arith.addf %23, %24 : vector<16x32xf32>
    %cst_35 = arith.constant dense<0.000000e+00> : vector<16xf32>
    %26 = vector.multi_reduction <add>, %20, %cst_35 [1] : vector<16x32xf32> to vector<16xf32>
    %27 = vector.shape_cast %26 : vector<16xf32> to vector<16x1xf32>
    %cst_36 = arith.constant dense<0.000000e+00> : vector<16xf32>
    %28 = vector.multi_reduction <add>, %25, %cst_36 [1] : vector<16x32xf32> to vector<16xf32>
    %29 = vector.shape_cast %28 : vector<16xf32> to vector<16x1xf32>
    %30 = arith.addf %27, %29 : vector<16x1xf32>
    %cst_37 = arith.constant 1.562500e-02 : f32
    %31 = vector.broadcast %cst_37 : f32 to vector<16x1xf32>
    %32 = arith.mulf %30, %31 : vector<16x1xf32>
    %33 = vector.broadcast %32 : vector<16x1xf32> to vector<16x32xf32>
    %34 = arith.subf %20, %33 : vector<16x32xf32>
    %35 = vector.broadcast %32 : vector<16x1xf32> to vector<16x32xf32>
    %36 = arith.subf %25, %35 : vector<16x32xf32>
    %37 = arith.mulf %34, %34 : vector<16x32xf32>
    %cst_38 = arith.constant dense<0.000000e+00> : vector<16xf32>
    %38 = vector.multi_reduction <add>, %37, %cst_38 [1] : vector<16x32xf32> to vector<16xf32>
    %39 = vector.shape_cast %38 : vector<16xf32> to vector<16x1xf32>
    %40 = arith.mulf %36, %36 : vector<16x32xf32>
    %cst_39 = arith.constant dense<0.000000e+00> : vector<16xf32>
    %41 = vector.multi_reduction <add>, %40, %cst_39 [1] : vector<16x32xf32> to vector<16xf32>
    %42 = vector.shape_cast %41 : vector<16xf32> to vector<16x1xf32>
    %43 = arith.addf %39, %42 : vector<16x1xf32>
    %cst_40 = arith.constant 1.562500e-02 : f32
    %44 = vector.broadcast %cst_40 : f32 to vector<16x1xf32>
    %45 = arith.mulf %43, %44 : vector<16x1xf32>
    %cst_41 = arith.constant 9.99999974E-6 : f32
    %46 = vector.broadcast %cst_41 : f32 to vector<16x1xf32>
    %47 = arith.addf %45, %46 : vector<16x1xf32>
    %48 = math.rsqrt %47 : vector<16x1xf32>
    %49 = vector.broadcast %48 : vector<16x1xf32> to vector<16x32xf32>
    %50 = arith.mulf %34, %49 : vector<16x32xf32>
    %51 = vector.broadcast %7 : vector<1x32xf32> to vector<16x32xf32>
    %52 = arith.mulf %50, %51 : vector<16x32xf32>
    %53 = vector.broadcast %8 : vector<1x32xf32> to vector<16x32xf32>
    %54 = arith.addf %52, %53 : vector<16x32xf32>
    %55 = vector.broadcast %48 : vector<16x1xf32> to vector<16x32xf32>
    %56 = arith.mulf %36, %55 : vector<16x32xf32>
    %57 = vector.broadcast %9 : vector<1x32xf32> to vector<16x32xf32>
    %58 = arith.mulf %56, %57 : vector<16x32xf32>
    %59 = vector.broadcast %10 : vector<1x32xf32> to vector<16x32xf32>
    %60 = arith.addf %58, %59 : vector<16x32xf32>
    %cst_42 = arith.constant dense<0.000000e+00> : vector<16x32xf32>
    %61 = tpu.matmul %54, %11, %cst_42 {dimension_numbers = #tpu.dot_dimension_numbers<[1], [0], [0], [1], [0, 0, 1, 1], [], []>} : vector<16x32xf32>, vector<32x32xf32>, vector<16x32xf32> -> vector<16x32xf32>
    %cst_43 = arith.constant dense<0.000000e+00> : vector<16x32xf32>
    %62 = tpu.matmul %60, %12, %cst_43 {dimension_numbers = #tpu.dot_dimension_numbers<[1], [0], [0], [1], [0, 0, 1, 1], [], []>} : vector<16x32xf32>, vector<32x32xf32>, vector<16x32xf32> -> vector<16x32xf32>
    %63 = arith.addf %61, %62 : vector<16x32xf32>
    %64 = vector.broadcast %13 : vector<1x32xf32> to vector<16x32xf32>
    %65 = arith.addf %63, %64 : vector<16x32xf32>
    %cst_44 = arith.constant 0.000000e+00 : f32
    %66 = vector.broadcast %cst_44 : f32 to vector<16x32xf32>
    %67 = arith.maximumf %65, %66 : vector<16x32xf32>
    %cst_45 = arith.constant dense<0.000000e+00> : vector<16x32xf32>
    %68 = tpu.matmul %67, %14, %cst_45 {dimension_numbers = #tpu.dot_dimension_numbers<[1], [0], [0], [1], [0, 0, 1, 1], [], []>} : vector<16x32xf32>, vector<32x32xf32>, vector<16x32xf32> -> vector<16x32xf32>
    %69 = vector.broadcast %15 : vector<1x32xf32> to vector<16x32xf32>
    %70 = arith.addf %68, %69 : vector<16x32xf32>
    %cst_46 = arith.constant 0.000000e+00 : f32
    %71 = vector.broadcast %cst_46 : f32 to vector<16x32xf32>
    %72 = arith.maximumf %70, %71 : vector<16x32xf32>
    %cst_47 = arith.constant dense<0.000000e+00> : vector<16x128xf32>
    %73 = tpu.matmul %72, %16, %cst_47 {dimension_numbers = #tpu.dot_dimension_numbers<[1], [0], [0], [1], [0, 0, 1, 1], [], []>} : vector<16x32xf32>, vector<32x128xf32>, vector<16x128xf32> -> vector<16x128xf32>
    %74 = vector.broadcast %17 : vector<1x128xf32> to vector<16x128xf32>
    %75 = arith.addf %73, %74 : vector<16x128xf32>
    %c0_48 = arith.constant 0 : index
    %c0_49 = arith.constant 0 : index
    %76 = vector.load %arg19[%c0_48, %c0_49] : memref<16x128xf32, #tpu.memory_space<vmem>>, vector<16x128xf32>
    tpu.vector_store %arg19[%c0_48, %c0_49], %75 {strides = array<i32>} : memref<16x128xf32, #tpu.memory_space<vmem>>, vector<16x128xf32>,
    %77 = tpu.iota {dimensions = array<i32: 1>} : vector<16x128xi32>
    %c6_i32 = arith.constant 6 : i32
    %78 = vector.broadcast %c6_i32 : i32 to vector<16x128xi32>
    %79 = arith.cmpi slt, %77, %78 : vector<16x128xi32>
    %cst_50 = arith.constant -1.000000e+30 : f32
    %80 = vector.broadcast %cst_50 : f32 to vector<16x128xf32>
    %81 = arith.select %79, %75, %80 : vector<16x128xi1>, vector<16x128xf32>
    %cst_51 = arith.constant dense<0xFF800000> : vector<16xf32>
    %82 = vector.multi_reduction <maximumf>, %81, %cst_51 [1] : vector<16x128xf32> to vector<16xf32>
    %83 = vector.shape_cast %82 : vector<16xf32> to vector<16x1xf32>
    %84 = vector.broadcast %83 : vector<16x1xf32> to vector<16x128xf32>
    %85 = arith.subf %81, %84 : vector<16x128xf32>
    %86 = math.exp %85 : vector<16x128xf32>
    %cst_52 = arith.constant 0.000000e+00 : f32
    %87 = vector.broadcast %cst_52 : f32 to vector<16x128xf32>
    %88 = arith.select %79, %86, %87 : vector<16x128xi1>, vector<16x128xf32>
    %cst_53 = arith.constant dense<0.000000e+00> : vector<16xf32>
    %89 = vector.multi_reduction <add>, %88, %cst_53 [1] : vector<16x128xf32> to vector<16xf32>
    %90 = vector.shape_cast %89 : vector<16xf32> to vector<16x1xf32>
    %91 = math.log %90 : vector<16x1xf32>
    %92 = vector.broadcast %91 : vector<16x1xf32> to vector<16x128xf32>
    %93 = arith.subf %85, %92 : vector<16x128xf32>
    %94 = vector.broadcast %2 : vector<16x1xi32> to vector<16x128xi32>
    %95 = arith.cmpi eq, %77, %94 : vector<16x128xi32>
    %96 = arith.extui %95 : vector<16x128xi1> to vector<16x128xi32>
    %97 = arith.sitofp %96 : vector<16x128xi32> to vector<16x128xf32>
    %98 = arith.mulf %97, %93 : vector<16x128xf32>
    %cst_54 = arith.constant dense<0.000000e+00> : vector<16xf32>
    %99 = vector.multi_reduction <add>, %98, %cst_54 [1] : vector<16x128xf32> to vector<16xf32>
    %100 = vector.shape_cast %99 : vector<16xf32> to vector<16x1xf32>
    %cst_55 = arith.constant 0.000000e+00 : f32
    %101 = vector.broadcast %cst_55 : f32 to vector<16x1xf32>
    %102 = arith.subf %101, %100 : vector<16x1xf32>
    %103 = vector.shape_cast %102 : vector<16x1xf32> to vector<16x1xf32>
    %104 = vector.broadcast %103 : vector<16x1xf32> to vector<16x128xf32>
    %c0_56 = arith.constant 0 : index
    %c0_57 = arith.constant 0 : index
    %105 = vector.load %arg20[%c0_56, %c0_57] : memref<16x128xf32, #tpu.memory_space<vmem>>, vector<16x128xf32>
    tpu.vector_store %arg20[%c0_56, %c0_57], %104 {strides = array<i32>} : memref<16x128xf32, #tpu.memory_space<vmem>>, vector<16x128xf32>,
    return
  }
  func.func @transform_0(%arg0: i32) -> (i32, i32) {
    %c0_i32 = arith.constant 0 : i32
    %c0_i32_0 = arith.constant 0 : i32
    return %arg0, %c0_i32 : i32, i32
  }
  func.func @transform_1(%arg0: i32) -> (i32, i32) {
    %c0_i32 = arith.constant 0 : i32
    %c0_i32_0 = arith.constant 0 : i32
    return %arg0, %c0_i32 : i32, i32
  }
  func.func @transform_2(%arg0: i32) -> (i32, i32) {
    %c0_i32 = arith.constant 0 : i32
    %c0_i32_0 = arith.constant 0 : i32
    return %arg0, %c0_i32 : i32, i32
  }
  func.func @transform_3(%arg0: i32) -> (i32, i32) {
    %c0_i32 = arith.constant 0 : i32
    %c0_i32_0 = arith.constant 0 : i32
    %c0_i32_1 = arith.constant 0 : i32
    return %c0_i32, %c0_i32_0 : i32, i32
  }
  func.func @transform_4(%arg0: i32) -> (i32, i32) {
    %c0_i32 = arith.constant 0 : i32
    %c0_i32_0 = arith.constant 0 : i32
    %c0_i32_1 = arith.constant 0 : i32
    return %c0_i32, %c0_i32_0 : i32, i32
  }
  func.func @transform_5(%arg0: i32) -> (i32, i32) {
    %c0_i32 = arith.constant 0 : i32
    %c0_i32_0 = arith.constant 0 : i32
    %c0_i32_1 = arith.constant 0 : i32
    return %c0_i32, %c0_i32_0 : i32, i32
  }
  func.func @transform_6(%arg0: i32) -> (i32, i32) {
    %c0_i32 = arith.constant 0 : i32
    %c0_i32_0 = arith.constant 0 : i32
    %c0_i32_1 = arith.constant 0 : i32
    return %c0_i32, %c0_i32_0 : i32, i32
  }
  func.func @transform_7(%arg0: i32) -> (i32, i32) {
    %c0_i32 = arith.constant 0 : i32
    %c0_i32_0 = arith.constant 0 : i32
    %c0_i32_1 = arith.constant 0 : i32
    return %c0_i32, %c0_i32_0 : i32, i32
  }
  func.func @transform_8(%arg0: i32) -> (i32, i32) {
    %c0_i32 = arith.constant 0 : i32
    %c0_i32_0 = arith.constant 0 : i32
    %c0_i32_1 = arith.constant 0 : i32
    return %c0_i32, %c0_i32_0 : i32, i32
  }
  func.func @transform_9(%arg0: i32) -> (i32, i32) {
    %c0_i32 = arith.constant 0 : i32
    %c0_i32_0 = arith.constant 0 : i32
    %c0_i32_1 = arith.constant 0 : i32
    return %c0_i32, %c0_i32_0 : i32, i32
  }
  func.func @transform_10(%arg0: i32) -> (i32, i32) {
    %c0_i32 = arith.constant 0 : i32
    %c0_i32_0 = arith.constant 0 : i32
    %c0_i32_1 = arith.constant 0 : i32
    return %c0_i32, %c0_i32_0 : i32, i32
  }
  func.func @transform_11(%arg0: i32) -> (i32, i32) {
    %c0_i32 = arith.constant 0 : i32
    %c0_i32_0 = arith.constant 0 : i32
    %c0_i32_1 = arith.constant 0 : i32
    return %c0_i32, %c0_i32_0 : i32, i32
  }
  func.func @transform_12(%arg0: i32) -> (i32, i32) {
    %c0_i32 = arith.constant 0 : i32
    %c0_i32_0 = arith.constant 0 : i32
    %c0_i32_1 = arith.constant 0 : i32
    return %c0_i32, %c0_i32_0 : i32, i32
  }
  func.func @transform_13(%arg0: i32) -> (i32, i32) {
    %c0_i32 = arith.constant 0 : i32
    %c0_i32_0 = arith.constant 0 : i32
    %c0_i32_1 = arith.constant 0 : i32
    return %c0_i32, %c0_i32_0 : i32, i32
  }
  func.func @transform_14(%arg0: i32) -> (i32, i32) {
    %c0_i32 = arith.constant 0 : i32
    %c0_i32_0 = arith.constant 0 : i32
    %c0_i32_1 = arith.constant 0 : i32
    return %c0_i32, %c0_i32_0 : i32, i32
  }
  func.func @transform_15(%arg0: i32) -> (i32, i32) {
    %c0_i32 = arith.constant 0 : i32
    %c0_i32_0 = arith.constant 0 : i32
    %c0_i32_1 = arith.constant 0 : i32
    return %c0_i32, %c0_i32_0 : i32, i32
  }
  func.func @transform_16(%arg0: i32) -> (i32, i32) {
    %c0_i32 = arith.constant 0 : i32
    %c0_i32_0 = arith.constant 0 : i32
    %c0_i32_1 = arith.constant 0 : i32
    return %c0_i32, %c0_i32_0 : i32, i32
  }
  func.func @transform_17(%arg0: i32) -> (i32, i32) {
    %c0_i32 = arith.constant 0 : i32
    %c0_i32_0 = arith.constant 0 : i32
    %c0_i32_1 = arith.constant 0 : i32
    return %c0_i32, %c0_i32_0 : i32, i32
  }
  func.func @transform_18(%arg0: i32) -> (i32, i32) {
    %c0_i32 = arith.constant 0 : i32
    %c0_i32_0 = arith.constant 0 : i32
    return %arg0, %c0_i32 : i32, i32
  }
  func.func @transform_19(%arg0: i32) -> (i32, i32) {
    %c0_i32 = arith.constant 0 : i32
    %c0_i32_0 = arith.constant 0 : i32
    return %arg0, %c0_i32 : i32, i32
  }
}

</mosaic_0001>

<bundles_post_ra>
// kernel: _rvs_forward_impl.4
= control target key start
LH: loop header
LB: loop body
LE: loop exit
PB: predicated region body
PF: predicated region fallthrough
CT: control target
= control target key end

     0   :  { %s1681_s12 = smov 0   ;;  %s2018_s0 = inlined_call_operand.vmem [shape: bf16[1024,256], index: 0, kind: input, shape index: {}]   ;;  %s2019_s1 = inlined_call_operand.vmem [shape: bf16[256,128], index: 1, kind: input, shape index: {}]   ;;  %s2020_s2 = inlined_call_operand.vmem [shape: f32[1,128], index: 2, kind: input, shape index: {}]   ;;  %s2021_s3 = inlined_call_operand.vmem [shape: f32[1024,128], index: 3, kind: output, shape index: {}]  }
   0x1 LB: > { %s1215_s13 = sadd.s32 4294967295, %s1659_s12   ;;  %p1219_p0 = scmp.ge.s32.totalorder %s1659_s12, 1  ;;  %s1659_s12 = sphi %s1681_s12, %s13_s12  }
   0x2   : > { %p139_p1 = scmp.lt.s32.totalorder %s1659_s12, 3 }
   0x4   : > { %p140_p2 = pnand %p1219_p0, %p139_p1 }
   0x5   : > { %s1220_s26 = sshll.u32 (!%p140_p2), %s1215_s13, 6 }
   0x6   : > { %143 = sbr.rel (%p140_p2) target bundleno = 430 (0x1ae), region = 32  ;;  %p165_p3 = scmp.lt.s32.totalorder (!%p140_p2), %s1220_s26, 127 }
   0xb   : > { %v1619_v0 = vld [vmem:[%s2019_s1 + $0x38] sm:$0xff]  ;;  %v1618_v2 = vld [vmem:[%s2019_s1 + $0x30] sm:$0xff]  ;;  %v1617_v4 = vld [vmem:[%s2019_s1 + $0x28] sm:$0xff]  ;;  %s2023_s26 = smov (!%p165_p3, %s1220_s26), 127 }
   0xc   : > { %v1627_v1 = vld [vmem:[%s2019_s1 + $0x78] sm:$0xff]  ;;  %693 = vmatpush.bf16.msra.mxu0 %v1619_v0  ;;  %1628 = vmatpush.bf16.msra.mxu2 %v1619_v0  ;;  %v1626_v3 = vld [vmem:[%s2019_s1 + $0x70] sm:$0xff]  ;;  %v1625_v5 = vld [vmem:[%s2019_s1 + $0x68] sm:$0xff]  ;;  %s1547_s13 = sshll.u32 %s2023_s26, 3 }
   0xd   : > { %862 = vmatpush.bf16.msra.mxu1 %v1627_v1  ;;  %1636 = vmatpush.bf16.msra.mxu3 %v1627_v1  ;;  %v1616_v6 = vld [vmem:[%s2019_s1 + $0x20] sm:$0xff]  ;;  %v1615_v8 = vld [vmem:[%s2019_s1 + $0x18] sm:$0xff]  ;;  %v1614_v10 = vld [vmem:[%s2019_s1 + $0x10] sm:$0xff]  ;;  %s1736_s18 = scalar_lea.vmem %s2018_s0, %s1547_s13  ;;  %s1830_s30 = scalar_lea.vmem %s2021_s3, %s1547_s13 }
   0xe   : > { %v1624_v7 = vld [vmem:[%s2019_s1 + $0x60] sm:$0xff]  ;;  %v1623_v9 = vld [vmem:[%s2019_s1 + $0x58] sm:$0xff]  ;;  %v1622_v11 = vld [vmem:[%s2019_s1 + $0x50] sm:$0xff] }
   0xf   : > { %v1613_v12 = vld [vmem:[%s2019_s1 + $0x8] sm:$0xff]  ;;  %v1612_v14 = vld [vmem:[%s2019_s1] sm:$0xff]  ;;  %v1235_v28 = vld [vmem:[%s1736_s18 + $0x10] sm:$0xf] }
  0x10   : > { %694 = vmatpush.bf16.msra.mxu0 %v1618_v2  ;;  %1629 = vmatpush.bf16.msra.mxu2 %v1618_v2  ;;  %v1621_v13 = vld [vmem:[%s2019_s1 + $0x48] sm:$0xff]  ;;  %v1620_v15 = vld [vmem:[%s2019_s1 + $0x40] sm:$0xff]  ;;  %v1551_v29 = vld [vmem:[%s1736_s18 + $0x14] sm:$0xf0] }
  0x11   : > { %863 = vmatpush.bf16.msra.mxu1 %v1626_v3  ;;  %1637 = vmatpush.bf16.msra.mxu3 %v1626_v3  ;;  %v1227_v16 = vld [vmem:[%s1736_s18] sm:$0xf]  ;;  %v1549_v17 = vld [vmem:[%s1736_s18 + $0x4] sm:$0xf0]  ;;  %v1548_v20 = vld [vmem:[%s1736_s18 + $0x4] sm:$0xf]  ;;  %v1236_v36 = vor.u32 %v1551_v29, %v1235_v28 }
  0x12   : > { %v1355_v18 = vld [vmem:[%s1736_s18 + $0x100] sm:$0xf]  ;;  %v1581_v19 = vld [vmem:[%s1736_s18 + $0x104] sm:$0xf0]  ;;  %v1229_v21 = vld [vmem:[%s1736_s18 + $0x8] sm:$0xf0]  ;;  %v1228_v24 = vor.u32 %v1549_v17, %v1227_v16 }
  0x13   : > { %v1580_v22 = vld [vmem:[%s1736_s18 + $0x104] sm:$0xf]  ;;  %v1357_v23 = vld [vmem:[%s1736_s18 + $0x108] sm:$0xf0]  ;;  %v1356_v25 = vor.u32 %v1581_v19, %v1355_v18  ;;  %v1232_v26 = vor.u32 %v1548_v20, %v1229_v21  ;;  %v1363_v30 = vld [vmem:[%s1736_s18 + $0x110] sm:$0xf] }
  0x14   : > { %695 = vmatpush.bf16.msra.mxu0 %v1617_v4  ;;  %1630 = vmatpush.bf16.msra.mxu2 %v1617_v4  ;;  %v1360_v27 = vor.u32 %v1580_v22, %v1357_v23  ;;  %v1583_v31 = vld [vmem:[%s1736_s18 + $0x114] sm:$0xf0]  ;;  %v1550_v32 = vld [vmem:[%s1736_s18 + $0x14] sm:$0xf]  ;;  %v1237_v33 = vld [vmem:[%s1736_s18 + $0x18] sm:$0xf0] }
  0x15   : > { %864 = vmatpush.bf16.msra.mxu1 %v1625_v5  ;;  %1638 = vmatpush.bf16.msra.mxu3 %v1625_v5  ;;  %v1582_v34 = vld [vmem:[%s1736_s18 + $0x114] sm:$0xf]  ;;  %v1365_v35 = vld [vmem:[%s1736_s18 + $0x118] sm:$0xf0]  ;;  %v1364_v37 = vor.u32 %v1583_v31, %v1363_v30  ;;  %v1240_v38 = vor.u32 %v1550_v32, %v1237_v33  ;;  %v1243_v40 = vld [vmem:[%s1736_s18 + $0x20] sm:$0xf] }
  0x16   : > { %v1368_v39 = vor.u32 %v1582_v34, %v1365_v35  ;;  %v1553_v41 = vld [vmem:[%s1736_s18 + $0x24] sm:$0xf0]  ;;  %v1371_v42 = vld [vmem:[%s1736_s18 + $0x120] sm:$0xf]  ;;  %v1552_v44 = vld [vmem:[%s1736_s18 + $0x24] sm:$0xf] }
  0x17   : > { %v1585_v43 = vld [vmem:[%s1736_s18 + $0x124] sm:$0xf0]  ;;  %v1245_v45 = vld [vmem:[%s1736_s18 + $0x28] sm:$0xf0]  ;;  %v1584_v46 = vld [vmem:[%s1736_s18 + $0x124] sm:$0xf]  ;;  %v1244_v48 = vor.u32 %v1553_v41, %v1243_v40 }
  0x18   : > { %696 = vmatpush.bf16.msra.mxu0 %v1616_v6  ;;  %1631 = vmatpush.bf16.msra.mxu2 %v1616_v6  ;;  %v1373_v47 = vld [vmem:[%s1736_s18 + $0x128] sm:$0xf0]  ;;  %v1372_v49 = vor.u32 %v1585_v43, %v1371_v42  ;;  %v1248_v50 = vor.u32 %v1552_v44, %v1245_v45  ;;  %v1251_v52 = vld [vmem:[%s1736_s18 + $0x30] sm:$0xf]  ;;  %v1555_v53 = vld [vmem:[%s1736_s18 + $0x34] sm:$0xf0] }
  0x19   : > { %865 = vmatpush.bf16.msra.mxu1 %v1624_v7  ;;  %1639 = vmatpush.bf16.msra.mxu3 %v1624_v7  ;;  %v1376_v51 = vor.u32 %v1584_v46, %v1373_v47  ;;  %v1379_v54 = vld [vmem:[%s1736_s18 + $0x130] sm:$0xf]  ;;  %v1587_v55 = vld [vmem:[%s1736_s18 + $0x134] sm:$0xf0]  ;;  %v1554_v56 = vld [vmem:[%s1736_s18 + $0x34] sm:$0xf]  ;;  %v1252_v60 = vor.u32 %v1555_v53, %v1251_v52 }
  0x1a   : > { %v1253_v57 = vld [vmem:[%s1736_s18 + $0x38] sm:$0xf0]  ;;  %v1586_v58 = vld [vmem:[%s1736_s18 + $0x134] sm:$0xf]  ;;  %v1380_v61 = vor.u32 %v1587_v55, %v1379_v54  ;;  %v1259_v0 = vld [vmem:[%s1736_s18 + $0x40] sm:$0xf] }
  0x1b   : > { %v1381_v59 = vld [vmem:[%s1736_s18 + $0x138] sm:$0xf0]  ;;  %v1256_v62 = vor.u32 %v1554_v56, %v1253_v57  ;;  %v1557_v1 = vld [vmem:[%s1736_s18 + $0x44] sm:$0xf0]  ;;  %v1387_v2 = vld [vmem:[%s1736_s18 + $0x140] sm:$0xf] }
  0x1c   : > { %697 = vmatpush.bf16.msra.mxu0 %v1615_v8  ;;  %1632 = vmatpush.bf16.msra.mxu2 %v1615_v8  ;;  %v1384_v63 = vor.u32 %v1586_v58, %v1381_v59  ;;  %v1589_v3 = vld [vmem:[%s1736_s18 + $0x144] sm:$0xf0]  ;;  %v1556_v4 = vld [vmem:[%s1736_s18 + $0x44] sm:$0xf]  ;;  %v1261_v5 = vld [vmem:[%s1736_s18 + $0x48] sm:$0xf0]  ;;  %v1260_v8 = vor.u32 %v1557_v1, %v1259_v0 }
  0x1d   : > { %866 = vmatpush.bf16.msra.mxu1 %v1623_v9  ;;  %1640 = vmatpush.bf16.msra.mxu3 %v1623_v9  ;;  %v1588_v6 = vld [vmem:[%s1736_s18 + $0x144] sm:$0xf]  ;;  %v1389_v7 = vld [vmem:[%s1736_s18 + $0x148] sm:$0xf0]  ;;  %v1388_v9 = vor.u32 %v1589_v3, %v1387_v2  ;;  %v1558_v16 = vld [vmem:[%s1736_s18 + $0x54] sm:$0xf] }
  0x1e   : > { %v1269_v17 = vld [vmem:[%s1736_s18 + $0x58] sm:$0xf0]  ;;  %v1590_v18 = vld [vmem:[%s1736_s18 + $0x154] sm:$0xf]  ;;  %v1560_v28 = vld [vmem:[%s1736_s18 + $0x64] sm:$0xf] }
  0x1f   : > { %v1397_v19 = vld [vmem:[%s1736_s18 + $0x158] sm:$0xf0]  ;;  %v1272_v22 = vor.u32 %v1558_v16, %v1269_v17  ;;  %v1277_v29 = vld [vmem:[%s1736_s18 + $0x68] sm:$0xf0]  ;;  %v1592_v30 = vld [vmem:[%s1736_s18 + $0x164] sm:$0xf] }
  0x20   : > { %698 = vmatpush.bf16.msra.mxu0 %v1614_v10  ;;  %1633 = vmatpush.bf16.msra.mxu2 %v1614_v10  ;;  %v1264_v10 = vor.u32 %v1556_v4, %v1261_v5  ;;  %v1400_v23 = vor.u32 %v1590_v18, %v1397_v19  ;;  %v1405_v31 = vld [vmem:[%s1736_s18 + $0x168] sm:$0xf0]  ;;  %v1280_v34 = vor.u32 %v1560_v28, %v1277_v29  ;;  %v1562_v40 = vld [vmem:[%s1736_s18 + $0x74] sm:$0xf]  ;;  %v1285_v41 = vld [vmem:[%s1736_s18 + $0x78] sm:$0xf0] }
  0x21   : > { %867 = vmatpush.bf16.msra.mxu1 %v1622_v11  ;;  %1641 = vmatpush.bf16.msra.mxu3 %v1622_v11  ;;  %v1392_v11 = vor.u32 %v1588_v6, %v1389_v7  ;;  %v1408_v35 = vor.u32 %v1592_v30, %v1405_v31  ;;  %v1594_v42 = vld [vmem:[%s1736_s18 + $0x174] sm:$0xf]  ;;  %v1413_v43 = vld [vmem:[%s1736_s18 + $0x178] sm:$0xf0]  ;;  %v1288_v46 = vor.u32 %v1562_v40, %v1285_v41  ;;  %v1597_v52 = vld [vmem:[%s1736_s18 + $0x184] sm:$0xf0] }
  0x22   : > { %v1416_v47 = vor.u32 %v1594_v42, %v1413_v43  ;;  %v1564_v53 = vld [vmem:[%s1736_s18 + $0x84] sm:$0xf]  ;;  %v1293_v54 = vld [vmem:[%s1736_s18 + $0x88] sm:$0xf0]  ;;  %v1301_v16 = vld [vmem:[%s1736_s18 + $0x98] sm:$0xf0] }
  0x23   : > { %v1596_v55 = vld [vmem:[%s1736_s18 + $0x184] sm:$0xf]  ;;  %v1421_v56 = vld [vmem:[%s1736_s18 + $0x188] sm:$0xf0]  ;;  %v1598_v18 = vld [vmem:[%s1736_s18 + $0x194] sm:$0xf] }
  0x24   : > { %699 = vmatpush.bf16.msra.mxu0 %v1613_v12  ;;  %1634 = vmatpush.bf16.msra.mxu2 %v1613_v12  ;;  %v1267_v12 = vld [vmem:[%s1736_s18 + $0x50] sm:$0xf]  ;;  %v1429_v19 = vld [vmem:[%s1736_s18 + $0x198] sm:$0xf0]  ;;  %v1307_v41 = vld [vmem:[%s1736_s18 + $0xa0] sm:$0xf] }
  0x25   : > { %868 = vmatpush.bf16.msra.mxu1 %v1621_v13  ;;  %1642 = vmatpush.bf16.msra.mxu3 %v1621_v13  ;;  %v1559_v13 = vld [vmem:[%s1736_s18 + $0x54] sm:$0xf0] }
  0x26   : > { %v1268_v20 = vor.u32 %v1559_v13, %v1267_v12  ;;  %v1567_v12 = vld [vmem:[%s1736_s18 + $0x94] sm:$0xf0]  ;;  %v1427_v13 = vld [vmem:[%s1736_s18 + $0x190] sm:$0xf] }
  0x28   : > { %700 = vmatpush.bf16.msra.mxu0 %v1612_v14  ;;  %1635 = vmatpush.bf16.msra.mxu2 %v1612_v14  ;;  %v1395_v14 = vld [vmem:[%s1736_s18 + $0x150] sm:$0xf] }
  0x29   : > { %869 = vmatpush.bf16.msra.mxu1 %v1620_v15  ;;  %1643 = vmatpush.bf16.msra.mxu3 %v1620_v15  ;;  %v1591_v15 = vld [vmem:[%s1736_s18 + $0x154] sm:$0xf0] }
  0x2a   : > { %v1396_v21 = vor.u32 %v1591_v15, %v1395_v14  ;;  %v1599_v14 = vld [vmem:[%s1736_s18 + $0x194] sm:$0xf0]  ;;  %v1566_v15 = vld [vmem:[%s1736_s18 + $0x94] sm:$0xf] }
  0x2b   : > { %701 = vmatmul.bf16.vlgmr.msra.gmra.mxu0 %v1228_v24  ;;  %781 = vmatmul.bf16.vlgmr.msra.gmra.mxu2 %v1356_v25  ;;  %v1275_v24 = vld [vmem:[%s1736_s18 + $0x60] sm:$0xf]  ;;  %v1561_v25 = vld [vmem:[%s1736_s18 + $0x64] sm:$0xf0] }
  0x2c   : > { %870 = vmatmul.bf16.vlgmr.msra.gmra.mxu1 %v1232_v26  ;;  %950 = vmatmul.bf16.vlgmr.msra.gmra.mxu3 %v1360_v27  ;;  %v1403_v26 = vld [vmem:[%s1736_s18 + $0x160] sm:$0xf]  ;;  %v1593_v27 = vld [vmem:[%s1736_s18 + $0x164] sm:$0xf0]  ;;  %v1276_v32 = vor.u32 %v1561_v25, %v1275_v24  ;;  %v1428_v24 = vor.u32 %v1599_v14, %v1427_v13  ;;  %v1571_v13 = vld [vmem:[%s1736_s18 + $0xb4] sm:$0xf0] }
  0x2d   : > { %v1404_v33 = vor.u32 %v1593_v27, %v1403_v26  ;;  %v1304_v26 = vor.u32 %v1566_v15, %v1301_v16  ;;  %v1432_v27 = vor.u32 %v1598_v18, %v1429_v19  ;;  %v1443_v14 = vld [vmem:[%s1736_s18 + $0x1b0] sm:$0xf]  ;;  %v1603_v15 = vld [vmem:[%s1736_s18 + $0x1b4] sm:$0xf0]  ;;  %v1570_v16 = vld [vmem:[%s1736_s18 + $0xb4] sm:$0xf] }
  0x2e   : > { %v1602_v19 = vld [vmem:[%s1736_s18 + $0x1b4] sm:$0xf] }
  0x3b   : > { %706 = vmatmul.bf16.gmra.mxu0 %v1236_v36  ;;  %786 = vmatmul.bf16.gmra.mxu2 %v1364_v37  ;;  %v1283_v36 = vld [vmem:[%s1736_s18 + $0x70] sm:$0xf]  ;;  %v1563_v37 = vld [vmem:[%s1736_s18 + $0x74] sm:$0xf0] }
  0x3c   : > { %875 = vmatmul.bf16.gmra.mxu1 %v1240_v38  ;;  %955 = vmatmul.bf16.gmra.mxu3 %v1368_v39  ;;  %v1411_v38 = vld [vmem:[%s1736_s18 + $0x170] sm:$0xf]  ;;  %v1595_v39 = vld [vmem:[%s1736_s18 + $0x174] sm:$0xf0]  ;;  %v1284_v44 = vor.u32 %v1563_v37, %v1283_v36 }
  0x3d   : > { %v1412_v45 = vor.u32 %v1595_v39, %v1411_v38 }
  0x4b   : > { %711 = vmatmul.bf16.gmra.mxu0 %v1244_v48  ;;  %791 = vmatmul.bf16.gmra.mxu2 %v1372_v49  ;;  %v1814_v48 = vld [vmem:[%s2020_s2] ss:$0 sm:$0xff] }
  0x4c   : > { %880 = vmatmul.bf16.gmra.mxu1 %v1248_v50  ;;  %960 = vmatmul.bf16.gmra.mxu3 %v1376_v51  ;;  %v1291_v49 = vld [vmem:[%s1736_s18 + $0x80] sm:$0xf]  ;;  %v1565_v50 = vld [vmem:[%s1736_s18 + $0x84] sm:$0xf0] }
  0x4d   : > { %v1419_v51 = vld [vmem:[%s1736_s18 + $0x180] sm:$0xf]  ;;  %v1292_v57 = vor.u32 %v1565_v50, %v1291_v49  ;;  %v1309_v49 = vld [vmem:[%s1736_s18 + $0xa8] sm:$0xf0] }
  0x4e   : > { %v1420_v58 = vor.u32 %v1597_v52, %v1419_v51  ;;  %v1600_v51 = vld [vmem:[%s1736_s18 + $0x1a4] sm:$0xf]  ;;  %v1437_v52 = vld [vmem:[%s1736_s18 + $0x1a8] sm:$0xf0] }
  0x5b   : > { %716 = vmatmul.bf16.gmra.mxu0 %v1252_v60  ;;  %796 = vmatmul.bf16.gmra.mxu2 %v1380_v61  ;;  %v1296_v60 = vor.u32 %v1564_v53, %v1293_v54  ;;  %v1424_v61 = vor.u32 %v1596_v55, %v1421_v56 }
  0x5c   : > { %885 = vmatmul.bf16.gmra.mxu1 %v1256_v62  ;;  %965 = vmatmul.bf16.gmra.mxu3 %v1384_v63 }
  0x6b   : > { %721 = vmatmul.bf16.gmra.mxu0 %v1260_v8  ;;  %801 = vmatmul.bf16.gmra.mxu2 %v1388_v9  ;;  %v1299_v9 = vld [vmem:[%s1736_s18 + $0x90] sm:$0xf] }
  0x6c   : > { %890 = vmatmul.bf16.gmra.mxu1 %v1264_v10  ;;  %970 = vmatmul.bf16.gmra.mxu3 %v1392_v11 }
  0x7b   : > { %726 = vmatmul.bf16.gmra.mxu0 %v1268_v20  ;;  %806 = vmatmul.bf16.gmra.mxu2 %v1396_v21 }
  0x7c   : > { %895 = vmatmul.bf16.gmra.mxu1 %v1272_v22  ;;  %975 = vmatmul.bf16.gmra.mxu3 %v1400_v23  ;;  %v1300_v23 = vor.u32 %v1567_v12, %v1299_v9 }
  0x8b   : > { %731 = vmatmul.bf16.gmra.mxu0 %v1276_v32  ;;  %811 = vmatmul.bf16.gmra.mxu2 %v1404_v33 }
  0x8c   : > { %900 = vmatmul.bf16.gmra.mxu1 %v1280_v34  ;;  %980 = vmatmul.bf16.gmra.mxu3 %v1408_v35 }
  0x9b   : > { %736 = vmatmul.bf16.gmra.mxu0 %v1284_v44  ;;  %816 = vmatmul.bf16.gmra.mxu2 %v1412_v45  ;;  %v1569_v44 = vld [vmem:[%s1736_s18 + $0xa4] sm:$0xf0]  ;;  %v1435_v45 = vld [vmem:[%s1736_s18 + $0x1a0] sm:$0xf] }
  0x9c   : > { %905 = vmatmul.bf16.gmra.mxu1 %v1288_v46  ;;  %985 = vmatmul.bf16.gmra.mxu3 %v1416_v47  ;;  %v1601_v46 = vld [vmem:[%s1736_s18 + $0x1a4] sm:$0xf0]  ;;  %v1568_v47 = vld [vmem:[%s1736_s18 + $0xa4] sm:$0xf]  ;;  %v1308_v56 = vor.u32 %v1569_v44, %v1307_v41 }
  0xa8   : > { %v702_v59 = vpop.f32.mrf.mxu0 }
  0xa9   : > { %v703_v62 = vadd.f32 %v1814_v48, %v702_v59  ;;  %v871_v63 = vpop.f32.mrf.mxu1  ;;  %v1312_v59 = vor.u32 %v1568_v47, %v1309_v49  ;;  %v1605_v47 = vld [vmem:[%s1736_s18 + $0x1c4] sm:$0xf0]  ;;  %v1572_v49 = vld [vmem:[%s1736_s18 + $0xc4] sm:$0xf] }
  0xab   : > { %v872_v0 = vadd.f32 %v871_v63, %v703_v62  ;;  %741 = vmatmul.bf16.gmra.mxu0 %v1292_v57  ;;  %821 = vmatmul.bf16.gmra.mxu2 %v1420_v58  ;;  %v1436_v57 = vor.u32 %v1601_v46, %v1435_v45  ;;  %v1573_v45 = vld [vmem:[%s1736_s18 + $0xc4] sm:$0xf0]  ;;  %v1451_v46 = vld [vmem:[%s1736_s18 + $0x1c0] sm:$0xf] }
  0xac   : > { %910 = vmatmul.bf16.gmra.mxu1 %v1296_v60  ;;  %990 = vmatmul.bf16.gmra.mxu3 %v1424_v61  ;;  %v1440_v60 = vor.u32 %v1600_v51, %v1437_v52  ;;  %v1604_v52 = vld [vmem:[%s1736_s18 + $0x1c4] sm:$0xf] }
  0xad   : > { %v1031_v1 = vmax.f32 %v872_v0, 0.0 }
  0xae   : > { %v782_v2 = vpop.f32.mrf.mxu2 }
  0xaf   : > { %1095 = vst [vmem:[%s1830_s30] sm:$0xff] %v1031_v1  ;;  %v783_v3 = vadd.f32 %v1814_v48, %v782_v2  ;;  %v951_v4 = vpop.f32.mrf.mxu3 }
  0xb0   : > { %v704_v5 = vpop.f32.mrf.mxu0 }
  0xb1   : > { %v952_v6 = vadd.f32 %v951_v4, %v783_v3  ;;  %v705_v7 = vadd.f32 %v1814_v48, %v704_v5  ;;  %v873_v8 = vpop.f32.mrf.mxu1 }
  0xb3   : > { %v1063_v10 = vmax.f32 %v952_v6, 0.0  ;;  %v874_v11 = vadd.f32 %v873_v8, %v705_v7 }
  0xb5   : > { %1127 = vst [vmem:[%s1830_s30 + $0x100] sm:$0xff] %v1063_v10  ;;  %v1032_v17 = vmax.f32 %v874_v11, 0.0  ;;  %v1315_v10 = vld [vmem:[%s1736_s18 + $0xb0] sm:$0xf] }
  0xb6   : > { %v784_v20 = vpop.f32.mrf.mxu2 }
  0xb7   : > { %1096 = vst [vmem:[%s1830_s30 + $0x8] sm:$0xff] %v1032_v17  ;;  %v785_v21 = vadd.f32 %v1814_v48, %v784_v20  ;;  %v953_v22 = vpop.f32.mrf.mxu3  ;;  %v1317_v17 = vld [vmem:[%s1736_s18 + $0xb8] sm:$0xf0] }
  0xb8   : > { %v707_v25 = vpop.f32.mrf.mxu0  ;;  %v1445_v20 = vld [vmem:[%s1736_s18 + $0x1b8] sm:$0xf0] }
  0xb9   : > { %v954_v28 = vadd.f32 %v953_v22, %v785_v21  ;;  %v708_v29 = vadd.f32 %v1814_v48, %v707_v25  ;;  %v876_v30 = vpop.f32.mrf.mxu1  ;;  %v1444_v25 = vor.u32 %v1603_v15, %v1443_v14  ;;  %v1575_v14 = vld [vmem:[%s1736_s18 + $0xd4] sm:$0xf0]  ;;  %v1459_v15 = vld [vmem:[%s1736_s18 + $0x1d0] sm:$0xf] }
  0xbb   : > { %v1064_v31 = vmax.f32 %v954_v28, 0.0  ;;  %v877_v32 = vadd.f32 %v876_v30, %v708_v29  ;;  %746 = vmatmul.bf16.gmra.mxu0 %v1300_v23  ;;  %826 = vmatmul.bf16.gmra.mxu2 %v1428_v24  ;;  %v1316_v24 = vor.u32 %v1571_v13, %v1315_v10  ;;  %v1448_v28 = vor.u32 %v1602_v19, %v1445_v20  ;;  %v1606_v20 = vld [vmem:[%s1736_s18 + $0x1d4] sm:$0xf] }
  0xbc   : > { %915 = vmatmul.bf16.gmra.mxu1 %v1304_v26  ;;  %995 = vmatmul.bf16.gmra.mxu3 %v1432_v27  ;;  %v1320_v27 = vor.u32 %v1570_v16, %v1317_v17  ;;  %v1607_v16 = vld [vmem:[%s1736_s18 + $0x1d4] sm:$0xf0]  ;;  %v1574_v17 = vld [vmem:[%s1736_s18 + $0xd4] sm:$0xf] }
  0xbd   : > { %1128 = vst [vmem:[%s1830_s30 + $0x108] sm:$0xff] %v1064_v31  ;;  %v1033_v33 = vmax.f32 %v877_v32, 0.0 }
  0xbe   : > { %v787_v34 = vpop.f32.mrf.mxu2 }
  0xbf   : > { %1097 = vst [vmem:[%s1830_s30 + $0x10] sm:$0xff] %v1033_v33  ;;  %v788_v35 = vadd.f32 %v1814_v48, %v787_v34  ;;  %v956_v36 = vpop.f32.mrf.mxu3 }
  0xc0   : > { %v709_v37 = vpop.f32.mrf.mxu0 }
  0xc1   : > { %v957_v38 = vadd.f32 %v956_v36, %v788_v35  ;;  %v710_v39 = vadd.f32 %v1814_v48, %v709_v37  ;;  %v878_v40 = vpop.f32.mrf.mxu1 }
  0xc3   : > { %v1065_v42 = vmax.f32 %v957_v38, 0.0  ;;  %v879_v43 = vadd.f32 %v878_v40, %v710_v39 }
  0xc5   : > { %1129 = vst [vmem:[%s1830_s30 + $0x110] sm:$0xff] %v1065_v42  ;;  %v1034_v50 = vmax.f32 %v879_v43, 0.0  ;;  %v1323_v42 = vld [vmem:[%s1736_s18 + $0xc0] sm:$0xf] }
  0xc6   : > { %v789_v53 = vpop.f32.mrf.mxu2 }
  0xc7   : > { %1098 = vst [vmem:[%s1830_s30 + $0x18] sm:$0xff] %v1034_v50  ;;  %v790_v54 = vadd.f32 %v1814_v48, %v789_v53  ;;  %v958_v55 = vpop.f32.mrf.mxu3  ;;  %v1325_v50 = vld [vmem:[%s1736_s18 + $0xc8] sm:$0xf0] }
  0xc8   : > { %v712_v58 = vpop.f32.mrf.mxu0  ;;  %v1453_v53 = vld [vmem:[%s1736_s18 + $0x1c8] sm:$0xf0] }
  0xc9   : > { %v959_v61 = vadd.f32 %v958_v55, %v790_v54  ;;  %v713_v62 = vadd.f32 %v1814_v48, %v712_v58  ;;  %v881_v63 = vpop.f32.mrf.mxu1  ;;  %v1452_v58 = vor.u32 %v1605_v47, %v1451_v46  ;;  %v1577_v46 = vld [vmem:[%s1736_s18 + $0xe4] sm:$0xf0]  ;;  %v1467_v47 = vld [vmem:[%s1736_s18 + $0x1e0] sm:$0xf] }
  0xcb   : > { %v1066_v0 = vmax.f32 %v959_v61, 0.0  ;;  %v882_v1 = vadd.f32 %v881_v63, %v713_v62  ;;  %751 = vmatmul.bf16.gmra.mxu0 %v1308_v56  ;;  %831 = vmatmul.bf16.gmra.mxu2 %v1436_v57  ;;  %v1324_v57 = vor.u32 %v1573_v45, %v1323_v42  ;;  %v1456_v61 = vor.u32 %v1604_v52, %v1453_v53  ;;  %v1608_v53 = vld [vmem:[%s1736_s18 + $0x1e4] sm:$0xf] }
  0xcc   : > { %920 = vmatmul.bf16.gmra.mxu1 %v1312_v59  ;;  %1000 = vmatmul.bf16.gmra.mxu3 %v1440_v60  ;;  %v1328_v60 = vor.u32 %v1572_v49, %v1325_v50  ;;  %v1609_v49 = vld [vmem:[%s1736_s18 + $0x1e4] sm:$0xf0]  ;;  %v1576_v50 = vld [vmem:[%s1736_s18 + $0xe4] sm:$0xf] }
  0xcd   : > { %1130 = vst [vmem:[%s1830_s30 + $0x118] sm:$0xff] %v1066_v0  ;;  %v1035_v2 = vmax.f32 %v882_v1, 0.0 }
  0xce   : > { %v792_v3 = vpop.f32.mrf.mxu2 }
  0xcf   : > { %1099 = vst [vmem:[%s1830_s30 + $0x20] sm:$0xff] %v1035_v2  ;;  %v793_v4 = vadd.f32 %v1814_v48, %v792_v3  ;;  %v961_v5 = vpop.f32.mrf.mxu3 }
  0xd0   : > { %v714_v6 = vpop.f32.mrf.mxu0 }
  0xd1   : > { %v962_v7 = vadd.f32 %v961_v5, %v793_v4  ;;  %v715_v8 = vadd.f32 %v1814_v48, %v714_v6  ;;  %v883_v9 = vpop.f32.mrf.mxu1 }
  0xd3   : > { %v1067_v11 = vmax.f32 %v962_v7, 0.0  ;;  %v884_v12 = vadd.f32 %v883_v9, %v715_v8 }
  0xd5   : > { %1131 = vst [vmem:[%s1830_s30 + $0x120] sm:$0xff] %v1067_v11  ;;  %v1036_v18 = vmax.f32 %v884_v12, 0.0  ;;  %v1331_v11 = vld [vmem:[%s1736_s18 + $0xd0] sm:$0xf] }
  0xd6   : > { %v794_v21 = vpop.f32.mrf.mxu2 }
  0xd7   : > { %1100 = vst [vmem:[%s1830_s30 + $0x28] sm:$0xff] %v1036_v18  ;;  %v795_v22 = vadd.f32 %v1814_v48, %v794_v21  ;;  %v963_v23 = vpop.f32.mrf.mxu3  ;;  %v1333_v18 = vld [vmem:[%s1736_s18 + $0xd8] sm:$0xf0] }
  0xd8   : > { %v717_v26 = vpop.f32.mrf.mxu0  ;;  %v1461_v21 = vld [vmem:[%s1736_s18 + $0x1d8] sm:$0xf0] }
  0xd9   : > { %v964_v29 = vadd.f32 %v963_v23, %v795_v22  ;;  %v718_v30 = vadd.f32 %v1814_v48, %v717_v26  ;;  %v886_v31 = vpop.f32.mrf.mxu1  ;;  %v1460_v26 = vor.u32 %v1607_v16, %v1459_v15  ;;  %v1579_v15 = vld [vmem:[%s1736_s18 + $0xf4] sm:$0xf0]  ;;  %v1475_v16 = vld [vmem:[%s1736_s18 + $0x1f0] sm:$0xf] }
  0xdb   : > { %v1068_v32 = vmax.f32 %v964_v29, 0.0  ;;  %v887_v33 = vadd.f32 %v886_v31, %v718_v30  ;;  %756 = vmatmul.bf16.gmra.mxu0 %v1316_v24  ;;  %836 = vmatmul.bf16.gmra.mxu2 %v1444_v25  ;;  %v1332_v25 = vor.u32 %v1575_v14, %v1331_v11  ;;  %v1464_v29 = vor.u32 %v1606_v20, %v1461_v21  ;;  %v1610_v21 = vld [vmem:[%s1736_s18 + $0x1f4] sm:$0xf] }
  0xdc   : > { %925 = vmatmul.bf16.gmra.mxu1 %v1320_v27  ;;  %1005 = vmatmul.bf16.gmra.mxu3 %v1448_v28  ;;  %v1336_v28 = vor.u32 %v1574_v17, %v1333_v18  ;;  %v1611_v17 = vld [vmem:[%s1736_s18 + $0x1f4] sm:$0xf0]  ;;  %v1578_v18 = vld [vmem:[%s1736_s18 + $0xf4] sm:$0xf] }
  0xdd   : > { %1132 = vst [vmem:[%s1830_s30 + $0x128] sm:$0xff] %v1068_v32  ;;  %v1037_v34 = vmax.f32 %v887_v33, 0.0 }
  0xde   : > { %v797_v35 = vpop.f32.mrf.mxu2 }
  0xdf   : > { %1101 = vst [vmem:[%s1830_s30 + $0x30] sm:$0xff] %v1037_v34  ;;  %v798_v36 = vadd.f32 %v1814_v48, %v797_v35  ;;  %v966_v37 = vpop.f32.mrf.mxu3 }
  0xe0   : > { %v719_v38 = vpop.f32.mrf.mxu0 }
  0xe1   : > { %v967_v39 = vadd.f32 %v966_v37, %v798_v36  ;;  %v720_v40 = vadd.f32 %v1814_v48, %v719_v38  ;;  %v888_v41 = vpop.f32.mrf.mxu1 }
  0xe3   : > { %v1069_v43 = vmax.f32 %v967_v39, 0.0  ;;  %v889_v44 = vadd.f32 %v888_v41, %v720_v40 }
  0xe5   : > { %1133 = vst [vmem:[%s1830_s30 + $0x130] sm:$0xff] %v1069_v43  ;;  %v1038_v51 = vmax.f32 %v889_v44, 0.0  ;;  %v1339_v43 = vld [vmem:[%s1736_s18 + $0xe0] sm:$0xf] }
  0xe6   : > { %v799_v54 = vpop.f32.mrf.mxu2 }
  0xe7   : > { %1102 = vst [vmem:[%s1830_s30 + $0x38] sm:$0xff] %v1038_v51  ;;  %v800_v55 = vadd.f32 %v1814_v48, %v799_v54  ;;  %v968_v56 = vpop.f32.mrf.mxu3  ;;  %v1341_v51 = vld [vmem:[%s1736_s18 + $0xe8] sm:$0xf0] }
  0xe8   : > { %v722_v59 = vpop.f32.mrf.mxu0  ;;  %v1469_v54 = vld [vmem:[%s1736_s18 + $0x1e8] sm:$0xf0] }
  0xe9   : > { %v969_v62 = vadd.f32 %v968_v56, %v800_v55  ;;  %v723_v63 = vadd.f32 %v1814_v48, %v722_v59  ;;  %v891_v0 = vpop.f32.mrf.mxu1  ;;  %v1468_v59 = vor.u32 %v1609_v49, %v1467_v47 }
  0xeb   : > { %v1070_v1 = vmax.f32 %v969_v62, 0.0  ;;  %v892_v2 = vadd.f32 %v891_v0, %v723_v63  ;;  %761 = vmatmul.bf16.gmra.mxu0 %v1324_v57  ;;  %841 = vmatmul.bf16.gmra.mxu2 %v1452_v58  ;;  %v1340_v58 = vor.u32 %v1577_v46, %v1339_v43  ;;  %v1472_v62 = vor.u32 %v1608_v53, %v1469_v54 }
  0xec   : > { %930 = vmatmul.bf16.gmra.mxu1 %v1328_v60  ;;  %1010 = vmatmul.bf16.gmra.mxu3 %v1456_v61  ;;  %v1344_v61 = vor.u32 %v1576_v50, %v1341_v51 }
  0xed   : > { %1134 = vst [vmem:[%s1830_s30 + $0x138] sm:$0xff] %v1070_v1  ;;  %v1039_v3 = vmax.f32 %v892_v2, 0.0 }
  0xee   : > { %v802_v4 = vpop.f32.mrf.mxu2 }
  0xef   : > { %1103 = vst [vmem:[%s1830_s30 + $0x40] sm:$0xff] %v1039_v3  ;;  %v803_v5 = vadd.f32 %v1814_v48, %v802_v4  ;;  %v971_v6 = vpop.f32.mrf.mxu3 }
  0xf0   : > { %v724_v7 = vpop.f32.mrf.mxu0 }
  0xf1   : > { %v972_v8 = vadd.f32 %v971_v6, %v803_v5  ;;  %v725_v9 = vadd.f32 %v1814_v48, %v724_v7  ;;  %v893_v10 = vpop.f32.mrf.mxu1 }
  0xf3   : > { %v1071_v12 = vmax.f32 %v972_v8, 0.0  ;;  %v894_v13 = vadd.f32 %v893_v10, %v725_v9 }
  0xf5   : > { %1135 = vst [vmem:[%s1830_s30 + $0x140] sm:$0xff] %v1071_v12  ;;  %v1040_v19 = vmax.f32 %v894_v13, 0.0  ;;  %v1347_v12 = vld [vmem:[%s1736_s18 + $0xf0] sm:$0xf] }
  0xf6   : > { %v804_v22 = vpop.f32.mrf.mxu2 }
  0xf7   : > { %1104 = vst [vmem:[%s1830_s30 + $0x48] sm:$0xff] %v1040_v19  ;;  %v805_v23 = vadd.f32 %v1814_v48, %v804_v22  ;;  %v973_v24 = vpop.f32.mrf.mxu3  ;;  %v1349_v19 = vld [vmem:[%s1736_s18 + $0xf8] sm:$0xf0] }
  0xf8   : > { %v727_v27 = vpop.f32.mrf.mxu0  ;;  %v1477_v22 = vld [vmem:[%s1736_s18 + $0x1f8] sm:$0xf0] }
  0xf9   : > { %v974_v30 = vadd.f32 %v973_v24, %v805_v23  ;;  %v728_v31 = vadd.f32 %v1814_v48, %v727_v27  ;;  %v896_v32 = vpop.f32.mrf.mxu1  ;;  %v1476_v27 = vor.u32 %v1611_v17, %v1475_v16 }
  0xfb   : > { %v1072_v33 = vmax.f32 %v974_v30, 0.0  ;;  %v897_v34 = vadd.f32 %v896_v32, %v728_v31  ;;  %766 = vmatmul.bf16.gmra.mxu0 %v1332_v25  ;;  %846 = vmatmul.bf16.gmra.mxu2 %v1460_v26  ;;  %v1348_v26 = vor.u32 %v1579_v15, %v1347_v12  ;;  %v1480_v30 = vor.u32 %v1610_v21, %v1477_v22 }
  0xfc   : > { %935 = vmatmul.bf16.gmra.mxu1 %v1336_v28  ;;  %1015 = vmatmul.bf16.gmra.mxu3 %v1464_v29  ;;  %v1352_v29 = vor.u32 %v1578_v18, %v1349_v19 }
  0xfd   : > { %1136 = vst [vmem:[%s1830_s30 + $0x148] sm:$0xff] %v1072_v33  ;;  %v1041_v35 = vmax.f32 %v897_v34, 0.0 }
  0xfe   : > { %v807_v36 = vpop.f32.mrf.mxu2 }
  0xff   : > { %1105 = vst [vmem:[%s1830_s30 + $0x50] sm:$0xff] %v1041_v35  ;;  %v808_v37 = vadd.f32 %v1814_v48, %v807_v36  ;;  %v976_v38 = vpop.f32.mrf.mxu3 }
 0x100   : > { %v729_v39 = vpop.f32.mrf.mxu0 }
 0x101   : > { %v977_v40 = vadd.f32 %v976_v38, %v808_v37  ;;  %v730_v41 = vadd.f32 %v1814_v48, %v729_v39  ;;  %v898_v42 = vpop.f32.mrf.mxu1 }
 0x103   : > { %v1073_v44 = vmax.f32 %v977_v40, 0.0  ;;  %v899_v45 = vadd.f32 %v898_v42, %v730_v41 }
 0x105   : > { %1137 = vst [vmem:[%s1830_s30 + $0x150] sm:$0xff] %v1073_v44  ;;  %v1042_v52 = vmax.f32 %v899_v45, 0.0 }
 0x106   : > { %v809_v55 = vpop.f32.mrf.mxu2 }
 0x107   : > { %1106 = vst [vmem:[%s1830_s30 + $0x58] sm:$0xff] %v1042_v52  ;;  %v810_v56 = vadd.f32 %v1814_v48, %v809_v55  ;;  %v978_v57 = vpop.f32.mrf.mxu3 }
 0x108   : > { %v732_v60 = vpop.f32.mrf.mxu0 }
 0x109   : > { %v979_v63 = vadd.f32 %v978_v57, %v810_v56  ;;  %v733_v0 = vadd.f32 %v1814_v48, %v732_v60  ;;  %v901_v1 = vpop.f32.mrf.mxu1 }
 0x10b   : > { %v1074_v2 = vmax.f32 %v979_v63, 0.0  ;;  %v902_v3 = vadd.f32 %v901_v1, %v733_v0  ;;  %771 = vmatmul.bf16.gmra.mxu0 %v1340_v58  ;;  %851 = vmatmul.bf16.gmra.mxu2 %v1468_v59 }
 0x10c   : > { %940 = vmatmul.bf16.gmra.mxu1 %v1344_v61  ;;  %1020 = vmatmul.bf16.gmra.mxu3 %v1472_v62 }
 0x10d   : > { %1138 = vst [vmem:[%s1830_s30 + $0x158] sm:$0xff] %v1074_v2  ;;  %v1043_v4 = vmax.f32 %v902_v3, 0.0 }
 0x10e   : > { %v812_v5 = vpop.f32.mrf.mxu2 }
 0x10f   : > { %1107 = vst [vmem:[%s1830_s30 + $0x60] sm:$0xff] %v1043_v4  ;;  %v813_v6 = vadd.f32 %v1814_v48, %v812_v5  ;;  %v981_v7 = vpop.f32.mrf.mxu3 }
 0x110   : > { %v734_v8 = vpop.f32.mrf.mxu0 }
 0x111   : > { %v982_v9 = vadd.f32 %v981_v7, %v813_v6  ;;  %v735_v10 = vadd.f32 %v1814_v48, %v734_v8  ;;  %v903_v11 = vpop.f32.mrf.mxu1 }
 0x113   : > { %v1075_v13 = vmax.f32 %v982_v9, 0.0  ;;  %v904_v14 = vadd.f32 %v903_v11, %v735_v10 }
 0x115   : > { %1139 = vst [vmem:[%s1830_s30 + $0x160] sm:$0xff] %v1075_v13  ;;  %v1044_v20 = vmax.f32 %v904_v14, 0.0 }
 0x116   : > { %v814_v23 = vpop.f32.mrf.mxu2 }
 0x117   : > { %1108 = vst [vmem:[%s1830_s30 + $0x68] sm:$0xff] %v1044_v20  ;;  %v815_v24 = vadd.f32 %v1814_v48, %v814_v23  ;;  %v983_v25 = vpop.f32.mrf.mxu3 }
 0x118   : > { %v737_v28 = vpop.f32.mrf.mxu0 }
 0x119   : > { %v984_v31 = vadd.f32 %v983_v25, %v815_v24  ;;  %v738_v32 = vadd.f32 %v1814_v48, %v737_v28  ;;  %v906_v33 = vpop.f32.mrf.mxu1 }
 0x11b   : > { %v1076_v34 = vmax.f32 %v984_v31, 0.0  ;;  %v907_v35 = vadd.f32 %v906_v33, %v738_v32  ;;  %776 = vmatmul.bf16.gmra.mxu0 %v1348_v26  ;;  %856 = vmatmul.bf16.gmra.mxu2 %v1476_v27 }
 0x11c   : > { %945 = vmatmul.bf16.gmra.mxu1 %v1352_v29  ;;  %1025 = vmatmul.bf16.gmra.mxu3 %v1480_v30 }
 0x11d   : > { %1140 = vst [vmem:[%s1830_s30 + $0x168] sm:$0xff] %v1076_v34  ;;  %v1045_v36 = vmax.f32 %v907_v35, 0.0 }
 0x11e   : > { %v817_v37 = vpop.f32.mrf.mxu2 }
 0x11f   : > { %1109 = vst [vmem:[%s1830_s30 + $0x70] sm:$0xff] %v1045_v36  ;;  %v818_v38 = vadd.f32 %v1814_v48, %v817_v37  ;;  %v986_v39 = vpop.f32.mrf.mxu3 }
 0x120   : > { %v739_v40 = vpop.f32.mrf.mxu0 }
 0x121   : > { %v987_v41 = vadd.f32 %v986_v39, %v818_v38  ;;  %v740_v42 = vadd.f32 %v1814_v48, %v739_v40  ;;  %v908_v43 = vpop.f32.mrf.mxu1 }
 0x123   : > { %v1077_v44 = vmax.f32 %v987_v41, 0.0  ;;  %v909_v45 = vadd.f32 %v908_v43, %v740_v42 }
 0x125   : > { %1141 = vst [vmem:[%s1830_s30 + $0x170] sm:$0xff] %v1077_v44  ;;  %v1046_v46 = vmax.f32 %v909_v45, 0.0 }
 0x126   : > { %v819_v47 = vpop.f32.mrf.mxu2 }
 0x127   : > { %1110 = vst [vmem:[%s1830_s30 + $0x78] sm:$0xff] %v1046_v46  ;;  %v820_v49 = vadd.f32 %v1814_v48, %v819_v47  ;;  %v988_v50 = vpop.f32.mrf.mxu3 }
 0x128   : > { %v742_v51 = vpop.f32.mrf.mxu0 }
 0x129   : > { %v989_v52 = vadd.f32 %v988_v50, %v820_v49  ;;  %v743_v53 = vadd.f32 %v1814_v48, %v742_v51  ;;  %v911_v54 = vpop.f32.mrf.mxu1 }
 0x12b   : > { %v1078_v55 = vmax.f32 %v989_v52, 0.0  ;;  %v912_v56 = vadd.f32 %v911_v54, %v743_v53 }
 0x12d   : > { %1142 = vst [vmem:[%s1830_s30 + $0x178] sm:$0xff] %v1078_v55  ;;  %v1047_v57 = vmax.f32 %v912_v56, 0.0 }
 0x12e   : > { %v822_v58 = vpop.f32.mrf.mxu2 }
 0x12f   : > { %1111 = vst [vmem:[%s1830_s30 + $0x80] sm:$0xff] %v1047_v57  ;;  %v823_v59 = vadd.f32 %v1814_v48, %v822_v58  ;;  %v991_v60 = vpop.f32.mrf.mxu3 }
 0x130   : > { %v744_v61 = vpop.f32.mrf.mxu0 }
 0x131   : > { %v992_v62 = vadd.f32 %v991_v60, %v823_v59  ;;  %v745_v63 = vadd.f32 %v1814_v48, %v744_v61  ;;  %v913_v0 = vpop.f32.mrf.mxu1 }
 0x133   : > { %v1079_v1 = vmax.f32 %v992_v62, 0.0  ;;  %v914_v2 = vadd.f32 %v913_v0, %v745_v63 }
 0x135   : > { %1143 = vst [vmem:[%s1830_s30 + $0x180] sm:$0xff] %v1079_v1  ;;  %v1048_v3 = vmax.f32 %v914_v2, 0.0 }
 0x136   : > { %v824_v4 = vpop.f32.mrf.mxu2 }
 0x137   : > { %1112 = vst [vmem:[%s1830_s30 + $0x88] sm:$0xff] %v1048_v3  ;;  %v825_v5 = vadd.f32 %v1814_v48, %v824_v4  ;;  %v993_v6 = vpop.f32.mrf.mxu3 }
 0x138   : > { %v747_v7 = vpop.f32.mrf.mxu0 }
 0x139   : > { %v994_v8 = vadd.f32 %v993_v6, %v825_v5  ;;  %v748_v9 = vadd.f32 %v1814_v48, %v747_v7  ;;  %v916_v10 = vpop.f32.mrf.mxu1 }
 0x13b   : > { %v1080_v11 = vmax.f32 %v994_v8, 0.0  ;;  %v917_v12 = vadd.f32 %v916_v10, %v748_v9 }
 0x13d   : > { %1144 = vst [vmem:[%s1830_s30 + $0x188] sm:$0xff] %v1080_v11  ;;  %v1049_v13 = vmax.f32 %v917_v12, 0.0 }
 0x13e   : > { %v827_v14 = vpop.f32.mrf.mxu2 }
 0x13f   : > { %1113 = vst [vmem:[%s1830_s30 + $0x90] sm:$0xff] %v1049_v13  ;;  %v828_v15 = vadd.f32 %v1814_v48, %v827_v14  ;;  %v996_v16 = vpop.f32.mrf.mxu3 }
 0x140   : > { %v749_v17 = vpop.f32.mrf.mxu0 }
 0x141   : > { %v997_v18 = vadd.f32 %v996_v16, %v828_v15  ;;  %v750_v19 = vadd.f32 %v1814_v48, %v749_v17  ;;  %v918_v20 = vpop.f32.mrf.mxu1 }
 0x143   : > { %v1081_v21 = vmax.f32 %v997_v18, 0.0  ;;  %v919_v22 = vadd.f32 %v918_v20, %v750_v19 }
 0x145   : > { %1145 = vst [vmem:[%s1830_s30 + $0x190] sm:$0xff] %v1081_v21  ;;  %v1050_v23 = vmax.f32 %v919_v22, 0.0 }
 0x146   : > { %v829_v24 = vpop.f32.mrf.mxu2 }
 0x147   : > { %1114 = vst [vmem:[%s1830_s30 + $0x98] sm:$0xff] %v1050_v23  ;;  %v830_v25 = vadd.f32 %v1814_v48, %v829_v24  ;;  %v998_v26 = vpop.f32.mrf.mxu3 }
 0x148   : > { %v752_v27 = vpop.f32.mrf.mxu0 }
 0x149   : > { %v999_v28 = vadd.f32 %v998_v26, %v830_v25  ;;  %v753_v29 = vadd.f32 %v1814_v48, %v752_v27  ;;  %v921_v30 = vpop.f32.mrf.mxu1 }
 0x14b   : > { %v1082_v31 = vmax.f32 %v999_v28, 0.0  ;;  %v922_v32 = vadd.f32 %v921_v30, %v753_v29 }
 0x14d   : > { %1146 = vst [vmem:[%s1830_s30 + $0x198] sm:$0xff] %v1082_v31  ;;  %v1051_v33 = vmax.f32 %v922_v32, 0.0 }
 0x14e   : > { %v832_v34 = vpop.f32.mrf.mxu2 }
 0x14f   : > { %1115 = vst [vmem:[%s1830_s30 + $0xa0] sm:$0xff] %v1051_v33  ;;  %v833_v35 = vadd.f32 %v1814_v48, %v832_v34  ;;  %v1001_v36 = vpop.f32.mrf.mxu3 }
 0x150   : > { %v754_v37 = vpop.f32.mrf.mxu0 }
 0x151   : > { %v1002_v38 = vadd.f32 %v1001_v36, %v833_v35  ;;  %v755_v39 = vadd.f32 %v1814_v48, %v754_v37  ;;  %v923_v40 = vpop.f32.mrf.mxu1 }
 0x153   : > { %v1083_v41 = vmax.f32 %v1002_v38, 0.0  ;;  %v924_v42 = vadd.f32 %v923_v40, %v755_v39 }
 0x155   : > { %1147 = vst [vmem:[%s1830_s30 + $0x1a0] sm:$0xff] %v1083_v41  ;;  %v1052_v43 = vmax.f32 %v924_v42, 0.0 }
 0x156   : > { %v834_v44 = vpop.f32.mrf.mxu2 }
 0x157   : > { %1116 = vst [vmem:[%s1830_s30 + $0xa8] sm:$0xff] %v1052_v43  ;;  %v835_v45 = vadd.f32 %v1814_v48, %v834_v44  ;;  %v1003_v46 = vpop.f32.mrf.mxu3 }
 0x158   : > { %v757_v47 = vpop.f32.mrf.mxu0 }
 0x159   : > { %v1004_v49 = vadd.f32 %v1003_v46, %v835_v45  ;;  %v758_v50 = vadd.f32 %v1814_v48, %v757_v47  ;;  %v926_v51 = vpop.f32.mrf.mxu1 }
 0x15b   : > { %v1084_v52 = vmax.f32 %v1004_v49, 0.0  ;;  %v927_v53 = vadd.f32 %v926_v51, %v758_v50 }
 0x15d   : > { %1148 = vst [vmem:[%s1830_s30 + $0x1a8] sm:$0xff] %v1084_v52  ;;  %v1053_v54 = vmax.f32 %v927_v53, 0.0 }
 0x15e   : > { %v837_v55 = vpop.f32.mrf.mxu2 }
 0x15f   : > { %1117 = vst [vmem:[%s1830_s30 + $0xb0] sm:$0xff] %v1053_v54  ;;  %v838_v56 = vadd.f32 %v1814_v48, %v837_v55  ;;  %v1006_v57 = vpop.f32.mrf.mxu3 }
 0x160   : > { %v759_v58 = vpop.f32.mrf.mxu0 }
 0x161   : > { %v1007_v59 = vadd.f32 %v1006_v57, %v838_v56  ;;  %v760_v60 = vadd.f32 %v1814_v48, %v759_v58  ;;  %v928_v61 = vpop.f32.mrf.mxu1 }
 0x163   : > { %v1085_v62 = vmax.f32 %v1007_v59, 0.0  ;;  %v929_v63 = vadd.f32 %v928_v61, %v760_v60 }
 0x165   : > { %1149 = vst [vmem:[%s1830_s30 + $0x1b0] sm:$0xff] %v1085_v62  ;;  %v1054_v0 = vmax.f32 %v929_v63, 0.0 }
 0x166   : > { %v839_v1 = vpop.f32.mrf.mxu2 }
 0x167   : > { %1118 = vst [vmem:[%s1830_s30 + $0xb8] sm:$0xff] %v1054_v0  ;;  %v840_v2 = vadd.f32 %v1814_v48, %v839_v1  ;;  %v1008_v3 = vpop.f32.mrf.mxu3 }
 0x168   : > { %v762_v4 = vpop.f32.mrf.mxu0 }
 0x169   : > { %v1009_v5 = vadd.f32 %v1008_v3, %v840_v2  ;;  %v763_v6 = vadd.f32 %v1814_v48, %v762_v4  ;;  %v931_v7 = vpop.f32.mrf.mxu1 }
 0x16b   : > { %v1086_v8 = vmax.f32 %v1009_v5, 0.0  ;;  %v932_v9 = vadd.f32 %v931_v7, %v763_v6 }
 0x16d   : > { %1150 = vst [vmem:[%s1830_s30 + $0x1b8] sm:$0xff] %v1086_v8  ;;  %v1055_v10 = vmax.f32 %v932_v9, 0.0 }
 0x16e   : > { %v842_v11 = vpop.f32.mrf.mxu2 }
 0x16f   : > { %1119 = vst [vmem:[%s1830_s30 + $0xc0] sm:$0xff] %v1055_v10  ;;  %v843_v12 = vadd.f32 %v1814_v48, %v842_v11  ;;  %v1011_v13 = vpop.f32.mrf.mxu3 }
 0x170   : > { %v764_v14 = vpop.f32.mrf.mxu0 }
 0x171   : > { %v1012_v15 = vadd.f32 %v1011_v13, %v843_v12  ;;  %v765_v16 = vadd.f32 %v1814_v48, %v764_v14  ;;  %v933_v17 = vpop.f32.mrf.mxu1 }
 0x173   : > { %v1087_v18 = vmax.f32 %v1012_v15, 0.0  ;;  %v934_v19 = vadd.f32 %v933_v17, %v765_v16 }
 0x175   : > { %1151 = vst [vmem:[%s1830_s30 + $0x1c0] sm:$0xff] %v1087_v18  ;;  %v1056_v20 = vmax.f32 %v934_v19, 0.0 }
 0x176   : > { %v844_v21 = vpop.f32.mrf.mxu2 }
 0x177   : > { %1120 = vst [vmem:[%s1830_s30 + $0xc8] sm:$0xff] %v1056_v20  ;;  %v845_v22 = vadd.f32 %v1814_v48, %v844_v21  ;;  %v1013_v23 = vpop.f32.mrf.mxu3 }
 0x178   : > { %v767_v24 = vpop.f32.mrf.mxu0 }
 0x179   : > { %v1014_v25 = vadd.f32 %v1013_v23, %v845_v22  ;;  %v768_v26 = vadd.f32 %v1814_v48, %v767_v24  ;;  %v936_v27 = vpop.f32.mrf.mxu1 }
 0x17b   : > { %v1088_v28 = vmax.f32 %v1014_v25, 0.0  ;;  %v937_v29 = vadd.f32 %v936_v27, %v768_v26 }
 0x17d   : > { %1152 = vst [vmem:[%s1830_s30 + $0x1c8] sm:$0xff] %v1088_v28  ;;  %v1057_v30 = vmax.f32 %v937_v29, 0.0 }
 0x17e   : > { %v847_v31 = vpop.f32.mrf.mxu2 }
 0x17f   : > { %1121 = vst [vmem:[%s1830_s30 + $0xd0] sm:$0xff] %v1057_v30  ;;  %v848_v32 = vadd.f32 %v1814_v48, %v847_v31  ;;  %v1016_v33 = vpop.f32.mrf.mxu3 }
 0x180   : > { %v769_v34 = vpop.f32.mrf.mxu0 }
 0x181   : > { %v1017_v35 = vadd.f32 %v1016_v33, %v848_v32  ;;  %v770_v36 = vadd.f32 %v1814_v48, %v769_v34  ;;  %v938_v37 = vpop.f32.mrf.mxu1 }
 0x183   : > { %v1089_v38 = vmax.f32 %v1017_v35, 0.0  ;;  %v939_v39 = vadd.f32 %v938_v37, %v770_v36 }
 0x185   : > { %1153 = vst [vmem:[%s1830_s30 + $0x1d0] sm:$0xff] %v1089_v38  ;;  %v1058_v40 = vmax.f32 %v939_v39, 0.0 }
 0x186   : > { %v849_v41 = vpop.f32.mrf.mxu2 }
 0x187   : > { %1122 = vst [vmem:[%s1830_s30 + $0xd8] sm:$0xff] %v1058_v40  ;;  %v850_v42 = vadd.f32 %v1814_v48, %v849_v41  ;;  %v1018_v43 = vpop.f32.mrf.mxu3 }
 0x188   : > { %v772_v44 = vpop.f32.mrf.mxu0 }
 0x189   : > { %v1019_v45 = vadd.f32 %v1018_v43, %v850_v42  ;;  %v773_v46 = vadd.f32 %v1814_v48, %v772_v44  ;;  %v941_v47 = vpop.f32.mrf.mxu1 }
 0x18b   : > { %v1090_v49 = vmax.f32 %v1019_v45, 0.0  ;;  %v942_v50 = vadd.f32 %v941_v47, %v773_v46 }
 0x18d   : > { %1154 = vst [vmem:[%s1830_s30 + $0x1d8] sm:$0xff] %v1090_v49  ;;  %v1059_v51 = vmax.f32 %v942_v50, 0.0 }
 0x18e   : > { %v852_v52 = vpop.f32.mrf.mxu2 }
 0x18f   : > { %1123 = vst [vmem:[%s1830_s30 + $0xe0] sm:$0xff] %v1059_v51  ;;  %v853_v53 = vadd.f32 %v1814_v48, %v852_v52  ;;  %v1021_v54 = vpop.f32.mrf.mxu3 }
 0x190   : > { %v774_v55 = vpop.f32.mrf.mxu0 }
 0x191   : > { %v1022_v56 = vadd.f32 %v1021_v54, %v853_v53  ;;  %v775_v57 = vadd.f32 %v1814_v48, %v774_v55  ;;  %v943_v58 = vpop.f32.mrf.mxu1 }
 0x193   : > { %v1091_v59 = vmax.f32 %v1022_v56, 0.0  ;;  %v944_v60 = vadd.f32 %v943_v58, %v775_v57 }
 0x195   : > { %1155 = vst [vmem:[%s1830_s30 + $0x1e0] sm:$0xff] %v1091_v59  ;;  %v1060_v61 = vmax.f32 %v944_v60, 0.0 }
 0x196   : > { %v854_v62 = vpop.f32.mrf.mxu2 }
 0x197   : > { %1124 = vst [vmem:[%s1830_s30 + $0xe8] sm:$0xff] %v1060_v61  ;;  %v855_v63 = vadd.f32 %v1814_v48, %v854_v62  ;;  %v1023_v0 = vpop.f32.mrf.mxu3 }
 0x198   : > { %v777_v1 = vpop.f32.mrf.mxu0 }
 0x199   : > { %v1024_v2 = vadd.f32 %v1023_v0, %v855_v63  ;;  %v778_v3 = vadd.f32 %v1814_v48, %v777_v1  ;;  %v946_v4 = vpop.f32.mrf.mxu1 }
 0x19b   : > { %v1092_v5 = vmax.f32 %v1024_v2, 0.0  ;;  %v947_v6 = vadd.f32 %v946_v4, %v778_v3 }
 0x19d   : > { %1156 = vst [vmem:[%s1830_s30 + $0x1e8] sm:$0xff] %v1092_v5  ;;  %v1061_v7 = vmax.f32 %v947_v6, 0.0 }
 0x19e   : > { %v857_v8 = vpop.f32.mrf.mxu2 }
 0x19f   : > { %1125 = vst [vmem:[%s1830_s30 + $0xf0] sm:$0xff] %v1061_v7  ;;  %v858_v9 = vadd.f32 %v1814_v48, %v857_v8  ;;  %v1026_v10 = vpop.f32.mrf.mxu3 }
 0x1a0   : > { %v779_v11 = vpop.f32.mrf.mxu0 }
 0x1a1   : > { %v1027_v12 = vadd.f32 %v1026_v10, %v858_v9  ;;  %v780_v13 = vadd.f32 %v1814_v48, %v779_v11  ;;  %v948_v14 = vpop.f32.mrf.mxu1 }
 0x1a3   : > { %v1093_v15 = vmax.f32 %v1027_v12, 0.0  ;;  %v949_v16 = vadd.f32 %v948_v14, %v780_v13 }
 0x1a5   : > { %1157 = vst [vmem:[%s1830_s30 + $0x1f0] sm:$0xff] %v1093_v15  ;;  %v1062_v17 = vmax.f32 %v949_v16, 0.0 }
 0x1a6   : > { %v859_v18 = vpop.f32.mrf.mxu2 }
 0x1a7   : > { %1126 = vst [vmem:[%s1830_s30 + $0xf8] sm:$0xff] %v1062_v17  ;;  %v860_v19 = vadd.f32 %v1814_v48, %v859_v18  ;;  %v1028_v20 = vpop.f32.mrf.mxu3 }
 0x1a9   : > { %v1029_v21 = vadd.f32 %v1028_v20, %v860_v19 }
 0x1ab   : > { %v1094_v22 = vmax.f32 %v1029_v21, 0.0 }
 0x1ad   : > { %1158 = vst [vmem:[%s1830_s30 + $0x1f8] sm:$0xff] %v1094_v22 }
 0x1ae PF: > { %s13_s12 = sadd.s32 1, %s1659_s12  }
 0x1af   : > { %p10_p4 = scmp.ge.s32.totalorder %s13_s12, 4  }
 0x1b1   :  { %12 = sbr.rel (!%p10_p4) target bundleno = 1 (0x1), region = 62 }

// kernel: _rvs_forward_impl.5
= control target key start
LH: loop header
LB: loop body
LE: loop exit
PB: predicated region body
PF: predicated region fallthrough
CT: control target
= control target key end

     0   :  { %s1696_s1 = inlined_call_operand.vmem [shape: bf16[512,128], index: 1, kind: input, shape index: {}]   ;;  %s1697_s2 = inlined_call_operand.vmem [shape: f32[1,128], index: 2, kind: input, shape index: {}]   ;;  %s1698_s0 = inlined_call_operand.vmem [shape: bf16[176,512], index: 0, kind: input, shape index: {}]   ;;  %s1699_s3 = inlined_call_operand.vmem [shape: f32[176,128], index: 3, kind: output, shape index: {}]  }
   0x1   :  { %v1197_v0 = vld [vmem:[%s1696_s1 + $0x38] sm:$0xff]  ;;  %v1196_v4 = vld [vmem:[%s1696_s1 + $0x30] sm:$0xff]  ;;  %v1195_v8 = vld [vmem:[%s1696_s1 + $0x28] sm:$0xff] }
   0x2   :  { %v1205_v1 = vld [vmem:[%s1696_s1 + $0x78] sm:$0xff]  ;;  %538 = vmatpush.bf16.msra.mxu0 %v1197_v0  ;;  %v1204_v5 = vld [vmem:[%s1696_s1 + $0x70] sm:$0xff]  ;;  %v1203_v9 = vld [vmem:[%s1696_s1 + $0x68] sm:$0xff] }
   0x3   :  { %v1213_v2 = vld [vmem:[%s1696_s1 + $0xb8] sm:$0xff]  ;;  %602 = vmatpush.bf16.msra.mxu1 %v1205_v1  ;;  %v1212_v6 = vld [vmem:[%s1696_s1 + $0xb0] sm:$0xff]  ;;  %v1211_v10 = vld [vmem:[%s1696_s1 + $0xa8] sm:$0xff] }
   0x4   :  { %v1221_v3 = vld [vmem:[%s1696_s1 + $0xf8] sm:$0xff]  ;;  %666 = vmatpush.bf16.msra.mxu2 %v1213_v2  ;;  %v1220_v7 = vld [vmem:[%s1696_s1 + $0xf0] sm:$0xff]  ;;  %v1219_v11 = vld [vmem:[%s1696_s1 + $0xe8] sm:$0xff] }
   0x5   :  { %730 = vmatpush.bf16.msra.mxu3 %v1221_v3  ;;  %v1194_v12 = vld [vmem:[%s1696_s1 + $0x20] sm:$0xff]  ;;  %v1193_v16 = vld [vmem:[%s1696_s1 + $0x18] sm:$0xff]  ;;  %v1192_v20 = vld [vmem:[%s1696_s1 + $0x10] sm:$0xff] }
   0x6   :  { %539 = vmatpush.bf16.msra.mxu0 %v1196_v4  ;;  %v1202_v13 = vld [vmem:[%s1696_s1 + $0x60] sm:$0xff]  ;;  %v1201_v17 = vld [vmem:[%s1696_s1 + $0x58] sm:$0xff]  ;;  %v1200_v21 = vld [vmem:[%s1696_s1 + $0x50] sm:$0xff] }
   0x7   :  { %603 = vmatpush.bf16.msra.mxu1 %v1204_v5  ;;  %v1210_v14 = vld [vmem:[%s1696_s1 + $0xa0] sm:$0xff]  ;;  %v1209_v18 = vld [vmem:[%s1696_s1 + $0x98] sm:$0xff]  ;;  %v1208_v22 = vld [vmem:[%s1696_s1 + $0x90] sm:$0xff] }
   0x8   :  { %667 = vmatpush.bf16.msra.mxu2 %v1212_v6  ;;  %v1218_v15 = vld [vmem:[%s1696_s1 + $0xe0] sm:$0xff]  ;;  %v1217_v19 = vld [vmem:[%s1696_s1 + $0xd8] sm:$0xff]  ;;  %v1216_v23 = vld [vmem:[%s1696_s1 + $0xd0] sm:$0xff] }
   0x9   :  { %731 = vmatpush.bf16.msra.mxu3 %v1220_v7  ;;  %v1191_v24 = vld [vmem:[%s1696_s1 + $0x8] sm:$0xff]  ;;  %v1190_v28 = vld [vmem:[%s1696_s1] sm:$0xff]  ;;  %v1148_v33 = vld [vmem:[%s1698_s0 + $0xc] sm:$0xf0] }
   0xa   :  { %540 = vmatpush.bf16.msra.mxu0 %v1195_v8  ;;  %v1199_v25 = vld [vmem:[%s1696_s1 + $0x48] sm:$0xff]  ;;  %v1198_v29 = vld [vmem:[%s1696_s1 + $0x40] sm:$0xff]  ;;  %v846_v35 = vld [vmem:[%s1698_s0 + $0x10] sm:$0xf0] }
   0xb   :  { %604 = vmatpush.bf16.msra.mxu1 %v1203_v9  ;;  %v1207_v26 = vld [vmem:[%s1696_s1 + $0x88] sm:$0xff]  ;;  %v1206_v30 = vld [vmem:[%s1696_s1 + $0x80] sm:$0xff]  ;;  %v1149_v37 = vld [vmem:[%s1698_s0 + $0x14] sm:$0xf0] }
   0xc   :  { %668 = vmatpush.bf16.msra.mxu2 %v1211_v10  ;;  %v1215_v27 = vld [vmem:[%s1696_s1 + $0xc8] sm:$0xff]  ;;  %v1214_v31 = vld [vmem:[%s1696_s1 + $0xc0] sm:$0xff]  ;;  %v854_v39 = vld [vmem:[%s1698_s0 + $0x18] sm:$0xf0] }
   0xd   :  { %732 = vmatpush.bf16.msra.mxu3 %v1219_v11  ;;  %v844_v32 = vld [vmem:[%s1698_s0] sm:$0xf]  ;;  %v1146_v34 = vld [vmem:[%s1698_s0 + $0x4] sm:$0xf]  ;;  %v852_v36 = vld [vmem:[%s1698_s0 + $0x8] sm:$0xf] }
   0xe   :  { %541 = vmatpush.bf16.msra.mxu0 %v1194_v12  ;;  %v1147_v38 = vld [vmem:[%s1698_s0 + $0xc] sm:$0xf]  ;;  %v845_v40 = vor.u32 %v1148_v33, %v844_v32  ;;  %v849_v41 = vor.u32 %v1146_v34, %v846_v35  ;;  %v853_v42 = vor.u32 %v1149_v37, %v852_v36  ;;  %v860_v44 = vld [vmem:[%s1698_s0 + $0x20] sm:$0xf]  ;;  %v1152_v45 = vld [vmem:[%s1698_s0 + $0x2c] sm:$0xf0] }
   0xf   :  { %605 = vmatpush.bf16.msra.mxu1 %v1202_v13  ;;  %v857_v43 = vor.u32 %v1147_v38, %v854_v39  ;;  %v1150_v46 = vld [vmem:[%s1698_s0 + $0x24] sm:$0xf]  ;;  %v862_v47 = vld [vmem:[%s1698_s0 + $0x30] sm:$0xf0]  ;;  %v868_v48 = vld [vmem:[%s1698_s0 + $0x28] sm:$0xf]  ;;  %v861_v52 = vor.u32 %v1152_v45, %v860_v44 }
  0x10   :  { %669 = vmatpush.bf16.msra.mxu2 %v1210_v14  ;;  %v1153_v49 = vld [vmem:[%s1698_s0 + $0x34] sm:$0xf0]  ;;  %v1151_v50 = vld [vmem:[%s1698_s0 + $0x2c] sm:$0xf]  ;;  %v870_v51 = vld [vmem:[%s1698_s0 + $0x38] sm:$0xf0]  ;;  %v865_v53 = vor.u32 %v1150_v46, %v862_v47 }
  0x11   :  { %733 = vmatpush.bf16.msra.mxu3 %v1218_v15  ;;  %v869_v54 = vor.u32 %v1153_v49, %v868_v48  ;;  %v873_v55 = vor.u32 %v1151_v50, %v870_v51  ;;  %v876_v56 = vld [vmem:[%s1698_s0 + $0x40] sm:$0xf]  ;;  %v1156_v57 = vld [vmem:[%s1698_s0 + $0x4c] sm:$0xf0]  ;;  %v1154_v58 = vld [vmem:[%s1698_s0 + $0x44] sm:$0xf] }
  0x12   :  { %542 = vmatpush.bf16.msra.mxu0 %v1193_v16  ;;  %v878_v59 = vld [vmem:[%s1698_s0 + $0x50] sm:$0xf0]  ;;  %v884_v60 = vld [vmem:[%s1698_s0 + $0x48] sm:$0xf]  ;;  %v1157_v61 = vld [vmem:[%s1698_s0 + $0x54] sm:$0xf0]  ;;  %v877_v0 = vor.u32 %v1156_v57, %v876_v56 }
  0x13   :  { %606 = vmatpush.bf16.msra.mxu1 %v1201_v17  ;;  %v1155_v62 = vld [vmem:[%s1698_s0 + $0x4c] sm:$0xf]  ;;  %v886_v63 = vld [vmem:[%s1698_s0 + $0x58] sm:$0xf0]  ;;  %v881_v1 = vor.u32 %v1154_v58, %v878_v59  ;;  %v885_v2 = vor.u32 %v1157_v61, %v884_v60  ;;  %v892_v4 = vld [vmem:[%s1698_s0 + $0x60] sm:$0xf] }
  0x14   :  { %670 = vmatpush.bf16.msra.mxu2 %v1209_v18  ;;  %v889_v3 = vor.u32 %v1155_v62, %v886_v63  ;;  %v1160_v5 = vld [vmem:[%s1698_s0 + $0x6c] sm:$0xf0]  ;;  %v1158_v6 = vld [vmem:[%s1698_s0 + $0x64] sm:$0xf]  ;;  %v894_v7 = vld [vmem:[%s1698_s0 + $0x70] sm:$0xf0] }
  0x15   :  { %734 = vmatpush.bf16.msra.mxu3 %v1217_v19  ;;  %v900_v8 = vld [vmem:[%s1698_s0 + $0x68] sm:$0xf]  ;;  %v1161_v9 = vld [vmem:[%s1698_s0 + $0x74] sm:$0xf0]  ;;  %v1159_v10 = vld [vmem:[%s1698_s0 + $0x6c] sm:$0xf]  ;;  %v893_v12 = vor.u32 %v1160_v5, %v892_v4  ;;  %v897_v13 = vor.u32 %v1158_v6, %v894_v7 }
  0x16   :  { %543 = vmatpush.bf16.msra.mxu0 %v1192_v20  ;;  %v902_v11 = vld [vmem:[%s1698_s0 + $0x78] sm:$0xf0]  ;;  %v901_v14 = vor.u32 %v1161_v9, %v900_v8  ;;  %v908_v16 = vld [vmem:[%s1698_s0 + $0x80] sm:$0xf]  ;;  %v1164_v17 = vld [vmem:[%s1698_s0 + $0x8c] sm:$0xf0] }
  0x17   :  { %607 = vmatpush.bf16.msra.mxu1 %v1200_v21  ;;  %v905_v15 = vor.u32 %v1159_v10, %v902_v11  ;;  %v1162_v18 = vld [vmem:[%s1698_s0 + $0x84] sm:$0xf]  ;;  %v910_v19 = vld [vmem:[%s1698_s0 + $0x90] sm:$0xf0]  ;;  %v916_v20 = vld [vmem:[%s1698_s0 + $0x88] sm:$0xf] }
  0x18   :  { %671 = vmatpush.bf16.msra.mxu2 %v1208_v22  ;;  %v1165_v21 = vld [vmem:[%s1698_s0 + $0x94] sm:$0xf0]  ;;  %v1163_v22 = vld [vmem:[%s1698_s0 + $0x8c] sm:$0xf]  ;;  %v932_v32 = vld [vmem:[%s1698_s0 + $0xa8] sm:$0xf] }
  0x19   :  { %735 = vmatpush.bf16.msra.mxu3 %v1216_v23  ;;  %v918_v23 = vld [vmem:[%s1698_s0 + $0x98] sm:$0xf0]  ;;  %v1169_v33 = vld [vmem:[%s1698_s0 + $0xb4] sm:$0xf0]  ;;  %v1167_v34 = vld [vmem:[%s1698_s0 + $0xac] sm:$0xf] }
  0x1a   :  { %544 = vmatpush.bf16.msra.mxu0 %v1191_v24  ;;  %v909_v24 = vor.u32 %v1164_v17, %v908_v16  ;;  %v934_v35 = vld [vmem:[%s1698_s0 + $0xb8] sm:$0xf0]  ;;  %v933_v38 = vor.u32 %v1169_v33, %v932_v32  ;;  %v948_v44 = vld [vmem:[%s1698_s0 + $0xc8] sm:$0xf]  ;;  %v1173_v45 = vld [vmem:[%s1698_s0 + $0xd4] sm:$0xf0] }
  0x1b   :  { %608 = vmatpush.bf16.msra.mxu1 %v1199_v25  ;;  %v913_v25 = vor.u32 %v1162_v18, %v910_v19  ;;  %v937_v39 = vor.u32 %v1167_v34, %v934_v35  ;;  %v1171_v46 = vld [vmem:[%s1698_s0 + $0xcc] sm:$0xf]  ;;  %v950_v47 = vld [vmem:[%s1698_s0 + $0xd8] sm:$0xf0]  ;;  %v949_v50 = vor.u32 %v1173_v45, %v948_v44  ;;  %v964_v56 = vld [vmem:[%s1698_s0 + $0xe8] sm:$0xf] }
  0x1c   :  { %672 = vmatpush.bf16.msra.mxu2 %v1207_v26  ;;  %v917_v26 = vor.u32 %v1165_v21, %v916_v20  ;;  %v953_v51 = vor.u32 %v1171_v46, %v950_v47  ;;  %v1177_v57 = vld [vmem:[%s1698_s0 + $0xf4] sm:$0xf0]  ;;  %v1175_v58 = vld [vmem:[%s1698_s0 + $0xec] sm:$0xf]  ;;  %v966_v59 = vld [vmem:[%s1698_s0 + $0xf8] sm:$0xf0] }
  0x1d   :  { %736 = vmatpush.bf16.msra.mxu3 %v1215_v27  ;;  %v921_v27 = vor.u32 %v1163_v22, %v918_v23  ;;  %v965_v62 = vor.u32 %v1177_v57, %v964_v56  ;;  %v969_v63 = vor.u32 %v1175_v58, %v966_v59  ;;  %v974_v4 = vld [vmem:[%s1698_s0 + $0x110] sm:$0xf0]  ;;  %v980_v5 = vld [vmem:[%s1698_s0 + $0x108] sm:$0xf]  ;;  %v1181_v6 = vld [vmem:[%s1698_s0 + $0x114] sm:$0xf0] }
  0x1e   :  { %545 = vmatpush.bf16.msra.mxu0 %v1190_v28  ;;  %v924_v28 = vld [vmem:[%s1698_s0 + $0xa0] sm:$0xf]  ;;  %v1179_v7 = vld [vmem:[%s1698_s0 + $0x10c] sm:$0xf]  ;;  %v982_v8 = vld [vmem:[%s1698_s0 + $0x118] sm:$0xf0] }
  0x1f   :  { %609 = vmatpush.bf16.msra.mxu1 %v1198_v29  ;;  %v1168_v29 = vld [vmem:[%s1698_s0 + $0xac] sm:$0xf0]  ;;  %v998_v32 = vld [vmem:[%s1698_s0 + $0x138] sm:$0xf0]  ;;  %v1186_v56 = vld [vmem:[%s1698_s0 + $0x144] sm:$0xf] }
  0x20   :  { %673 = vmatpush.bf16.msra.mxu2 %v1206_v30  ;;  %v1166_v30 = vld [vmem:[%s1698_s0 + $0xa4] sm:$0xf]  ;;  %v925_v36 = vor.u32 %v1168_v29, %v924_v28  ;;  %v990_v28 = vld [vmem:[%s1698_s0 + $0x130] sm:$0xf0]  ;;  %v996_v29 = vld [vmem:[%s1698_s0 + $0x128] sm:$0xf] }
  0x21   :  { %737 = vmatpush.bf16.msra.mxu3 %v1214_v31  ;;  %546 = vmatmul.bf16.vlgmr.msra.gmra.mxu0 %v845_v40  ;;  %v926_v31 = vld [vmem:[%s1698_s0 + $0xb0] sm:$0xf0]  ;;  %v940_v40 = vld [vmem:[%s1698_s0 + $0xc0] sm:$0xf]  ;;  %v1012_v59 = vld [vmem:[%s1698_s0 + $0x148] sm:$0xf] }
  0x22   :  { %610 = vmatmul.bf16.vlgmr.msra.gmra.mxu1 %v849_v41  ;;  %v929_v37 = vor.u32 %v1166_v30, %v926_v31  ;;  %v1172_v41 = vld [vmem:[%s1698_s0 + $0xcc] sm:$0xf0]  ;;  %v1185_v30 = vld [vmem:[%s1698_s0 + $0x134] sm:$0xf0]  ;;  %v1183_v31 = vld [vmem:[%s1698_s0 + $0x12c] sm:$0xf] }
  0x23   :  { %674 = vmatmul.bf16.vlgmr.msra.gmra.mxu2 %v853_v42  ;;  %v1170_v42 = vld [vmem:[%s1698_s0 + $0xc4] sm:$0xf]  ;;  %v941_v48 = vor.u32 %v1172_v41, %v940_v40  ;;  %v997_v41 = vor.u32 %v1185_v30, %v996_v29  ;;  %v1006_v58 = vld [vmem:[%s1698_s0 + $0x150] sm:$0xf0] }
  0x24   :  { %738 = vmatmul.bf16.vlgmr.msra.gmra.mxu3 %v857_v43  ;;  %v942_v43 = vld [vmem:[%s1698_s0 + $0xd0] sm:$0xf0] }
  0x25   :  { %v945_v49 = vor.u32 %v1170_v42, %v942_v43  ;;  %v1001_v42 = vor.u32 %v1183_v31, %v998_v32 }
  0x31   :  { %551 = vmatmul.bf16.gmra.mxu0 %v861_v52  ;;  %v956_v52 = vld [vmem:[%s1698_s0 + $0xe0] sm:$0xf] }
  0x32   :  { %615 = vmatmul.bf16.gmra.mxu1 %v865_v53  ;;  %v1176_v53 = vld [vmem:[%s1698_s0 + $0xec] sm:$0xf0] }
  0x33   :  { %679 = vmatmul.bf16.gmra.mxu2 %v869_v54  ;;  %v1174_v54 = vld [vmem:[%s1698_s0 + $0xe4] sm:$0xf]  ;;  %v957_v60 = vor.u32 %v1176_v53, %v956_v52 }
  0x34   :  { %743 = vmatmul.bf16.gmra.mxu3 %v873_v55  ;;  %v958_v55 = vld [vmem:[%s1698_s0 + $0xf0] sm:$0xf0] }
  0x35   :  { %v961_v61 = vor.u32 %v1174_v54, %v958_v55  ;;  %v1004_v54 = vld [vmem:[%s1698_s0 + $0x140] sm:$0xf]  ;;  %v1188_v55 = vld [vmem:[%s1698_s0 + $0x14c] sm:$0xf0] }
  0x41   :  { %556 = vmatmul.bf16.gmra.mxu0 %v877_v0  ;;  %v1534_v0 = vld [vmem:[%s1697_s2] ss:$0 sm:$0xff] }
  0x42   :  { %620 = vmatmul.bf16.gmra.mxu1 %v881_v1  ;;  %v972_v1 = vld [vmem:[%s1698_s0 + $0x100] sm:$0xf] }
  0x43   :  { %684 = vmatmul.bf16.gmra.mxu2 %v885_v2  ;;  %v1180_v2 = vld [vmem:[%s1698_s0 + $0x10c] sm:$0xf0] }
  0x44   :  { %748 = vmatmul.bf16.gmra.mxu3 %v889_v3  ;;  %v1178_v3 = vld [vmem:[%s1698_s0 + $0x104] sm:$0xf]  ;;  %v973_v9 = vor.u32 %v1180_v2, %v972_v1 }
  0x45   :  { %v977_v10 = vor.u32 %v1178_v3, %v974_v4  ;;  %v1005_v3 = vor.u32 %v1188_v55, %v1004_v54  ;;  %v1009_v4 = vor.u32 %v1186_v56, %v1006_v58 }
  0x51   :  { %561 = vmatmul.bf16.gmra.mxu0 %v893_v12 }
  0x52   :  { %625 = vmatmul.bf16.gmra.mxu1 %v897_v13  ;;  %v981_v13 = vor.u32 %v1181_v6, %v980_v5 }
  0x53   :  { %689 = vmatmul.bf16.gmra.mxu2 %v901_v14  ;;  %v985_v14 = vor.u32 %v1179_v7, %v982_v8 }
  0x54   :  { %753 = vmatmul.bf16.gmra.mxu3 %v905_v15 }
  0x61   :  { %566 = vmatmul.bf16.gmra.mxu0 %v909_v24  ;;  %v988_v24 = vld [vmem:[%s1698_s0 + $0x120] sm:$0xf] }
  0x62   :  { %630 = vmatmul.bf16.gmra.mxu1 %v913_v25  ;;  %v1184_v25 = vld [vmem:[%s1698_s0 + $0x12c] sm:$0xf0] }
  0x63   :  { %694 = vmatmul.bf16.gmra.mxu2 %v917_v26  ;;  %v1182_v26 = vld [vmem:[%s1698_s0 + $0x124] sm:$0xf] }
  0x64   :  { %758 = vmatmul.bf16.gmra.mxu3 %v921_v27 }
  0x71   :  { %571 = vmatmul.bf16.gmra.mxu0 %v925_v36  ;;  %v989_v36 = vor.u32 %v1184_v25, %v988_v24 }
  0x72   :  { %635 = vmatmul.bf16.gmra.mxu1 %v929_v37  ;;  %v993_v37 = vor.u32 %v1182_v26, %v990_v28 }
  0x73   :  { %699 = vmatmul.bf16.gmra.mxu2 %v933_v38 }
  0x74   :  { %763 = vmatmul.bf16.gmra.mxu3 %v937_v39 }
  0x81   :  { %576 = vmatmul.bf16.gmra.mxu0 %v941_v48 }
  0x82   :  { %640 = vmatmul.bf16.gmra.mxu1 %v945_v49 }
  0x83   :  { %704 = vmatmul.bf16.gmra.mxu2 %v949_v50 }
  0x84   :  { %768 = vmatmul.bf16.gmra.mxu3 %v953_v51 }
  0x91   :  { %581 = vmatmul.bf16.gmra.mxu0 %v957_v60  ;;  %v1189_v60 = vld [vmem:[%s1698_s0 + $0x154] sm:$0xf0] }
  0x92   :  { %645 = vmatmul.bf16.gmra.mxu1 %v961_v61  ;;  %v1187_v61 = vld [vmem:[%s1698_s0 + $0x14c] sm:$0xf]  ;;  %v1013_v8 = vor.u32 %v1189_v60, %v1012_v59 }
  0x93   :  { %709 = vmatmul.bf16.gmra.mxu2 %v965_v62  ;;  %v1014_v62 = vld [vmem:[%s1698_s0 + $0x158] sm:$0xf0] }
  0x94   :  { %773 = vmatmul.bf16.gmra.mxu3 %v969_v63 }
  0x9e   :  { %v547_v11 = vpop.f32.mrf.mxu0 }
  0x9f   :  { %v611_v12 = vpop.f32.mrf.mxu1  ;;  %v548_v15 = vadd.f32 %v1534_v0, %v547_v11 }
  0xa1   :  { %586 = vmatmul.bf16.gmra.mxu0 %v973_v9  ;;  %v612_v16 = vadd.f32 %v611_v12, %v548_v15  ;;  %v1017_v9 = vor.u32 %v1187_v61, %v1014_v62 }
  0xa2   :  { %650 = vmatmul.bf16.gmra.mxu1 %v977_v10 }
  0xa3   :  { %714 = vmatmul.bf16.gmra.mxu2 %v981_v13 }
  0xa4   :  { %778 = vmatmul.bf16.gmra.mxu3 %v985_v14 }
  0xa6   :  { %v675_v17 = vpop.f32.mrf.mxu2  ;;  %v549_v20 = vpop.f32.mrf.mxu0 }
  0xa7   :  { %v739_v18 = vpop.f32.mrf.mxu3  ;;  %v676_v19 = vadd.f32 %v675_v17, %v612_v16  ;;  %v613_v21 = vpop.f32.mrf.mxu1  ;;  %v550_v23 = vadd.f32 %v1534_v0, %v549_v20 }
  0xa9   :  { %v740_v22 = vadd.f32 %v739_v18, %v676_v19  ;;  %v614_v33 = vadd.f32 %v613_v21, %v550_v23 }
  0xab   :  { %v794_v27 = vmax.f32 %v740_v22, 0.0 }
  0xad   :  { %816 = vst [vmem:[%s1699_s3] sm:$0xff] %v794_v27 }
  0xae   :  { %v677_v34 = vpop.f32.mrf.mxu2  ;;  %v552_v39 = vpop.f32.mrf.mxu0 }
  0xaf   :  { %v741_v35 = vpop.f32.mrf.mxu3  ;;  %v678_v38 = vadd.f32 %v677_v34, %v614_v33  ;;  %v616_v40 = vpop.f32.mrf.mxu1  ;;  %v553_v43 = vadd.f32 %v1534_v0, %v552_v39 }
  0xb1   :  { %v742_v44 = vadd.f32 %v741_v35, %v678_v38  ;;  %591 = vmatmul.bf16.gmra.mxu0 %v989_v36  ;;  %v617_v46 = vadd.f32 %v616_v40, %v553_v43 }
  0xb2   :  { %655 = vmatmul.bf16.gmra.mxu1 %v993_v37 }
  0xb3   :  { %v795_v45 = vmax.f32 %v742_v44, 0.0  ;;  %719 = vmatmul.bf16.gmra.mxu2 %v997_v41 }
  0xb4   :  { %783 = vmatmul.bf16.gmra.mxu3 %v1001_v42 }
  0xb5   :  { %817 = vst [vmem:[%s1699_s3 + $0x8] sm:$0xff] %v795_v45 }
  0xb6   :  { %v680_v47 = vpop.f32.mrf.mxu2  ;;  %v554_v50 = vpop.f32.mrf.mxu0 }
  0xb7   :  { %v744_v48 = vpop.f32.mrf.mxu3  ;;  %v681_v49 = vadd.f32 %v680_v47, %v617_v46  ;;  %v618_v51 = vpop.f32.mrf.mxu1  ;;  %v555_v53 = vadd.f32 %v1534_v0, %v554_v50 }
  0xb9   :  { %v745_v52 = vadd.f32 %v744_v48, %v681_v49  ;;  %v619_v63 = vadd.f32 %v618_v51, %v555_v53 }
  0xbb   :  { %v796_v57 = vmax.f32 %v745_v52, 0.0 }
  0xbd   :  { %818 = vst [vmem:[%s1699_s3 + $0x10] sm:$0xff] %v796_v57 }
  0xbe   :  { %v682_v1 = vpop.f32.mrf.mxu2  ;;  %v557_v6 = vpop.f32.mrf.mxu0 }
  0xbf   :  { %v746_v2 = vpop.f32.mrf.mxu3  ;;  %v683_v5 = vadd.f32 %v682_v1, %v619_v63  ;;  %v621_v7 = vpop.f32.mrf.mxu1  ;;  %v558_v10 = vadd.f32 %v1534_v0, %v557_v6 }
  0xc1   :  { %v747_v11 = vadd.f32 %v746_v2, %v683_v5  ;;  %596 = vmatmul.bf16.gmra.mxu0 %v1005_v3  ;;  %v622_v13 = vadd.f32 %v621_v7, %v558_v10 }
  0xc2   :  { %660 = vmatmul.bf16.gmra.mxu1 %v1009_v4 }
  0xc3   :  { %v797_v12 = vmax.f32 %v747_v11, 0.0  ;;  %724 = vmatmul.bf16.gmra.mxu2 %v1013_v8 }
  0xc4   :  { %788 = vmatmul.bf16.gmra.mxu3 %v1017_v9 }
  0xc5   :  { %819 = vst [vmem:[%s1699_s3 + $0x18] sm:$0xff] %v797_v12 }
  0xc6   :  { %v685_v14 = vpop.f32.mrf.mxu2  ;;  %v559_v17 = vpop.f32.mrf.mxu0 }
  0xc7   :  { %v749_v15 = vpop.f32.mrf.mxu3  ;;  %v686_v16 = vadd.f32 %v685_v14, %v622_v13  ;;  %v623_v18 = vpop.f32.mrf.mxu1  ;;  %v560_v20 = vadd.f32 %v1534_v0, %v559_v17 }
  0xc9   :  { %v750_v19 = vadd.f32 %v749_v15, %v686_v16  ;;  %v624_v22 = vadd.f32 %v623_v18, %v560_v20 }
  0xcb   :  { %v798_v21 = vmax.f32 %v750_v19, 0.0 }
  0xcd   :  { %820 = vst [vmem:[%s1699_s3 + $0x20] sm:$0xff] %v798_v21 }
  0xce   :  { %v687_v23 = vpop.f32.mrf.mxu2  ;;  %v562_v26 = vpop.f32.mrf.mxu0 }
  0xcf   :  { %v751_v24 = vpop.f32.mrf.mxu3  ;;  %v688_v25 = vadd.f32 %v687_v23, %v624_v22  ;;  %v626_v27 = vpop.f32.mrf.mxu1  ;;  %v563_v28 = vadd.f32 %v1534_v0, %v562_v26 }
  0xd1   :  { %v752_v29 = vadd.f32 %v751_v24, %v688_v25  ;;  %v627_v31 = vadd.f32 %v626_v27, %v563_v28 }
  0xd3   :  { %v799_v30 = vmax.f32 %v752_v29, 0.0 }
  0xd5   :  { %821 = vst [vmem:[%s1699_s3 + $0x28] sm:$0xff] %v799_v30 }
  0xd6   :  { %v690_v32 = vpop.f32.mrf.mxu2  ;;  %v564_v35 = vpop.f32.mrf.mxu0 }
  0xd7   :  { %v754_v33 = vpop.f32.mrf.mxu3  ;;  %v691_v34 = vadd.f32 %v690_v32, %v627_v31  ;;  %v628_v36 = vpop.f32.mrf.mxu1  ;;  %v565_v38 = vadd.f32 %v1534_v0, %v564_v35 }
  0xd9   :  { %v755_v37 = vadd.f32 %v754_v33, %v691_v34  ;;  %v629_v40 = vadd.f32 %v628_v36, %v565_v38 }
  0xdb   :  { %v800_v39 = vmax.f32 %v755_v37, 0.0 }
  0xdd   :  { %822 = vst [vmem:[%s1699_s3 + $0x30] sm:$0xff] %v800_v39 }
  0xde   :  { %v692_v41 = vpop.f32.mrf.mxu2  ;;  %v567_v44 = vpop.f32.mrf.mxu0 }
  0xdf   :  { %v756_v42 = vpop.f32.mrf.mxu3  ;;  %v693_v43 = vadd.f32 %v692_v41, %v629_v40  ;;  %v631_v45 = vpop.f32.mrf.mxu1  ;;  %v568_v46 = vadd.f32 %v1534_v0, %v567_v44 }
  0xe1   :  { %v757_v47 = vadd.f32 %v756_v42, %v693_v43  ;;  %v632_v49 = vadd.f32 %v631_v45, %v568_v46 }
  0xe3   :  { %v801_v48 = vmax.f32 %v757_v47, 0.0 }
  0xe5   :  { %823 = vst [vmem:[%s1699_s3 + $0x38] sm:$0xff] %v801_v48 }
  0xe6   :  { %v695_v50 = vpop.f32.mrf.mxu2  ;;  %v569_v53 = vpop.f32.mrf.mxu0 }
  0xe7   :  { %v759_v51 = vpop.f32.mrf.mxu3  ;;  %v696_v52 = vadd.f32 %v695_v50, %v632_v49  ;;  %v633_v54 = vpop.f32.mrf.mxu1  ;;  %v570_v56 = vadd.f32 %v1534_v0, %v569_v53 }
  0xe9   :  { %v760_v55 = vadd.f32 %v759_v51, %v696_v52  ;;  %v634_v58 = vadd.f32 %v633_v54, %v570_v56 }
  0xeb   :  { %v802_v57 = vmax.f32 %v760_v55, 0.0 }
  0xed   :  { %824 = vst [vmem:[%s1699_s3 + $0x40] sm:$0xff] %v802_v57 }
  0xee   :  { %v697_v59 = vpop.f32.mrf.mxu2  ;;  %v572_v62 = vpop.f32.mrf.mxu0 }
  0xef   :  { %v761_v60 = vpop.f32.mrf.mxu3  ;;  %v698_v61 = vadd.f32 %v697_v59, %v634_v58  ;;  %v636_v63 = vpop.f32.mrf.mxu1  ;;  %v573_v1 = vadd.f32 %v1534_v0, %v572_v62 }
  0xf1   :  { %v762_v2 = vadd.f32 %v761_v60, %v698_v61  ;;  %v637_v4 = vadd.f32 %v636_v63, %v573_v1 }
  0xf3   :  { %v803_v3 = vmax.f32 %v762_v2, 0.0 }
  0xf5   :  { %825 = vst [vmem:[%s1699_s3 + $0x48] sm:$0xff] %v803_v3 }
  0xf6   :  { %v700_v5 = vpop.f32.mrf.mxu2  ;;  %v574_v8 = vpop.f32.mrf.mxu0 }
  0xf7   :  { %v764_v6 = vpop.f32.mrf.mxu3  ;;  %v701_v7 = vadd.f32 %v700_v5, %v637_v4  ;;  %v638_v9 = vpop.f32.mrf.mxu1  ;;  %v575_v11 = vadd.f32 %v1534_v0, %v574_v8 }
  0xf9   :  { %v765_v10 = vadd.f32 %v764_v6, %v701_v7  ;;  %v639_v13 = vadd.f32 %v638_v9, %v575_v11 }
  0xfb   :  { %v804_v12 = vmax.f32 %v765_v10, 0.0 }
  0xfd   :  { %826 = vst [vmem:[%s1699_s3 + $0x50] sm:$0xff] %v804_v12 }
  0xfe   :  { %v702_v14 = vpop.f32.mrf.mxu2  ;;  %v577_v17 = vpop.f32.mrf.mxu0 }
  0xff   :  { %v766_v15 = vpop.f32.mrf.mxu3  ;;  %v703_v16 = vadd.f32 %v702_v14, %v639_v13  ;;  %v641_v18 = vpop.f32.mrf.mxu1  ;;  %v578_v19 = vadd.f32 %v1534_v0, %v577_v17 }
 0x101   :  { %v767_v20 = vadd.f32 %v766_v15, %v703_v16  ;;  %v642_v22 = vadd.f32 %v641_v18, %v578_v19 }
 0x103   :  { %v805_v21 = vmax.f32 %v767_v20, 0.0 }
 0x105   :  { %827 = vst [vmem:[%s1699_s3 + $0x58] sm:$0xff] %v805_v21 }
 0x106   :  { %v705_v23 = vpop.f32.mrf.mxu2  ;;  %v579_v26 = vpop.f32.mrf.mxu0 }
 0x107   :  { %v769_v24 = vpop.f32.mrf.mxu3  ;;  %v706_v25 = vadd.f32 %v705_v23, %v642_v22  ;;  %v643_v27 = vpop.f32.mrf.mxu1  ;;  %v580_v29 = vadd.f32 %v1534_v0, %v579_v26 }
 0x109   :  { %v770_v28 = vadd.f32 %v769_v24, %v706_v25  ;;  %v644_v31 = vadd.f32 %v643_v27, %v580_v29 }
 0x10b   :  { %v806_v30 = vmax.f32 %v770_v28, 0.0 }
 0x10d   :  { %828 = vst [vmem:[%s1699_s3 + $0x60] sm:$0xff] %v806_v30 }
 0x10e   :  { %v707_v32 = vpop.f32.mrf.mxu2  ;;  %v582_v35 = vpop.f32.mrf.mxu0 }
 0x10f   :  { %v771_v33 = vpop.f32.mrf.mxu3  ;;  %v708_v34 = vadd.f32 %v707_v32, %v644_v31  ;;  %v646_v36 = vpop.f32.mrf.mxu1  ;;  %v583_v37 = vadd.f32 %v1534_v0, %v582_v35 }
 0x111   :  { %v772_v38 = vadd.f32 %v771_v33, %v708_v34  ;;  %v647_v40 = vadd.f32 %v646_v36, %v583_v37 }
 0x113   :  { %v807_v39 = vmax.f32 %v772_v38, 0.0 }
 0x115   :  { %829 = vst [vmem:[%s1699_s3 + $0x68] sm:$0xff] %v807_v39 }
 0x116   :  { %v710_v41 = vpop.f32.mrf.mxu2  ;;  %v584_v44 = vpop.f32.mrf.mxu0 }
 0x117   :  { %v774_v42 = vpop.f32.mrf.mxu3  ;;  %v711_v43 = vadd.f32 %v710_v41, %v647_v40  ;;  %v648_v45 = vpop.f32.mrf.mxu1  ;;  %v585_v47 = vadd.f32 %v1534_v0, %v584_v44 }
 0x119   :  { %v775_v46 = vadd.f32 %v774_v42, %v711_v43  ;;  %v649_v49 = vadd.f32 %v648_v45, %v585_v47 }
 0x11b   :  { %v808_v48 = vmax.f32 %v775_v46, 0.0 }
 0x11d   :  { %830 = vst [vmem:[%s1699_s3 + $0x70] sm:$0xff] %v808_v48 }
 0x11e   :  { %v712_v50 = vpop.f32.mrf.mxu2  ;;  %v587_v53 = vpop.f32.mrf.mxu0 }
 0x11f   :  { %v776_v51 = vpop.f32.mrf.mxu3  ;;  %v713_v52 = vadd.f32 %v712_v50, %v649_v49  ;;  %v651_v54 = vpop.f32.mrf.mxu1  ;;  %v588_v55 = vadd.f32 %v1534_v0, %v587_v53 }
 0x121   :  { %v777_v56 = vadd.f32 %v776_v51, %v713_v52  ;;  %v652_v58 = vadd.f32 %v651_v54, %v588_v55 }
 0x123   :  { %v809_v57 = vmax.f32 %v777_v56, 0.0 }
 0x125   :  { %831 = vst [vmem:[%s1699_s3 + $0x78] sm:$0xff] %v809_v57 }
 0x126   :  { %v715_v59 = vpop.f32.mrf.mxu2  ;;  %v589_v62 = vpop.f32.mrf.mxu0 }
 0x127   :  { %v779_v60 = vpop.f32.mrf.mxu3  ;;  %v716_v61 = vadd.f32 %v715_v59, %v652_v58  ;;  %v653_v63 = vpop.f32.mrf.mxu1  ;;  %v590_v2 = vadd.f32 %v1534_v0, %v589_v62 }
 0x129   :  { %v780_v1 = vadd.f32 %v779_v60, %v716_v61  ;;  %v654_v4 = vadd.f32 %v653_v63, %v590_v2 }
 0x12b   :  { %v810_v3 = vmax.f32 %v780_v1, 0.0 }
 0x12d   :  { %832 = vst [vmem:[%s1699_s3 + $0x80] sm:$0xff] %v810_v3 }
 0x12e   :  { %v717_v5 = vpop.f32.mrf.mxu2  ;;  %v592_v8 = vpop.f32.mrf.mxu0 }
 0x12f   :  { %v781_v6 = vpop.f32.mrf.mxu3  ;;  %v718_v7 = vadd.f32 %v717_v5, %v654_v4  ;;  %v656_v9 = vpop.f32.mrf.mxu1  ;;  %v593_v10 = vadd.f32 %v1534_v0, %v592_v8 }
 0x131   :  { %v782_v11 = vadd.f32 %v781_v6, %v718_v7  ;;  %v657_v13 = vadd.f32 %v656_v9, %v593_v10 }
 0x133   :  { %v811_v12 = vmax.f32 %v782_v11, 0.0 }
 0x135   :  { %833 = vst [vmem:[%s1699_s3 + $0x88] sm:$0xff] %v811_v12 }
 0x136   :  { %v720_v14 = vpop.f32.mrf.mxu2  ;;  %v594_v17 = vpop.f32.mrf.mxu0 }
 0x137   :  { %v784_v15 = vpop.f32.mrf.mxu3  ;;  %v721_v16 = vadd.f32 %v720_v14, %v657_v13  ;;  %v658_v18 = vpop.f32.mrf.mxu1  ;;  %v595_v20 = vadd.f32 %v1534_v0, %v594_v17 }
 0x139   :  { %v785_v19 = vadd.f32 %v784_v15, %v721_v16  ;;  %v659_v22 = vadd.f32 %v658_v18, %v595_v20 }
 0x13b   :  { %v812_v21 = vmax.f32 %v785_v19, 0.0 }
 0x13d   :  { %834 = vst [vmem:[%s1699_s3 + $0x90] sm:$0xff] %v812_v21 }
 0x13e   :  { %v722_v23 = vpop.f32.mrf.mxu2  ;;  %v597_v26 = vpop.f32.mrf.mxu0 }
 0x13f   :  { %v786_v24 = vpop.f32.mrf.mxu3  ;;  %v723_v25 = vadd.f32 %v722_v23, %v659_v22  ;;  %v598_v27 = vadd.f32 %v1534_v0, %v597_v26  ;;  %v661_v29 = vpop.f32.mrf.mxu1 }
 0x141   :  { %v787_v28 = vadd.f32 %v786_v24, %v723_v25  ;;  %v662_v31 = vadd.f32 %v661_v29, %v598_v27 }
 0x143   :  { %v813_v30 = vmax.f32 %v787_v28, 0.0 }
 0x145   :  { %835 = vst [vmem:[%s1699_s3 + $0x98] sm:$0xff] %v813_v30 }
 0x146   :  { %v725_v32 = vpop.f32.mrf.mxu2  ;;  %v599_v35 = vpop.f32.mrf.mxu0 }
 0x147   :  { %v789_v33 = vpop.f32.mrf.mxu3  ;;  %v726_v34 = vadd.f32 %v725_v32, %v662_v31  ;;  %v600_v37 = vadd.f32 %v1534_v0, %v599_v35  ;;  %v663_v39 = vpop.f32.mrf.mxu1 }
 0x149   :  { %v790_v36 = vadd.f32 %v789_v33, %v726_v34  ;;  %v664_v40 = vadd.f32 %v663_v39, %v600_v37 }
 0x14b   :  { %v814_v38 = vmax.f32 %v790_v36, 0.0 }
 0x14d   :  { %836 = vst [vmem:[%s1699_s3 + $0xa0] sm:$0xff] %v814_v38 }
 0x14e   :  { %v727_v41 = vpop.f32.mrf.mxu2 }
 0x14f   :  { %v728_v42 = vadd.f32 %v727_v41, %v664_v40  ;;  %v791_v43 = vpop.f32.mrf.mxu3 }
 0x151   :  { %v792_v44 = vadd.f32 %v791_v43, %v728_v42 }
 0x153   :  { %v815_v45 = vmax.f32 %v792_v44, 0.0 }
 0x155   :  { %837 = vst [vmem:[%s1699_s3 + $0xa8] sm:$0xff] %v815_v45 }

// kernel: _rvs_forward_impl.6
= control target key start
LH: loop header
LB: loop body
LE: loop exit
PB: predicated region body
PF: predicated region fallthrough
CT: control target
= control target key end

     0   :  { %vm524_vm0 = vcmask 523264   ;;  %s1621_s1 = inlined_call_operand.vmem [shape: bf16[576,128], index: 1, kind: input, shape index: {}]   ;;  %s1622_s2 = inlined_call_operand.vmem [shape: f32[1,128], index: 2, kind: input, shape index: {}]   ;;  %s1623_s0 = inlined_call_operand.vmem [shape: bf16[112,576], index: 0, kind: input, shape index: {}]   ;;  %s1624_s3 = inlined_call_operand.vmem [shape: f32[112,128], index: 3, kind: output, shape index: {}]  }
   0x1   :  { %v1131_v0 = vld [vmem:[%s1621_s1 + $0x38] sm:$0xff]  ;;  %v1130_v1 = vld [vmem:[%s1621_s1 + $0x30] sm:$0xff]  ;;  %v1129_v2 = vld [vmem:[%s1621_s1 + $0x28] sm:$0xff] }
   0x2   :  { %1160 = vmatpush.bf16.msra.mxu1 %v1131_v0  ;;  %1161 = vmatpush.bf16.msra.mxu2 %v1131_v0  ;;  %v1128_v3 = vld [vmem:[%s1621_s1 + $0x20] sm:$0xff]  ;;  %v1127_v4 = vld [vmem:[%s1621_s1 + $0x18] sm:$0xff]  ;;  %v1126_v5 = vld [vmem:[%s1621_s1 + $0x10] sm:$0xff] }
   0x3   :  { %1162 = vmatpush.bf16.msra.mxu3 %v1131_v0  ;;  %546 = vmatpush.bf16.msra.mxu0 %v1131_v0  ;;  %v1125_v6 = vld [vmem:[%s1621_s1 + $0x8] sm:$0xff]  ;;  %v1124_v7 = vld [vmem:[%s1621_s1] sm:$0xff]  ;;  %v840_v8 = vld [vmem:[%s1623_s0 + $0x50] sm:$0xf] }
   0x4   :  { %v1101_v9 = vld [vmem:[%s1623_s0 + $0x60] sm:$0xf0]  ;;  %v880_v10 = vld [vmem:[%s1623_s0 + $0xa0] sm:$0xf]  ;;  %v1111_v11 = vld [vmem:[%s1623_s0 + $0xb0] sm:$0xf0] }
   0x5   :  { %v1155_v12 = vld [vmem:[%s1621_s1 + $0xf8] sm:$0xff]  ;;  %v800_v13 = vld [vmem:[%s1623_s0] sm:$0xf]  ;;  %v1091_v14 = vld [vmem:[%s1623_s0 + $0x10] sm:$0xf0]  ;;  %v841_v18 = vor.u32 %v1101_v9, %v840_v8  ;;  %v881_v19 = vor.u32 %v1111_v11, %v880_v10 }
   0x6   :  { %1163 = vmatpush.bf16.msra.mxu1 %v1130_v1  ;;  %1164 = vmatpush.bf16.msra.mxu2 %v1130_v1  ;;  %v1147_v15 = vld [vmem:[%s1621_s1 + $0xb8] sm:$0xff]  ;;  %v920_v16 = vld [vmem:[%s1623_s0 + $0xf0] sm:$0xf]  ;;  %v1121_v17 = vld [vmem:[%s1623_s0 + $0x100] sm:$0xf0]  ;;  %v801_v21 = vor.u32 %v1091_v14, %v800_v13 }
   0x7   :  { %1165 = vmatpush.bf16.msra.mxu3 %v1130_v1  ;;  %547 = vmatpush.bf16.msra.mxu0 %v1130_v1  ;;  %v1139_v20 = vld [vmem:[%s1621_s1 + $0x78] sm:$0xff]  ;;  %v921_v22 = vor.u32 %v1121_v17, %v920_v16  ;;  %v1154_v24 = vld [vmem:[%s1621_s1 + $0xf0] sm:$0xff]  ;;  %v1153_v28 = vld [vmem:[%s1621_s1 + $0xe8] sm:$0xff] }
   0x8   :  { %v1159_v23 = vld [vmem:[%s1621_s1 + $0x118] sm:$0xff]  ;;  %v1146_v25 = vld [vmem:[%s1621_s1 + $0xb0] sm:$0xff]  ;;  %v1145_v29 = vld [vmem:[%s1621_s1 + $0xa8] sm:$0xff] }
   0x9   :  { %v1138_v26 = vld [vmem:[%s1621_s1 + $0x70] sm:$0xff]  ;;  %v1137_v30 = vld [vmem:[%s1621_s1 + $0x68] sm:$0xff]  ;;  %v1152_v32 = vld [vmem:[%s1621_s1 + $0xe0] sm:$0xff] }
   0xa   :  { %1166 = vmatpush.bf16.msra.mxu1 %v1129_v2  ;;  %1167 = vmatpush.bf16.msra.mxu2 %v1129_v2  ;;  %v1158_v27 = vld [vmem:[%s1621_s1 + $0x110] sm:$0xff]  ;;  %v1157_v31 = vld [vmem:[%s1621_s1 + $0x108] sm:$0xff]  ;;  %v1144_v33 = vld [vmem:[%s1621_s1 + $0xa0] sm:$0xff] }
   0xb   :  { %1168 = vmatpush.bf16.msra.mxu3 %v1129_v2  ;;  %548 = vmatpush.bf16.msra.mxu0 %v1129_v2  ;;  %v1136_v34 = vld [vmem:[%s1621_s1 + $0x60] sm:$0xff]  ;;  %v860_v35 = vld [vmem:[%s1623_s0 + $0x78] sm:$0xf]  ;;  %v1106_v36 = vld [vmem:[%s1623_s0 + $0x88] sm:$0xf0] }
   0xc   :  { %v900_v37 = vld [vmem:[%s1623_s0 + $0xc8] sm:$0xf]  ;;  %v1116_v38 = vld [vmem:[%s1623_s0 + $0xd8] sm:$0xf0]  ;;  %v1156_v41 = vld [vmem:[%s1621_s1 + $0x100] sm:$0xff]  ;;  %v861_v44 = vor.u32 %v1106_v36, %v860_v35 }
   0xd   :  { %v820_v39 = vld [vmem:[%s1623_s0 + $0x28] sm:$0xf]  ;;  %v1096_v40 = vld [vmem:[%s1623_s0 + $0x38] sm:$0xf0]  ;;  %v901_v45 = vor.u32 %v1116_v38, %v900_v37  ;;  %v1150_v48 = vld [vmem:[%s1621_s1 + $0xd0] sm:$0xff] }
   0xe   :  { %1169 = vmatpush.bf16.msra.mxu1 %v1128_v3  ;;  %1170 = vmatpush.bf16.msra.mxu2 %v1128_v3  ;;  %v1151_v42 = vld [vmem:[%s1621_s1 + $0xd8] sm:$0xff]  ;;  %v821_v47 = vor.u32 %v1096_v40, %v820_v39  ;;  %v1142_v49 = vld [vmem:[%s1621_s1 + $0x90] sm:$0xff]  ;;  %v1149_v51 = vld [vmem:[%s1621_s1 + $0xc8] sm:$0xff] }
   0xf   :  { %1171 = vmatpush.bf16.msra.mxu3 %v1128_v3  ;;  %549 = vmatpush.bf16.msra.mxu0 %v1128_v3  ;;  %v1143_v43 = vld [vmem:[%s1621_s1 + $0x98] sm:$0xff]  ;;  %v1134_v50 = vld [vmem:[%s1621_s1 + $0x50] sm:$0xff]  ;;  %v1141_v52 = vld [vmem:[%s1621_s1 + $0x88] sm:$0xff] }
  0x10   :  { %v1135_v46 = vld [vmem:[%s1621_s1 + $0x58] sm:$0xff]  ;;  %v1133_v53 = vld [vmem:[%s1621_s1 + $0x48] sm:$0xff]  ;;  %v1148_v54 = vld [vmem:[%s1621_s1 + $0xc0] sm:$0xff] }
  0x11   :  { %v1140_v55 = vld [vmem:[%s1621_s1 + $0x80] sm:$0xff]  ;;  %v1090_v56 = vld [vmem:[%s1623_s0 + $0xc] sm:$0xf]  ;;  %v802_v60 = vld [vmem:[%s1623_s0 + $0x14] sm:$0xf0] }
  0x12   :  { %1172 = vmatpush.bf16.msra.mxu1 %v1127_v4  ;;  %1173 = vmatpush.bf16.msra.mxu2 %v1127_v4  ;;  %v810_v57 = vld [vmem:[%s1623_s0 + $0x1c] sm:$0xf0]  ;;  %v1089_v59 = vld [vmem:[%s1623_s0 + $0x4] sm:$0xf]  ;;  %v808_v61 = vld [vmem:[%s1623_s0 + $0x8] sm:$0xf] }
  0x13   :  { %1174 = vmatpush.bf16.msra.mxu3 %v1127_v4  ;;  %550 = vmatpush.bf16.msra.mxu0 %v1127_v4  ;;  %v1132_v58 = vld [vmem:[%s1621_s1 + $0x40] sm:$0xff]  ;;  %v1092_v62 = vld [vmem:[%s1623_s0 + $0x18] sm:$0xf0]  ;;  %v813_v63 = vor.u32 %v1090_v56, %v810_v57  ;;  %v816_v0 = vld [vmem:[%s1623_s0 + $0x10] sm:$0xf]  ;;  %v805_v2 = vor.u32 %v1089_v59, %v802_v60 }
  0x14   :  { %v1093_v1 = vld [vmem:[%s1623_s0 + $0x20] sm:$0xf0]  ;;  %v809_v3 = vor.u32 %v1092_v62, %v808_v61  ;;  %v822_v8 = vld [vmem:[%s1623_s0 + $0x3c] sm:$0xf0]  ;;  %v828_v9 = vld [vmem:[%s1623_s0 + $0x30] sm:$0xf] }
  0x15   :  { %v817_v4 = vor.u32 %v1093_v1, %v816_v0  ;;  %v1097_v10 = vld [vmem:[%s1623_s0 + $0x40] sm:$0xf0]  ;;  %v1098_v13 = vld [vmem:[%s1623_s0 + $0x48] sm:$0xf0]  ;;  %v1100_v17 = vld [vmem:[%s1623_s0 + $0x5c] sm:$0xf] }
  0x16   :  { %1175 = vmatpush.bf16.msra.mxu1 %v1126_v5  ;;  %1176 = vmatpush.bf16.msra.mxu2 %v1126_v5  ;;  %v876_v36 = vld [vmem:[%s1623_s0 + $0x88] sm:$0xf]  ;;  %v1108_v37 = vld [vmem:[%s1623_s0 + $0x98] sm:$0xf0]  ;;  %v902_v56 = vld [vmem:[%s1623_s0 + $0xdc] sm:$0xf0] }
  0x17   :  { %1177 = vmatpush.bf16.msra.mxu3 %v1126_v5  ;;  %551 = vmatpush.bf16.msra.mxu0 %v1126_v5  ;;  %v1095_v5 = vld [vmem:[%s1623_s0 + $0x34] sm:$0xf]  ;;  %v877_v40 = vor.u32 %v1108_v37, %v876_v36  ;;  %v908_v57 = vld [vmem:[%s1623_s0 + $0xd0] sm:$0xf]  ;;  %v916_v60 = vld [vmem:[%s1623_s0 + $0xd8] sm:$0xf] }
  0x18   :  { %v1118_v61 = vld [vmem:[%s1623_s0 + $0xe8] sm:$0xf0]  ;;  %v1120_v1 = vld [vmem:[%s1623_s0 + $0xfc] sm:$0xf] }
  0x19   :  { %v917_v0 = vor.u32 %v1118_v61, %v916_v60 }
  0x1a   :  { %1178 = vmatpush.bf16.msra.mxu1 %v1125_v6  ;;  %1179 = vmatpush.bf16.msra.mxu2 %v1125_v6 }
  0x1b   :  { %1180 = vmatpush.bf16.msra.mxu3 %v1125_v6  ;;  %552 = vmatpush.bf16.msra.mxu0 %v1125_v6  ;;  %v830_v6 = vld [vmem:[%s1623_s0 + $0x44] sm:$0xf0] }
  0x1c   :  { %v833_v11 = vor.u32 %v1095_v5, %v830_v6  ;;  %v928_v5 = vld [vmem:[%s1623_s0 + $0xf8] sm:$0xf]  ;;  %v1122_v6 = vld [vmem:[%s1623_s0 + $0x108] sm:$0xf0] }
  0x1e   :  { %1181 = vmatpush.bf16.msra.mxu1 %v1124_v7  ;;  %1182 = vmatpush.bf16.msra.mxu2 %v1124_v7 }
  0x1f   :  { %1183 = vmatpush.bf16.msra.mxu3 %v1124_v7  ;;  %553 = vmatpush.bf16.msra.mxu0 %v1124_v7  ;;  %v1094_v7 = vld [vmem:[%s1623_s0 + $0x2c] sm:$0xf] }
  0x20   :  { %v825_v14 = vor.u32 %v1094_v7, %v822_v8  ;;  %v936_v8 = vld [vmem:[%s1623_s0 + $0x100] sm:$0xf] }
  0x21   :  { %564 = vmatmul.bf16.vlgmr.msra.gmra.mxu1 %v841_v18  ;;  %574 = vmatmul.bf16.vlgmr.msra.gmra.mxu2 %v881_v19  ;;  %v850_v18 = vld [vmem:[%s1623_s0 + $0x6c] sm:$0xf0]  ;;  %v1099_v19 = vld [vmem:[%s1623_s0 + $0x54] sm:$0xf] }
  0x22   :  { %634 = vmatpush.bf16.msrb.mxu2 %v1147_v15  ;;  %590 = vmatpush.bf16.msrb.mxu1 %v1139_v20  ;;  %v829_v15 = vor.u32 %v1097_v10, %v828_v9  ;;  %v842_v20 = vld [vmem:[%s1623_s0 + $0x64] sm:$0xf0]  ;;  %v1123_v9 = vld [vmem:[%s1623_s0 + $0x110] sm:$0xf0] }
  0x23   :  { %678 = vmatpush.bf16.msrb.mxu3 %v1155_v12  ;;  %554 = vmatmul.bf16.vlgmr.msra.gmra.mxu0 %v801_v21  ;;  %v836_v12 = vld [vmem:[%s1623_s0 + $0x38] sm:$0xf] }
  0x24   :  { %584 = vmatmul.bf16.vlgmr.msra.gmra.mxu3 %v921_v22  ;;  %726 = vmatpush.bf16.msrb.mxu0 %v1159_v23  ;;  %v837_v16 = vor.u32 %v1098_v13, %v836_v12  ;;  %v848_v21 = vld [vmem:[%s1623_s0 + $0x58] sm:$0xf]  ;;  %v1102_v22 = vld [vmem:[%s1623_s0 + $0x68] sm:$0xf0]  ;;  %v853_v23 = vor.u32 %v1100_v17, %v850_v18  ;;  %v937_v13 = vor.u32 %v1123_v9, %v936_v8 }
  0x26   :  { %635 = vmatpush.bf16.msrb.mxu2 %v1146_v25  ;;  %591 = vmatpush.bf16.msrb.mxu1 %v1138_v26  ;;  %v1103_v25 = vld [vmem:[%s1623_s0 + $0x70] sm:$0xf0]  ;;  %v845_v26 = vor.u32 %v1099_v19, %v842_v20 }
  0x27   :  { %679 = vmatpush.bf16.msrb.mxu3 %v1154_v24  ;;  %v856_v24 = vld [vmem:[%s1623_s0 + $0x60] sm:$0xf] }
  0x28   :  { %727 = vmatpush.bf16.msrb.mxu0 %v1158_v27  ;;  %v849_v27 = vor.u32 %v1102_v22, %v848_v21 }
  0x2a   :  { %636 = vmatpush.bf16.msrb.mxu2 %v1145_v29  ;;  %592 = vmatpush.bf16.msrb.mxu1 %v1137_v30  ;;  %v1105_v29 = vld [vmem:[%s1623_s0 + $0x84] sm:$0xf]  ;;  %v870_v30 = vld [vmem:[%s1623_s0 + $0x94] sm:$0xf0] }
  0x2b   :  { %680 = vmatpush.bf16.msrb.mxu3 %v1153_v28  ;;  %v857_v28 = vor.u32 %v1103_v25, %v856_v24  ;;  %v873_v35 = vor.u32 %v1105_v29, %v870_v30 }
  0x2c   :  { %728 = vmatpush.bf16.msrb.mxu0 %v1157_v31  ;;  %v1104_v31 = vld [vmem:[%s1623_s0 + $0x7c] sm:$0xf] }
  0x2e   :  { %637 = vmatpush.bf16.msrb.mxu2 %v1144_v33  ;;  %593 = vmatpush.bf16.msrb.mxu1 %v1136_v34  ;;  %v868_v33 = vld [vmem:[%s1623_s0 + $0x80] sm:$0xf]  ;;  %v1107_v34 = vld [vmem:[%s1623_s0 + $0x90] sm:$0xf0] }
  0x2f   :  { %681 = vmatpush.bf16.msrb.mxu3 %v1152_v32  ;;  %v862_v32 = vld [vmem:[%s1623_s0 + $0x8c] sm:$0xf0]  ;;  %v869_v39 = vor.u32 %v1107_v34, %v868_v33 }
  0x30   :  { %729 = vmatpush.bf16.msrb.mxu0 %v1156_v41  ;;  %v865_v38 = vor.u32 %v1104_v31, %v862_v32  ;;  %v1110_v41 = vld [vmem:[%s1623_s0 + $0xac] sm:$0xf] }
  0x31   :  { %569 = vmatmul.bf16.gmra.mxu1 %v861_v44  ;;  %579 = vmatmul.bf16.gmra.mxu2 %v901_v45  ;;  %v882_v44 = vld [vmem:[%s1623_s0 + $0xb4] sm:$0xf0]  ;;  %v888_v45 = vld [vmem:[%s1623_s0 + $0xa8] sm:$0xf] }
  0x32   :  { %638 = vmatpush.bf16.msrb.mxu2 %v1143_v43  ;;  %594 = vmatpush.bf16.msrb.mxu1 %v1135_v46  ;;  %v1109_v43 = vld [vmem:[%s1623_s0 + $0xa4] sm:$0xf]  ;;  %v1112_v46 = vld [vmem:[%s1623_s0 + $0xb8] sm:$0xf0] }
  0x33   :  { %682 = vmatpush.bf16.msrb.mxu3 %v1151_v42  ;;  %559 = vmatmul.bf16.gmra.mxu0 %v821_v47  ;;  %v890_v42 = vld [vmem:[%s1623_s0 + $0xbc] sm:$0xf0] }
  0x34   :  { %v893_v47 = vor.u32 %v1110_v41, %v890_v42 }
  0x36   :  { %639 = vmatpush.bf16.msrb.mxu2 %v1142_v49  ;;  %595 = vmatpush.bf16.msrb.mxu1 %v1134_v50  ;;  %v1113_v49 = vld [vmem:[%s1623_s0 + $0xc0] sm:$0xf0]  ;;  %v885_v50 = vor.u32 %v1109_v43, %v882_v44 }
  0x37   :  { %683 = vmatpush.bf16.msrb.mxu3 %v1150_v48  ;;  %v896_v48 = vld [vmem:[%s1623_s0 + $0xb0] sm:$0xf] }
  0x3a   :  { %640 = vmatpush.bf16.msrb.mxu2 %v1141_v52  ;;  %596 = vmatpush.bf16.msrb.mxu1 %v1133_v53  ;;  %v897_v52 = vor.u32 %v1113_v49, %v896_v48  ;;  %v1115_v53 = vld [vmem:[%s1623_s0 + $0xd4] sm:$0xf] }
  0x3b   :  { %684 = vmatpush.bf16.msrb.mxu3 %v1149_v51  ;;  %v889_v51 = vor.u32 %v1112_v46, %v888_v45 }
  0x3e   :  { %641 = vmatpush.bf16.msrb.mxu2 %v1140_v55  ;;  %597 = vmatpush.bf16.msrb.mxu1 %v1132_v58  ;;  %v1114_v55 = vld [vmem:[%s1623_s0 + $0xcc] sm:$0xf]  ;;  %v1117_v58 = vld [vmem:[%s1623_s0 + $0xe0] sm:$0xf0] }
  0x3f   :  { %685 = vmatpush.bf16.msrb.mxu3 %v1148_v54  ;;  %v910_v54 = vld [vmem:[%s1623_s0 + $0xe4] sm:$0xf0]  ;;  %v905_v62 = vor.u32 %v1114_v55, %v902_v56 }
  0x40   :  { %v913_v59 = vor.u32 %v1115_v53, %v910_v54 }
  0x41   :  { %598 = vmatmul.bf16.vlgmr.msrb.gmra.mxu1 %v805_v2  ;;  %642 = vmatmul.bf16.vlgmr.msrb.gmra.mxu2 %v809_v3  ;;  %v930_v2 = vld [vmem:[%s1623_s0 + $0x10c] sm:$0xf0]  ;;  %v1119_v3 = vld [vmem:[%s1623_s0 + $0xf4] sm:$0xf] }
  0x42   :  { %686 = vmatmul.bf16.vlgmr.msrb.gmra.mxu3 %v813_v63  ;;  %v909_v63 = vor.u32 %v1117_v58, %v908_v57  ;;  %v933_v7 = vor.u32 %v1120_v1, %v930_v2 }
  0x43   :  { %1082 = vmatmul.msk.bf16.vlgmr.msrb.gmra.mxu0 %vm524_vm0, %v817_v4  ;;  %v922_v4 = vld [vmem:[%s1623_s0 + $0x104] sm:$0xf0] }
  0x44   :  { %v925_v10 = vor.u32 %v1119_v3, %v922_v4 }
  0x51   :  { %603 = vmatmul.bf16.gmra.mxu1 %v825_v14  ;;  %647 = vmatmul.bf16.gmra.mxu2 %v829_v15  ;;  %v1535_v15 = vld [vmem:[%s1622_s2] ss:$0 sm:$0xff] }
  0x52   :  { %691 = vmatmul.bf16.gmra.mxu3 %v833_v11  ;;  %v929_v11 = vor.u32 %v1122_v6, %v928_v5 }
  0x53   :  { %1083 = vmatmul.msk.bf16.gmra.mxu0 %vm524_vm0, %v837_v16 }
  0x61   :  { %608 = vmatmul.bf16.gmra.mxu1 %v845_v26  ;;  %652 = vmatmul.bf16.gmra.mxu2 %v849_v27 }
  0x62   :  { %696 = vmatmul.bf16.gmra.mxu3 %v853_v23 }
  0x63   :  { %1084 = vmatmul.msk.bf16.gmra.mxu0 %vm524_vm0, %v857_v28 }
  0x71   :  { %613 = vmatmul.bf16.gmra.mxu1 %v865_v38  ;;  %657 = vmatmul.bf16.gmra.mxu2 %v869_v39 }
  0x72   :  { %701 = vmatmul.bf16.gmra.mxu3 %v873_v35 }
  0x73   :  { %1085 = vmatmul.msk.bf16.gmra.mxu0 %vm524_vm0, %v877_v40 }
  0x81   :  { %618 = vmatmul.bf16.gmra.mxu1 %v885_v50  ;;  %662 = vmatmul.bf16.gmra.mxu2 %v889_v51 }
  0x82   :  { %706 = vmatmul.bf16.gmra.mxu3 %v893_v47 }
  0x83   :  { %1086 = vmatmul.msk.bf16.gmra.mxu0 %vm524_vm0, %v897_v52 }
  0x91   :  { %623 = vmatmul.bf16.gmra.mxu1 %v905_v62  ;;  %667 = vmatmul.bf16.gmra.mxu2 %v909_v63 }
  0x92   :  { %711 = vmatmul.bf16.gmra.mxu3 %v913_v59 }
  0x93   :  { %1087 = vmatmul.msk.bf16.gmra.mxu0 %vm524_vm0, %v917_v0 }
  0x9e   :  { %v1529_v12 = vpop.f32.mrf.mxu1 }
  0xa0   :  { %v555_v14 = vpop.f32.mrf.mxu0 }
  0xa1   :  { %628 = vmatmul.bf16.gmra.mxu1 %v925_v10  ;;  %672 = vmatmul.bf16.gmra.mxu2 %v929_v11  ;;  %v556_v36 = vadd.f32 %v1535_v15, %v555_v14  ;;  %v566_v10 = vadd.f32 %v1535_v15, %v1529_v12 }
  0xa2   :  { %716 = vmatmul.bf16.gmra.mxu3 %v933_v7 }
  0xa3   :  { %1088 = vmatmul.msk.bf16.gmra.mxu0 %vm524_vm0, %v937_v13 }
  0xa4   :  { %v575_v16 = vpop.f32.mrf.mxu2 }
  0xa5   :  { %v1538_v17 = vadd.f32 %v1535_v15, %v575_v16 }
  0xa6   :  { %v1540_v18 = vpop.f32.mrf.mxu1 }
  0xa7   :  { %v585_v19 = vpop.f32.mrf.mxu3 }
  0xa8   :  { %v557_v20 = vpop.f32.mrf.mxu0  ;;  %v1543_v21 = vadd.f32 %v1535_v15, %v585_v19 }
  0xa9   :  { %v558_v44 = vadd.f32 %v1535_v15, %v557_v20 }
  0xac   :  { %v577_v22 = vpop.f32.mrf.mxu2 }
  0xad   :  { %v1546_v23 = vadd.f32 %v1535_v15, %v577_v22 }
  0xae   :  { %v1548_v24 = vpop.f32.mrf.mxu1 }
  0xaf   :  { %v587_v25 = vpop.f32.mrf.mxu3 }
  0xb0   :  { %v560_v26 = vpop.f32.mrf.mxu0  ;;  %v1551_v27 = vadd.f32 %v1535_v15, %v587_v25 }
  0xb1   :  { %v561_v54 = vadd.f32 %v1535_v15, %v560_v26 }
  0xb4   :  { %v580_v28 = vpop.f32.mrf.mxu2 }
  0xb5   :  { %v1554_v29 = vadd.f32 %v1535_v15, %v580_v28  ;;  %v568_v28 = vadd.f32 %v1535_v15, %v1540_v18 }
  0xb6   :  { %v1556_v30 = vpop.f32.mrf.mxu1 }
  0xb8   :  { %v562_v31 = vpop.f32.mrf.mxu0 }
  0xb9   :  { %v563_v0 = vadd.f32 %v1535_v15, %v562_v31 }
  0xbc   :  { %v582_v32 = vpop.f32.mrf.mxu2 }
  0xbd   :  { %v1559_v33 = vadd.f32 %v1535_v15, %v582_v32 }
  0xbe   :  { %v599_v34 = vpop.f32.mrf.mxu1 }
  0xbf   :  { %v600_v38 = vadd.f32 %v599_v34, %v556_v36 }
  0xc0   :  { %v731_v35 = vpop.f32.mrf.mxu0 }
  0xc4   :  { %v643_v39 = vpop.f32.mrf.mxu2 }
  0xc5   :  { %v687_v37 = vpop.f32.mrf.mxu3  ;;  %v644_v40 = vadd.f32 %v643_v39, %v600_v38 }
  0xc6   :  { %v601_v41 = vpop.f32.mrf.mxu1 }
  0xc7   :  { %v688_v42 = vadd.f32 %v687_v37, %v644_v40  ;;  %v602_v48 = vadd.f32 %v601_v41, %v558_v44  ;;  %v571_v40 = vadd.f32 %v1535_v15, %v1548_v24 }
  0xc8   :  { %v733_v43 = vpop.f32.mrf.mxu0 }
  0xc9   :  { %v732_v45 = vadd.f32 %v731_v35, %v688_v42 }
  0xcb   :  { %v766_v47 = vmax.f32 %v732_v45, 0.0 }
  0xcc   :  { %v645_v49 = vpop.f32.mrf.mxu2 }
  0xcd   :  { %v689_v46 = vpop.f32.mrf.mxu3  ;;  %780 = vst [vmem:[%s1624_s3] sm:$0xff] %v766_v47  ;;  %v646_v50 = vadd.f32 %v645_v49, %v602_v48  ;;  %v573_v49 = vadd.f32 %v1535_v15, %v1556_v30 }
  0xce   :  { %v604_v51 = vpop.f32.mrf.mxu1 }
  0xcf   :  { %v690_v52 = vadd.f32 %v689_v46, %v646_v50  ;;  %v605_v58 = vadd.f32 %v604_v51, %v561_v54 }
  0xd0   :  { %v736_v53 = vpop.f32.mrf.mxu0 }
  0xd1   :  { %v734_v55 = vadd.f32 %v733_v43, %v690_v52 }
  0xd3   :  { %v767_v57 = vmax.f32 %v734_v55, 0.0 }
  0xd4   :  { %v648_v59 = vpop.f32.mrf.mxu2 }
  0xd5   :  { %v692_v56 = vpop.f32.mrf.mxu3  ;;  %781 = vst [vmem:[%s1624_s3 + $0x8] sm:$0xff] %v767_v57  ;;  %v649_v60 = vadd.f32 %v648_v59, %v605_v58 }
  0xd6   :  { %v606_v61 = vpop.f32.mrf.mxu1 }
  0xd7   :  { %v693_v62 = vadd.f32 %v692_v56, %v649_v60  ;;  %v607_v4 = vadd.f32 %v606_v61, %v563_v0 }
  0xd8   :  { %v738_v63 = vpop.f32.mrf.mxu0 }
  0xd9   :  { %v737_v1 = vadd.f32 %v736_v53, %v693_v62 }
  0xdb   :  { %v768_v3 = vmax.f32 %v737_v1, 0.0 }
  0xdc   :  { %v650_v5 = vpop.f32.mrf.mxu2 }
  0xdd   :  { %v694_v2 = vpop.f32.mrf.mxu3  ;;  %782 = vst [vmem:[%s1624_s3 + $0x10] sm:$0xff] %v768_v3  ;;  %v651_v6 = vadd.f32 %v650_v5, %v607_v4 }
  0xde   :  { %v609_v7 = vpop.f32.mrf.mxu1 }
  0xdf   :  { %v695_v8 = vadd.f32 %v694_v2, %v651_v6  ;;  %v610_v16 = vadd.f32 %v609_v7, %v566_v10 }
  0xe0   :  { %v741_v9 = vpop.f32.mrf.mxu0 }
  0xe1   :  { %v739_v11 = vadd.f32 %v738_v63, %v695_v8 }
  0xe3   :  { %v769_v14 = vmax.f32 %v739_v11, 0.0 }
  0xe4   :  { %v653_v19 = vpop.f32.mrf.mxu2 }
  0xe5   :  { %v697_v13 = vpop.f32.mrf.mxu3  ;;  %783 = vst [vmem:[%s1624_s3 + $0x18] sm:$0xff] %v769_v14  ;;  %v654_v20 = vadd.f32 %v653_v19, %v610_v16 }
  0xe6   :  { %v611_v22 = vpop.f32.mrf.mxu1 }
  0xe7   :  { %v698_v25 = vadd.f32 %v697_v13, %v654_v20  ;;  %v612_v12 = vadd.f32 %v611_v22, %v568_v28 }
  0xe8   :  { %v743_v26 = vpop.f32.mrf.mxu0 }
  0xe9   :  { %v742_v31 = vadd.f32 %v741_v9, %v698_v25 }
  0xeb   :  { %v770_v34 = vmax.f32 %v742_v31, 0.0 }
  0xec   :  { %v655_v35 = vpop.f32.mrf.mxu2 }
  0xed   :  { %v699_v32 = vpop.f32.mrf.mxu3  ;;  %784 = vst [vmem:[%s1624_s3 + $0x20] sm:$0xff] %v770_v34  ;;  %v656_v36 = vadd.f32 %v655_v35, %v612_v12 }
  0xee   :  { %v614_v37 = vpop.f32.mrf.mxu1 }
  0xef   :  { %v700_v38 = vadd.f32 %v699_v32, %v656_v36  ;;  %v615_v18 = vadd.f32 %v614_v37, %v571_v40 }
  0xf0   :  { %v746_v39 = vpop.f32.mrf.mxu0 }
  0xf1   :  { %v744_v41 = vadd.f32 %v743_v26, %v700_v38 }
  0xf3   :  { %v771_v43 = vmax.f32 %v744_v41, 0.0 }
  0xf4   :  { %v658_v44 = vpop.f32.mrf.mxu2 }
  0xf5   :  { %v702_v42 = vpop.f32.mrf.mxu3  ;;  %785 = vst [vmem:[%s1624_s3 + $0x28] sm:$0xff] %v771_v43  ;;  %v659_v45 = vadd.f32 %v658_v44, %v615_v18 }
  0xf6   :  { %v616_v46 = vpop.f32.mrf.mxu1 }
  0xf7   :  { %v703_v47 = vadd.f32 %v702_v42, %v659_v45  ;;  %v617_v24 = vadd.f32 %v616_v46, %v573_v49 }
  0xf8   :  { %v748_v48 = vpop.f32.mrf.mxu0 }
  0xf9   :  { %v747_v50 = vadd.f32 %v746_v39, %v703_v47 }
  0xfb   :  { %v772_v52 = vmax.f32 %v747_v50, 0.0 }
  0xfc   :  { %v660_v53 = vpop.f32.mrf.mxu2 }
  0xfd   :  { %v704_v51 = vpop.f32.mrf.mxu3  ;;  %786 = vst [vmem:[%s1624_s3 + $0x30] sm:$0xff] %v772_v52  ;;  %v661_v54 = vadd.f32 %v660_v53, %v617_v24 }
  0xfe   :  { %v619_v55 = vpop.f32.mrf.mxu1 }
  0xff   :  { %v705_v56 = vadd.f32 %v704_v51, %v661_v54  ;;  %v620_v61 = vadd.f32 %v619_v55, %v1538_v17 }
 0x100   :  { %v751_v57 = vpop.f32.mrf.mxu0 }
 0x101   :  { %v749_v58 = vadd.f32 %v748_v48, %v705_v56 }
 0x103   :  { %v773_v60 = vmax.f32 %v749_v58, 0.0 }
 0x104   :  { %v663_v62 = vpop.f32.mrf.mxu2 }
 0x105   :  { %v707_v59 = vpop.f32.mrf.mxu3  ;;  %787 = vst [vmem:[%s1624_s3 + $0x38] sm:$0xff] %v773_v60  ;;  %v664_v15 = vadd.f32 %v663_v62, %v620_v61 }
 0x106   :  { %v621_v30 = vpop.f32.mrf.mxu1 }
 0x107   :  { %v708_v63 = vadd.f32 %v707_v59, %v664_v15  ;;  %v622_v4 = vadd.f32 %v621_v30, %v1546_v23 }
 0x108   :  { %v753_v0 = vpop.f32.mrf.mxu0 }
 0x109   :  { %v752_v1 = vadd.f32 %v751_v57, %v708_v63 }
 0x10b   :  { %v774_v3 = vmax.f32 %v752_v1, 0.0 }
 0x10c   :  { %v665_v5 = vpop.f32.mrf.mxu2 }
 0x10d   :  { %v709_v2 = vpop.f32.mrf.mxu3  ;;  %788 = vst [vmem:[%s1624_s3 + $0x40] sm:$0xff] %v774_v3  ;;  %v666_v17 = vadd.f32 %v665_v5, %v622_v4 }
 0x10e   :  { %v624_v6 = vpop.f32.mrf.mxu1 }
 0x10f   :  { %v710_v7 = vadd.f32 %v709_v2, %v666_v17  ;;  %v625_v13 = vadd.f32 %v624_v6, %v1554_v29 }
 0x110   :  { %v756_v9 = vpop.f32.mrf.mxu0 }
 0x111   :  { %v754_v8 = vadd.f32 %v753_v0, %v710_v7 }
 0x113   :  { %v775_v11 = vmax.f32 %v754_v8, 0.0 }
 0x114   :  { %v668_v14 = vpop.f32.mrf.mxu2 }
 0x115   :  { %v712_v10 = vpop.f32.mrf.mxu3  ;;  %789 = vst [vmem:[%s1624_s3 + $0x48] sm:$0xff] %v775_v11  ;;  %v669_v23 = vadd.f32 %v668_v14, %v625_v13 }
 0x116   :  { %v626_v16 = vpop.f32.mrf.mxu1 }
 0x117   :  { %v713_v19 = vadd.f32 %v712_v10, %v669_v23  ;;  %v627_v26 = vadd.f32 %v626_v16, %v1559_v33 }
 0x118   :  { %v758_v28 = vpop.f32.mrf.mxu0 }
 0x119   :  { %v757_v20 = vadd.f32 %v756_v9, %v713_v19 }
 0x11b   :  { %v776_v25 = vmax.f32 %v757_v20, 0.0 }
 0x11c   :  { %v670_v31 = vpop.f32.mrf.mxu2 }
 0x11d   :  { %v714_v22 = vpop.f32.mrf.mxu3  ;;  %790 = vst [vmem:[%s1624_s3 + $0x50] sm:$0xff] %v776_v25  ;;  %v671_v29 = vadd.f32 %v670_v31, %v627_v26 }
 0x11e   :  { %v629_v32 = vpop.f32.mrf.mxu1 }
 0x11f   :  { %v715_v34 = vadd.f32 %v714_v22, %v671_v29  ;;  %v630_v36 = vadd.f32 %v629_v32, %v1543_v21 }
 0x120   :  { %v761_v39 = vpop.f32.mrf.mxu0 }
 0x121   :  { %v759_v12 = vadd.f32 %v758_v28, %v715_v34 }
 0x123   :  { %v777_v35 = vmax.f32 %v759_v12, 0.0 }
 0x124   :  { %v673_v38 = vpop.f32.mrf.mxu2 }
 0x125   :  { %v717_v37 = vpop.f32.mrf.mxu3  ;;  %791 = vst [vmem:[%s1624_s3 + $0x58] sm:$0xff] %v777_v35  ;;  %v674_v33 = vadd.f32 %v673_v38, %v630_v36 }
 0x126   :  { %v631_v41 = vpop.f32.mrf.mxu1 }
 0x127   :  { %v718_v40 = vadd.f32 %v717_v37, %v674_v33  ;;  %v632_v18 = vadd.f32 %v631_v41, %v1551_v27 }
 0x128   :  { %v763_v47 = vpop.f32.mrf.mxu0 }
 0x129   :  { %v762_v42 = vadd.f32 %v761_v39, %v718_v40 }
 0x12b   :  { %v778_v43 = vmax.f32 %v762_v42, 0.0 }
 0x12c   :  { %v675_v44 = vpop.f32.mrf.mxu2 }
 0x12d   :  { %792 = vst [vmem:[%s1624_s3 + $0x60] sm:$0xff] %v778_v43  ;;  %v676_v21 = vadd.f32 %v675_v44, %v632_v18  ;;  %v719_v45 = vpop.f32.mrf.mxu3 }
 0x12f   :  { %v720_v46 = vadd.f32 %v719_v45, %v676_v21 }
 0x131   :  { %v764_v48 = vadd.f32 %v763_v47, %v720_v46 }
 0x133   :  { %v779_v49 = vmax.f32 %v764_v48, 0.0 }
 0x135   :  { %793 = vst [vmem:[%s1624_s3 + $0x68] sm:$0xff] %v779_v49 }

// kernel: _rvs_forward_impl.7
= control target key start
LH: loop header
LB: loop body
LE: loop exit
PB: predicated region body
PF: predicated region fallthrough
CT: control target
= control target key end

     0   :  { %vm1814_vm0 = vcmask 523264   ;;  %vm2188_vm1 = vcmask 261120   ;;  %s4594_s3 = inlined_call_operand.vmem [shape: bf16[3136,32], index: 3, kind: input, shape index: {}]   ;;  %s4595_s0 = inlined_call_operand.vmem [shape: bf16[16,3136], index: 0, kind: input, shape index: {}]   ;;  %s4596_s4 = inlined_call_operand.vmem [shape: f32[1,32], index: 4, kind: input, shape index: {}]   ;;  %s4597_s1 = inlined_call_operand.vmem [shape: f32[16,1], index: 1, kind: input, shape index: {}]   ;;  %s4598_s5 = inlined_call_operand.vmem [shape: f32[1,32], index: 5, kind: input, shape index: {}]   ;;  %s4599_s6 = inlined_call_operand.vmem [shape: f32[1,32], index: 6, kind: input, shape index: {}]   ;;  %s4600_s7 = inlined_call_operand.vmem [shape: f32[1,32], index: 7, kind: input, shape index: {}]   ;;  %s4601_s9 = inlined_call_operand.vmem [shape: f32[1,32], index: 9, kind: input, shape index: {}]   ;;  %s4602_s10 = inlined_call_operand.vmem [shape: f32[1,32], index: 10, kind: input, shape index: {}]   ;;  %s4603_s8 = inlined_call_operand.vmem [shape: f32[1,32], index: 8, kind: input, shape index: {}]   ;;  %s4604_s11 = inlined_call_operand.vmem [shape: f32[32,32], index: 11, kind: input, shape index: {}]   ;;  %s4605_s12 = inlined_call_operand.vmem [shape: f32[32,32], index: 12, kind: input, shape index: {}]   ;;  %s4606_s14 = inlined_call_operand.vmem [shape: f32[32,32], index: 14, kind: input, shape index: {}]   ;;  %s4607_s13 = inlined_call_operand.vmem [shape: f32[1,32], index: 13, kind: input, shape index: {}]   ;;  %s4608_s15 = inlined_call_operand.vmem [shape: f32[1,32], index: 15, kind: input, shape index: {}]   ;;  %s4609_s16 = inlined_call_operand.vmem [shape: f32[32,128], index: 16, kind: input, shape index: {}]   ;;  %s4610_s17 = inlined_call_operand.vmem [shape: f32[1,128], index: 17, kind: input, shape index: {}]   ;;  %s4611_s18 = inlined_call_operand.vmem [shape: f32[16,128], index: 18, kind: output, shape index: {0}]   ;;  %s4612_s2 = inlined_call_operand.vmem [shape: s32[16,1], index: 2, kind: input, shape index: {}]   ;;  %s4613_s19 = inlined_call_operand.vmem [shape: f32[16,128], index: 19, kind: output, shape index: {1}]  }
   0x1   :  { %4617 = sst [smem:[#allocation2_spill]] %s4594_s3 }
   0x2   :  { %4618 = sst [smem:[#allocation3_spill]] %s4595_s0 }
   0x3   :  { %4619 = sst [smem:[#allocation4_spill]] %s4596_s4 }
   0x4   :  { %4620 = sst [smem:[#allocation5_spill]] %s4597_s1 }
   0x5   :  { %s4621_s20 = sld [smem:[#allocation2_spill]] }
   0x6   :  { %s4622_s26 = sld [smem:[#allocation3_spill]] }
   0x7   :  { %s4623_s23 = sld [smem:[#allocation5_spill]] }
   0x8   :  { %s4624_s21 = sld [smem:[#allocation4_spill]] }
   0xb   :  { %v3392_v0 = vld [vmem:[%s4621_s20 + $0x38] sm:$0xff]  ;;  %v3391_v4 = vld [vmem:[%s4621_s20 + $0x30] sm:$0xff]  ;;  %v3390_v8 = vld [vmem:[%s4621_s20 + $0x28] sm:$0xff] }
   0xc   :  { %v3408_v1 = vld [vmem:[%s4621_s20 + $0xb8] sm:$0xff]  ;;  %1818 = vmatpush.bf16.msra.mxu0 %v3392_v0  ;;  %v3407_v5 = vld [vmem:[%s4621_s20 + $0xb0] sm:$0xff]  ;;  %v3406_v9 = vld [vmem:[%s4621_s20 + $0xa8] sm:$0xff] }
   0xd   :  { %v3416_v2 = vld [vmem:[%s4621_s20 + $0xf8] sm:$0xff]  ;;  %1846 = vmatpush.bf16.msra.mxu2 %v3408_v1  ;;  %v3415_v6 = vld [vmem:[%s4621_s20 + $0xf0] sm:$0xff]  ;;  %v3414_v10 = vld [vmem:[%s4621_s20 + $0xe8] sm:$0xff] }
   0xe   :  { %v3400_v3 = vld [vmem:[%s4621_s20 + $0x78] sm:$0xff]  ;;  %1860 = vmatpush.bf16.msra.mxu3 %v3416_v2  ;;  %v3399_v7 = vld [vmem:[%s4621_s20 + $0x70] sm:$0xff]  ;;  %v3398_v11 = vld [vmem:[%s4621_s20 + $0x68] sm:$0xff] }
   0xf   :  { %1832 = vmatpush.bf16.msra.mxu1 %v3400_v3  ;;  %v3389_v12 = vld [vmem:[%s4621_s20 + $0x20] sm:$0xff]  ;;  %v3388_v16 = vld [vmem:[%s4621_s20 + $0x18] sm:$0xff]  ;;  %v3387_v20 = vld [vmem:[%s4621_s20 + $0x10] sm:$0xff] }
  0x10   :  { %1819 = vmatpush.bf16.msra.mxu0 %v3391_v4  ;;  %v3405_v13 = vld [vmem:[%s4621_s20 + $0xa0] sm:$0xff]  ;;  %v3404_v17 = vld [vmem:[%s4621_s20 + $0x98] sm:$0xff]  ;;  %v3403_v21 = vld [vmem:[%s4621_s20 + $0x90] sm:$0xff] }
  0x11   :  { %1847 = vmatpush.bf16.msra.mxu2 %v3407_v5  ;;  %v3413_v14 = vld [vmem:[%s4621_s20 + $0xe0] sm:$0xff]  ;;  %v3412_v18 = vld [vmem:[%s4621_s20 + $0xd8] sm:$0xff]  ;;  %v3411_v22 = vld [vmem:[%s4621_s20 + $0xd0] sm:$0xff] }
  0x12   :  { %1861 = vmatpush.bf16.msra.mxu3 %v3415_v6  ;;  %v3397_v15 = vld [vmem:[%s4621_s20 + $0x60] sm:$0xff]  ;;  %v3396_v19 = vld [vmem:[%s4621_s20 + $0x58] sm:$0xff]  ;;  %v3395_v23 = vld [vmem:[%s4621_s20 + $0x50] sm:$0xff] }
  0x13   :  { %1833 = vmatpush.bf16.msra.mxu1 %v3399_v7  ;;  %v3386_v24 = vld [vmem:[%s4621_s20 + $0x8] sm:$0xff]  ;;  %v3385_v28 = vld [vmem:[%s4621_s20] sm:$0xff]  ;;  %v3424_v31 = vld [vmem:[%s4621_s20 + $0x138] sm:$0xff] }
  0x14   :  { %1820 = vmatpush.bf16.msra.mxu0 %v3390_v8  ;;  %v3402_v25 = vld [vmem:[%s4621_s20 + $0x88] sm:$0xff]  ;;  %v3401_v29 = vld [vmem:[%s4621_s20 + $0x80] sm:$0xff]  ;;  %v3440_v34 = vld [vmem:[%s4621_s20 + $0x1b8] sm:$0xff] }
  0x15   :  { %1848 = vmatpush.bf16.msra.mxu2 %v3406_v9  ;;  %v3410_v26 = vld [vmem:[%s4621_s20 + $0xc8] sm:$0xff]  ;;  %v3409_v30 = vld [vmem:[%s4621_s20 + $0xc0] sm:$0xff]  ;;  %v3448_v37 = vld [vmem:[%s4621_s20 + $0x1f8] sm:$0xff] }
  0x16   :  { %1862 = vmatpush.bf16.msra.mxu3 %v3414_v10  ;;  %v3394_v27 = vld [vmem:[%s4621_s20 + $0x48] sm:$0xff]  ;;  %v2467_v32 = vld [vmem:[%s4622_s26] sm:$0xf]  ;;  %v3372_v33 = vld [vmem:[%s4622_s26 + $0x60] sm:$0xf0] }
  0x17   :  { %1834 = vmatpush.bf16.msra.mxu1 %v3398_v11  ;;  %v2475_v35 = vld [vmem:[%s4622_s26 + $0x8] sm:$0xf]  ;;  %v3373_v36 = vld [vmem:[%s4622_s26 + $0x68] sm:$0xf0]  ;;  %v2477_v39 = vld [vmem:[%s4622_s26 + $0x6c] sm:$0xf0]  ;;  %v2468_v41 = vor.u32 %v3372_v33, %v2467_v32 }
  0x18   :  { %1821 = vmatpush.bf16.msra.mxu0 %v3389_v12  ;;  %v3361_v38 = vld [vmem:[%s4622_s26 + $0xc] sm:$0xf]  ;;  %v3393_v40 = vld [vmem:[%s4621_s20 + $0x40] sm:$0xff]  ;;  %v3432_v42 = vld [vmem:[%s4621_s20 + $0x178] sm:$0xff]  ;;  %v2476_v43 = vor.u32 %v3373_v36, %v2475_v35 }
  0x19   :  { %1849 = vmatpush.bf16.msra.mxu2 %v3405_v13  ;;  %v3360_v44 = vld [vmem:[%s4622_s26 + $0x4] sm:$0xf]  ;;  %v2469_v45 = vld [vmem:[%s4622_s26 + $0x64] sm:$0xf0]  ;;  %v3423_v46 = vld [vmem:[%s4621_s20 + $0x130] sm:$0xff]  ;;  %v2480_v47 = vor.u32 %v3361_v38, %v2477_v39 }
  0x1a   :  { %1863 = vmatpush.bf16.msra.mxu3 %v3413_v14  ;;  %v3439_v48 = vld [vmem:[%s4621_s20 + $0x1b0] sm:$0xff]  ;;  %v2472_v50 = vor.u32 %v3360_v44, %v2469_v45  ;;  %v3422_v52 = vld [vmem:[%s4621_s20 + $0x128] sm:$0xff]  ;;  %v3421_v56 = vld [vmem:[%s4621_s20 + $0x120] sm:$0xff] }
  0x1b   :  { %1835 = vmatpush.bf16.msra.mxu1 %v3397_v15  ;;  %v3447_v49 = vld [vmem:[%s4621_s20 + $0x1f0] sm:$0xff]  ;;  %v3438_v53 = vld [vmem:[%s4621_s20 + $0x1a8] sm:$0xff]  ;;  %v3437_v57 = vld [vmem:[%s4621_s20 + $0x1a0] sm:$0xff] }
  0x1c   :  { %1822 = vmatpush.bf16.msra.mxu0 %v3388_v16  ;;  %v3431_v51 = vld [vmem:[%s4621_s20 + $0x170] sm:$0xff]  ;;  %v3446_v54 = vld [vmem:[%s4621_s20 + $0x1e8] sm:$0xff]  ;;  %v3445_v58 = vld [vmem:[%s4621_s20 + $0x1e0] sm:$0xff] }
  0x1d   :  { %1850 = vmatpush.bf16.msra.mxu2 %v3404_v17  ;;  %v3430_v55 = vld [vmem:[%s4621_s20 + $0x168] sm:$0xff]  ;;  %v3429_v59 = vld [vmem:[%s4621_s20 + $0x160] sm:$0xff]  ;;  %v3420_v60 = vld [vmem:[%s4621_s20 + $0x118] sm:$0xff] }
  0x1e   :  { %1864 = vmatpush.bf16.msra.mxu3 %v3412_v18  ;;  %v3436_v61 = vld [vmem:[%s4621_s20 + $0x198] sm:$0xff]  ;;  %v3419_v0 = vld [vmem:[%s4621_s20 + $0x110] sm:$0xff]  ;;  %v3418_v4 = vld [vmem:[%s4621_s20 + $0x108] sm:$0xff] }
  0x1f   :  { %1836 = vmatpush.bf16.msra.mxu1 %v3396_v19  ;;  %v3444_v62 = vld [vmem:[%s4621_s20 + $0x1d8] sm:$0xff]  ;;  %v3435_v1 = vld [vmem:[%s4621_s20 + $0x190] sm:$0xff]  ;;  %v3434_v5 = vld [vmem:[%s4621_s20 + $0x188] sm:$0xff] }
  0x20   :  { %1823 = vmatpush.bf16.msra.mxu0 %v3387_v20  ;;  %v3428_v63 = vld [vmem:[%s4621_s20 + $0x158] sm:$0xff]  ;;  %v3443_v2 = vld [vmem:[%s4621_s20 + $0x1d0] sm:$0xff]  ;;  %v3442_v6 = vld [vmem:[%s4621_s20 + $0x1c8] sm:$0xff] }
  0x21   :  { %1851 = vmatpush.bf16.msra.mxu2 %v3403_v21  ;;  %v3427_v3 = vld [vmem:[%s4621_s20 + $0x150] sm:$0xff]  ;;  %v3426_v7 = vld [vmem:[%s4621_s20 + $0x148] sm:$0xff]  ;;  %v3417_v8 = vld [vmem:[%s4621_s20 + $0x100] sm:$0xff] }
  0x22   :  { %1865 = vmatpush.bf16.msra.mxu3 %v3411_v22  ;;  %v3433_v9 = vld [vmem:[%s4621_s20 + $0x180] sm:$0xff]  ;;  %v3456_v11 = vld [vmem:[%s4621_s20 + $0x238] sm:$0xff]  ;;  %v2483_v13 = vld [vmem:[%s4622_s26 + $0x10] sm:$0xf] }
  0x23   :  { %1837 = vmatpush.bf16.msra.mxu1 %v3395_v23  ;;  %v3441_v10 = vld [vmem:[%s4621_s20 + $0x1c0] sm:$0xff]  ;;  %v3472_v12 = vld [vmem:[%s4621_s20 + $0x2b8] sm:$0xff]  ;;  %v3374_v14 = vld [vmem:[%s4622_s26 + $0x70] sm:$0xf0] }
  0x24   :  { %1824 = vmatpush.bf16.msra.mxu0 %v3386_v24  ;;  %v2491_v15 = vld [vmem:[%s4622_s26 + $0x18] sm:$0xf]  ;;  %v3375_v16 = vld [vmem:[%s4622_s26 + $0x78] sm:$0xf0]  ;;  %v2493_v19 = vld [vmem:[%s4622_s26 + $0x7c] sm:$0xf0]  ;;  %v2484_v23 = vor.u32 %v3374_v14, %v2483_v13 }
  0x25   :  { %1852 = vmatpush.bf16.msra.mxu2 %v3402_v25  ;;  %v3480_v17 = vld [vmem:[%s4621_s20 + $0x2f8] sm:$0xff]  ;;  %v3425_v20 = vld [vmem:[%s4621_s20 + $0x140] sm:$0xff]  ;;  %v3362_v21 = vld [vmem:[%s4622_s26 + $0x14] sm:$0xf]  ;;  %v2492_v24 = vor.u32 %v3375_v16, %v2491_v15 }
  0x26   :  { %1866 = vmatpush.bf16.msra.mxu3 %v3410_v26  ;;  %v3363_v18 = vld [vmem:[%s4622_s26 + $0x1c] sm:$0xf]  ;;  %v2485_v22 = vld [vmem:[%s4622_s26 + $0x74] sm:$0xf0]  ;;  %v3454_v32 = vld [vmem:[%s4621_s20 + $0x228] sm:$0xff] }
  0x27   :  { %1838 = vmatpush.bf16.msra.mxu1 %v3394_v27  ;;  %v3464_v25 = vld [vmem:[%s4621_s20 + $0x278] sm:$0xff]  ;;  %v2496_v26 = vor.u32 %v3363_v18, %v2493_v19  ;;  %v2488_v27 = vor.u32 %v3362_v21, %v2485_v22  ;;  %v3470_v33 = vld [vmem:[%s4621_s20 + $0x2a8] sm:$0xff]  ;;  %v3453_v36 = vld [vmem:[%s4621_s20 + $0x220] sm:$0xff] }
  0x28   :  { %1825 = vmatpush.bf16.msra.mxu0 %v3385_v28  ;;  %v3455_v28 = vld [vmem:[%s4621_s20 + $0x230] sm:$0xff]  ;;  %v3462_v35 = vld [vmem:[%s4621_s20 + $0x268] sm:$0xff]  ;;  %v3477_v38 = vld [vmem:[%s4621_s20 + $0x2e0] sm:$0xff] }
  0x29   :  { %1853 = vmatpush.bf16.msra.mxu2 %v3401_v29  ;;  %v3471_v29 = vld [vmem:[%s4621_s20 + $0x2b0] sm:$0xff]  ;;  %v3461_v39 = vld [vmem:[%s4621_s20 + $0x260] sm:$0xff]  ;;  %v3502_v13 = vld [vmem:[%s4621_s20 + $0x3a8] sm:$0xff] }
  0x2a   :  { %1867 = vmatpush.bf16.msra.mxu3 %v3409_v30  ;;  %v3479_v30 = vld [vmem:[%s4621_s20 + $0x2f0] sm:$0xff]  ;;  %v3510_v14 = vld [vmem:[%s4621_s20 + $0x3e8] sm:$0xff]  ;;  %v3485_v16 = vld [vmem:[%s4621_s20 + $0x320] sm:$0xff] }
  0x2b   :  { %1839 = vmatpush.bf16.msra.mxu1 %v3393_v40  ;;  %1826 = vmatmul.bf16.vlgmr.msra.gmra.mxu0 %v2468_v41  ;;  %v3452_v40 = vld [vmem:[%s4621_s20 + $0x218] sm:$0xff]  ;;  %v3451_v44 = vld [vmem:[%s4621_s20 + $0x210] sm:$0xff]  ;;  %v3494_v15 = vld [vmem:[%s4621_s20 + $0x368] sm:$0xff] }
  0x2c   :  { %1874 = vmatpush.bf16.msrb.mxu0 %v3424_v31  ;;  %1854 = vmatmul.bf16.vlgmr.msra.gmra.mxu2 %v2476_v43  ;;  %v3463_v31 = vld [vmem:[%s4621_s20 + $0x270] sm:$0xff]  ;;  %v3468_v41 = vld [vmem:[%s4621_s20 + $0x298] sm:$0xff]  ;;  %v3509_v18 = vld [vmem:[%s4621_s20 + $0x3e0] sm:$0xff] }
  0x2d   :  { %1902 = vmatpush.bf16.msrb.mxu2 %v3440_v34  ;;  %1868 = vmatmul.bf16.vlgmr.msra.gmra.mxu3 %v2480_v47  ;;  %v3478_v34 = vld [vmem:[%s4621_s20 + $0x2e8] sm:$0xff]  ;;  %v3460_v43 = vld [vmem:[%s4621_s20 + $0x258] sm:$0xff]  ;;  %v3467_v45 = vld [vmem:[%s4621_s20 + $0x290] sm:$0xff] }
  0x2e   :  { %1916 = vmatpush.bf16.msrb.mxu3 %v3448_v37  ;;  %1840 = vmatmul.bf16.vlgmr.msra.gmra.mxu1 %v2472_v50  ;;  %v3469_v37 = vld [vmem:[%s4621_s20 + $0x2a0] sm:$0xff]  ;;  %v3459_v47 = vld [vmem:[%s4621_s20 + $0x250] sm:$0xff]  ;;  %v3474_v50 = vld [vmem:[%s4621_s20 + $0x2c8] sm:$0xff] }
  0x2f   :  { %1888 = vmatpush.bf16.msrb.mxu1 %v3432_v42  ;;  %v3476_v42 = vld [vmem:[%s4621_s20 + $0x2d8] sm:$0xff]  ;;  %v3493_v19 = vld [vmem:[%s4621_s20 + $0x360] sm:$0xff] }
  0x30   :  { %1875 = vmatpush.bf16.msrb.mxu0 %v3423_v46  ;;  %v3475_v46 = vld [vmem:[%s4621_s20 + $0x2d0] sm:$0xff]  ;;  %v3500_v21 = vld [vmem:[%s4621_s20 + $0x398] sm:$0xff] }
  0x31   :  { %1903 = vmatpush.bf16.msrb.mxu2 %v3439_v48  ;;  %v3450_v48 = vld [vmem:[%s4621_s20 + $0x208] sm:$0xff]  ;;  %v3508_v22 = vld [vmem:[%s4621_s20 + $0x3d8] sm:$0xff] }
  0x32   :  { %1917 = vmatpush.bf16.msrb.mxu3 %v3447_v49  ;;  %v3466_v49 = vld [vmem:[%s4621_s20 + $0x288] sm:$0xff] }
  0x33   :  { %1889 = vmatpush.bf16.msrb.mxu1 %v3431_v51  ;;  %v3458_v51 = vld [vmem:[%s4621_s20 + $0x248] sm:$0xff] }
  0x34   :  { %1876 = vmatpush.bf16.msrb.mxu0 %v3422_v52  ;;  %v3449_v52 = vld [vmem:[%s4621_s20 + $0x200] sm:$0xff] }
  0x35   :  { %1904 = vmatpush.bf16.msrb.mxu2 %v3438_v53  ;;  %v3465_v53 = vld [vmem:[%s4621_s20 + $0x280] sm:$0xff] }
  0x36   :  { %1918 = vmatpush.bf16.msrb.mxu3 %v3446_v54  ;;  %v3473_v54 = vld [vmem:[%s4621_s20 + $0x2c0] sm:$0xff] }
  0x37   :  { %1890 = vmatpush.bf16.msrb.mxu1 %v3430_v55  ;;  %v3488_v55 = vld [vmem:[%s4621_s20 + $0x338] sm:$0xff] }
  0x38   :  { %1877 = vmatpush.bf16.msrb.mxu0 %v3421_v56  ;;  %v3504_v56 = vld [vmem:[%s4621_s20 + $0x3b8] sm:$0xff] }
  0x39   :  { %1905 = vmatpush.bf16.msrb.mxu2 %v3437_v57  ;;  %v2499_v57 = vld [vmem:[%s4622_s26 + $0x20] sm:$0xf] }
  0x3a   :  { %1919 = vmatpush.bf16.msrb.mxu3 %v3445_v58  ;;  %v3376_v58 = vld [vmem:[%s4622_s26 + $0x80] sm:$0xf0] }
  0x3b   :  { %1891 = vmatpush.bf16.msrb.mxu1 %v3429_v59  ;;  %v2507_v59 = vld [vmem:[%s4622_s26 + $0x28] sm:$0xf] }
  0x3c   :  { %1878 = vmatpush.bf16.msrb.mxu0 %v3420_v60  ;;  %v3377_v60 = vld [vmem:[%s4622_s26 + $0x88] sm:$0xf0] }
  0x3d   :  { %1906 = vmatpush.bf16.msrb.mxu2 %v3436_v61  ;;  %v3512_v61 = vld [vmem:[%s4621_s20 + $0x3f8] sm:$0xff] }
  0x3e   :  { %1920 = vmatpush.bf16.msrb.mxu3 %v3444_v62  ;;  %v3365_v62 = vld [vmem:[%s4622_s26 + $0x2c] sm:$0xf] }
  0x3f   :  { %1892 = vmatpush.bf16.msrb.mxu1 %v3428_v63  ;;  %v2509_v63 = vld [vmem:[%s4622_s26 + $0x8c] sm:$0xf0] }
  0x40   :  { %1879 = vmatpush.bf16.msrb.mxu0 %v3419_v0  ;;  %v3457_v0 = vld [vmem:[%s4621_s20 + $0x240] sm:$0xff] }
  0x41   :  { %1907 = vmatpush.bf16.msrb.mxu2 %v3435_v1  ;;  %v3364_v1 = vld [vmem:[%s4622_s26 + $0x24] sm:$0xf] }
  0x42   :  { %1921 = vmatpush.bf16.msrb.mxu3 %v3443_v2  ;;  %v2501_v2 = vld [vmem:[%s4622_s26 + $0x84] sm:$0xf0] }
  0x43   :  { %1893 = vmatpush.bf16.msrb.mxu1 %v3427_v3  ;;  %v2500_v3 = vor.u32 %v3376_v58, %v2499_v57  ;;  %v3534_v57 = vld [vmem:[%s4621_s20 + $0x4a8] sm:$0xff] }
  0x44   :  { %1880 = vmatpush.bf16.msrb.mxu0 %v3418_v4  ;;  %v2508_v4 = vor.u32 %v3377_v60, %v2507_v59  ;;  %v3542_v58 = vld [vmem:[%s4621_s20 + $0x4e8] sm:$0xff]  ;;  %v3517_v60 = vld [vmem:[%s4621_s20 + $0x420] sm:$0xff] }
  0x45   :  { %1908 = vmatpush.bf16.msrb.mxu2 %v3434_v5  ;;  %v3496_v5 = vld [vmem:[%s4621_s20 + $0x378] sm:$0xff]  ;;  %v3526_v59 = vld [vmem:[%s4621_s20 + $0x468] sm:$0xff] }
  0x46   :  { %1922 = vmatpush.bf16.msrb.mxu3 %v3442_v6  ;;  %v2512_v6 = vor.u32 %v3365_v62, %v2509_v63  ;;  %v3541_v62 = vld [vmem:[%s4621_s20 + $0x4e0] sm:$0xff] }
  0x47   :  { %1894 = vmatpush.bf16.msrb.mxu1 %v3426_v7  ;;  %v2504_v7 = vor.u32 %v3364_v1, %v2501_v2  ;;  %v3525_v63 = vld [vmem:[%s4621_s20 + $0x460] sm:$0xff]  ;;  %v3532_v1 = vld [vmem:[%s4621_s20 + $0x498] sm:$0xff] }
  0x48   :  { %1881 = vmatpush.bf16.msrb.mxu0 %v3417_v8  ;;  %v3487_v8 = vld [vmem:[%s4621_s20 + $0x330] sm:$0xff]  ;;  %v3540_v2 = vld [vmem:[%s4621_s20 + $0x4d8] sm:$0xff] }
  0x49   :  { %1909 = vmatpush.bf16.msrb.mxu2 %v3433_v9  ;;  %v3503_v9 = vld [vmem:[%s4621_s20 + $0x3b0] sm:$0xff] }
  0x4a   :  { %1923 = vmatpush.bf16.msrb.mxu3 %v3441_v10  ;;  %v3511_v10 = vld [vmem:[%s4621_s20 + $0x3f0] sm:$0xff] }
  0x4b   :  { %1895 = vmatpush.bf16.msrb.mxu1 %v3425_v20  ;;  %1882 = vmatmul.bf16.vlgmr.msrb.gmra.mxu0 %v2484_v23  ;;  %v3484_v20 = vld [vmem:[%s4621_s20 + $0x318] sm:$0xff] }
  0x4c   :  { %1930 = vmatpush.bf16.msra.mxu0 %v3456_v11  ;;  %1910 = vmatmul.bf16.vlgmr.msrb.gmra.mxu2 %v2492_v24  ;;  %v3495_v11 = vld [vmem:[%s4621_s20 + $0x370] sm:$0xff]  ;;  %v3492_v23 = vld [vmem:[%s4621_s20 + $0x358] sm:$0xff] }
  0x4d   :  { %1958 = vmatpush.bf16.msra.mxu2 %v3472_v12  ;;  %1924 = vmatmul.bf16.vlgmr.msrb.gmra.mxu3 %v2496_v26  ;;  %v3486_v12 = vld [vmem:[%s4621_s20 + $0x328] sm:$0xff]  ;;  %v3483_v24 = vld [vmem:[%s4621_s20 + $0x310] sm:$0xff] }
  0x4e   :  { %1972 = vmatpush.bf16.msra.mxu3 %v3480_v17  ;;  %1896 = vmatmul.bf16.vlgmr.msrb.gmra.mxu1 %v2488_v27  ;;  %v3501_v17 = vld [vmem:[%s4621_s20 + $0x3a0] sm:$0xff]  ;;  %v3507_v26 = vld [vmem:[%s4621_s20 + $0x3d0] sm:$0xff] }
  0x4f   :  { %1944 = vmatpush.bf16.msra.mxu1 %v3464_v25  ;;  %v3499_v25 = vld [vmem:[%s4621_s20 + $0x390] sm:$0xff] }
  0x50   :  { %1931 = vmatpush.bf16.msra.mxu0 %v3455_v28  ;;  %v3491_v27 = vld [vmem:[%s4621_s20 + $0x350] sm:$0xff]  ;;  %v3482_v28 = vld [vmem:[%s4621_s20 + $0x308] sm:$0xff] }
  0x51   :  { %1959 = vmatpush.bf16.msra.mxu2 %v3471_v29  ;;  %v3498_v29 = vld [vmem:[%s4621_s20 + $0x388] sm:$0xff] }
  0x52   :  { %1973 = vmatpush.bf16.msra.mxu3 %v3479_v30  ;;  %v3506_v30 = vld [vmem:[%s4621_s20 + $0x3c8] sm:$0xff] }
  0x53   :  { %1945 = vmatpush.bf16.msra.mxu1 %v3463_v31  ;;  %v3490_v31 = vld [vmem:[%s4621_s20 + $0x348] sm:$0xff] }
  0x54   :  { %1932 = vmatpush.bf16.msra.mxu0 %v3454_v32  ;;  %v3481_v32 = vld [vmem:[%s4621_s20 + $0x300] sm:$0xff] }
  0x55   :  { %1960 = vmatpush.bf16.msra.mxu2 %v3470_v33  ;;  %v3497_v33 = vld [vmem:[%s4621_s20 + $0x380] sm:$0xff] }
  0x56   :  { %1974 = vmatpush.bf16.msra.mxu3 %v3478_v34  ;;  %v3505_v34 = vld [vmem:[%s4621_s20 + $0x3c0] sm:$0xff] }
  0x57   :  { %1946 = vmatpush.bf16.msra.mxu1 %v3462_v35  ;;  %v3520_v35 = vld [vmem:[%s4621_s20 + $0x438] sm:$0xff] }
  0x58   :  { %1933 = vmatpush.bf16.msra.mxu0 %v3453_v36  ;;  %v3536_v36 = vld [vmem:[%s4621_s20 + $0x4b8] sm:$0xff] }
  0x59   :  { %1961 = vmatpush.bf16.msra.mxu2 %v3469_v37  ;;  %v2515_v37 = vld [vmem:[%s4622_s26 + $0x30] sm:$0xf] }
  0x5a   :  { %1975 = vmatpush.bf16.msra.mxu3 %v3477_v38  ;;  %v3378_v38 = vld [vmem:[%s4622_s26 + $0x90] sm:$0xf0] }
  0x5b   :  { %1947 = vmatpush.bf16.msra.mxu1 %v3461_v39  ;;  %v2523_v39 = vld [vmem:[%s4622_s26 + $0x38] sm:$0xf] }
  0x5c   :  { %1934 = vmatpush.bf16.msra.mxu0 %v3452_v40  ;;  %v3379_v40 = vld [vmem:[%s4622_s26 + $0x98] sm:$0xf0] }
  0x5d   :  { %1962 = vmatpush.bf16.msra.mxu2 %v3468_v41  ;;  %v3544_v41 = vld [vmem:[%s4621_s20 + $0x4f8] sm:$0xff] }
  0x5e   :  { %1976 = vmatpush.bf16.msra.mxu3 %v3476_v42  ;;  %v3367_v42 = vld [vmem:[%s4622_s26 + $0x3c] sm:$0xf] }
  0x5f   :  { %1948 = vmatpush.bf16.msra.mxu1 %v3460_v43  ;;  %v2525_v43 = vld [vmem:[%s4622_s26 + $0x9c] sm:$0xf0] }
  0x60   :  { %1935 = vmatpush.bf16.msra.mxu0 %v3451_v44  ;;  %v3489_v44 = vld [vmem:[%s4621_s20 + $0x340] sm:$0xff] }
  0x61   :  { %1963 = vmatpush.bf16.msra.mxu2 %v3467_v45  ;;  %v3366_v45 = vld [vmem:[%s4622_s26 + $0x34] sm:$0xf] }
  0x62   :  { %1977 = vmatpush.bf16.msra.mxu3 %v3475_v46  ;;  %v2517_v46 = vld [vmem:[%s4622_s26 + $0x94] sm:$0xf0] }
  0x63   :  { %1949 = vmatpush.bf16.msra.mxu1 %v3459_v47  ;;  %v2516_v47 = vor.u32 %v3378_v38, %v2515_v37  ;;  %v3566_v37 = vld [vmem:[%s4621_s20 + $0x5a8] sm:$0xff] }
  0x64   :  { %1936 = vmatpush.bf16.msra.mxu0 %v3450_v48  ;;  %v2524_v48 = vor.u32 %v3379_v40, %v2523_v39  ;;  %v3574_v38 = vld [vmem:[%s4621_s20 + $0x5e8] sm:$0xff]  ;;  %v3549_v40 = vld [vmem:[%s4621_s20 + $0x520] sm:$0xff] }
  0x65   :  { %1964 = vmatpush.bf16.msra.mxu2 %v3466_v49  ;;  %v3528_v49 = vld [vmem:[%s4621_s20 + $0x478] sm:$0xff]  ;;  %v3558_v39 = vld [vmem:[%s4621_s20 + $0x568] sm:$0xff] }
  0x66   :  { %1978 = vmatpush.bf16.msra.mxu3 %v3474_v50  ;;  %v2528_v50 = vor.u32 %v3367_v42, %v2525_v43  ;;  %v3573_v42 = vld [vmem:[%s4621_s20 + $0x5e0] sm:$0xff] }
  0x67   :  { %1950 = vmatpush.bf16.msra.mxu1 %v3458_v51  ;;  %v2520_v51 = vor.u32 %v3366_v45, %v2517_v46  ;;  %v3557_v43 = vld [vmem:[%s4621_s20 + $0x560] sm:$0xff]  ;;  %v3564_v45 = vld [vmem:[%s4621_s20 + $0x598] sm:$0xff] }
  0x68   :  { %1937 = vmatpush.bf16.msra.mxu0 %v3449_v52  ;;  %v3519_v52 = vld [vmem:[%s4621_s20 + $0x430] sm:$0xff]  ;;  %v3572_v46 = vld [vmem:[%s4621_s20 + $0x5d8] sm:$0xff] }
  0x69   :  { %1965 = vmatpush.bf16.msra.mxu2 %v3465_v53  ;;  %v3535_v53 = vld [vmem:[%s4621_s20 + $0x4b0] sm:$0xff] }
  0x6a   :  { %1979 = vmatpush.bf16.msra.mxu3 %v3473_v54  ;;  %v3543_v54 = vld [vmem:[%s4621_s20 + $0x4f0] sm:$0xff] }
  0x6b   :  { %1951 = vmatpush.bf16.msra.mxu1 %v3457_v0  ;;  %1938 = vmatmul.bf16.vlgmr.msra.gmra.mxu0 %v2500_v3  ;;  %v3516_v0 = vld [vmem:[%s4621_s20 + $0x418] sm:$0xff] }
  0x6c   :  { %1986 = vmatpush.bf16.msrb.mxu0 %v3488_v55  ;;  %1966 = vmatmul.bf16.vlgmr.msra.gmra.mxu2 %v2508_v4  ;;  %v3527_v55 = vld [vmem:[%s4621_s20 + $0x470] sm:$0xff]  ;;  %v3524_v3 = vld [vmem:[%s4621_s20 + $0x458] sm:$0xff] }
  0x6d   :  { %2014 = vmatpush.bf16.msrb.mxu2 %v3504_v56  ;;  %1980 = vmatmul.bf16.vlgmr.msra.gmra.mxu3 %v2512_v6  ;;  %v3518_v56 = vld [vmem:[%s4621_s20 + $0x428] sm:$0xff]  ;;  %v3515_v4 = vld [vmem:[%s4621_s20 + $0x410] sm:$0xff] }
  0x6e   :  { %2028 = vmatpush.bf16.msrb.mxu3 %v3512_v61  ;;  %1952 = vmatmul.bf16.vlgmr.msra.gmra.mxu1 %v2504_v7  ;;  %v3533_v61 = vld [vmem:[%s4621_s20 + $0x4a0] sm:$0xff]  ;;  %v3539_v6 = vld [vmem:[%s4621_s20 + $0x4d0] sm:$0xff] }
  0x6f   :  { %2000 = vmatpush.bf16.msrb.mxu1 %v3496_v5  ;;  %v3531_v5 = vld [vmem:[%s4621_s20 + $0x490] sm:$0xff] }
  0x70   :  { %1987 = vmatpush.bf16.msrb.mxu0 %v3487_v8  ;;  %v3523_v7 = vld [vmem:[%s4621_s20 + $0x450] sm:$0xff]  ;;  %v3514_v8 = vld [vmem:[%s4621_s20 + $0x408] sm:$0xff] }
  0x71   :  { %2015 = vmatpush.bf16.msrb.mxu2 %v3503_v9  ;;  %v3530_v9 = vld [vmem:[%s4621_s20 + $0x488] sm:$0xff] }
  0x72   :  { %2029 = vmatpush.bf16.msrb.mxu3 %v3511_v10  ;;  %v3538_v10 = vld [vmem:[%s4621_s20 + $0x4c8] sm:$0xff] }
  0x73   :  { %2001 = vmatpush.bf16.msrb.mxu1 %v3495_v11  ;;  %v3522_v11 = vld [vmem:[%s4621_s20 + $0x448] sm:$0xff] }
  0x74   :  { %1988 = vmatpush.bf16.msrb.mxu0 %v3486_v12  ;;  %v3513_v12 = vld [vmem:[%s4621_s20 + $0x400] sm:$0xff] }
  0x75   :  { %2016 = vmatpush.bf16.msrb.mxu2 %v3502_v13  ;;  %v3529_v13 = vld [vmem:[%s4621_s20 + $0x480] sm:$0xff] }
  0x76   :  { %2030 = vmatpush.bf16.msrb.mxu3 %v3510_v14  ;;  %v3537_v14 = vld [vmem:[%s4621_s20 + $0x4c0] sm:$0xff] }
  0x77   :  { %2002 = vmatpush.bf16.msrb.mxu1 %v3494_v15  ;;  %v3552_v15 = vld [vmem:[%s4621_s20 + $0x538] sm:$0xff] }
  0x78   :  { %1989 = vmatpush.bf16.msrb.mxu0 %v3485_v16  ;;  %v3568_v16 = vld [vmem:[%s4621_s20 + $0x5b8] sm:$0xff] }
  0x79   :  { %2017 = vmatpush.bf16.msrb.mxu2 %v3501_v17  ;;  %v2531_v17 = vld [vmem:[%s4622_s26 + $0x40] sm:$0xf] }
  0x7a   :  { %2031 = vmatpush.bf16.msrb.mxu3 %v3509_v18  ;;  %v3380_v18 = vld [vmem:[%s4622_s26 + $0xa0] sm:$0xf0] }
  0x7b   :  { %2003 = vmatpush.bf16.msrb.mxu1 %v3493_v19  ;;  %v2539_v19 = vld [vmem:[%s4622_s26 + $0x48] sm:$0xf] }
  0x7c   :  { %1990 = vmatpush.bf16.msrb.mxu0 %v3484_v20  ;;  %v3381_v20 = vld [vmem:[%s4622_s26 + $0xa8] sm:$0xf0] }
  0x7d   :  { %2018 = vmatpush.bf16.msrb.mxu2 %v3500_v21  ;;  %v3576_v21 = vld [vmem:[%s4621_s20 + $0x5f8] sm:$0xff] }
  0x7e   :  { %2032 = vmatpush.bf16.msrb.mxu3 %v3508_v22  ;;  %v3369_v22 = vld [vmem:[%s4622_s26 + $0x4c] sm:$0xf] }
  0x7f   :  { %2004 = vmatpush.bf16.msrb.mxu1 %v3492_v23  ;;  %v2541_v23 = vld [vmem:[%s4622_s26 + $0xac] sm:$0xf0] }
  0x80   :  { %1991 = vmatpush.bf16.msrb.mxu0 %v3483_v24  ;;  %v3521_v24 = vld [vmem:[%s4621_s20 + $0x440] sm:$0xff] }
  0x81   :  { %2019 = vmatpush.bf16.msrb.mxu2 %v3499_v25  ;;  %v3368_v25 = vld [vmem:[%s4622_s26 + $0x44] sm:$0xf] }
  0x82   :  { %2033 = vmatpush.bf16.msrb.mxu3 %v3507_v26  ;;  %v2533_v26 = vld [vmem:[%s4622_s26 + $0xa4] sm:$0xf0] }
  0x83   :  { %2005 = vmatpush.bf16.msrb.mxu1 %v3491_v27  ;;  %v2532_v27 = vor.u32 %v3380_v18, %v2531_v17 }
  0x84   :  { %1992 = vmatpush.bf16.msrb.mxu0 %v3482_v28  ;;  %v2540_v28 = vor.u32 %v3381_v20, %v2539_v19 }
  0x85   :  { %2020 = vmatpush.bf16.msrb.mxu2 %v3498_v29  ;;  %v3560_v29 = vld [vmem:[%s4621_s20 + $0x578] sm:$0xff] }
  0x86   :  { %2034 = vmatpush.bf16.msrb.mxu3 %v3506_v30  ;;  %v2544_v30 = vor.u32 %v3369_v22, %v2541_v23 }
  0x87   :  { %2006 = vmatpush.bf16.msrb.mxu1 %v3490_v31  ;;  %v2536_v31 = vor.u32 %v3368_v25, %v2533_v26 }
  0x88   :  { %1993 = vmatpush.bf16.msrb.mxu0 %v3481_v32  ;;  %v3551_v32 = vld [vmem:[%s4621_s20 + $0x530] sm:$0xff] }
  0x89   :  { %2021 = vmatpush.bf16.msrb.mxu2 %v3497_v33  ;;  %v3567_v33 = vld [vmem:[%s4621_s20 + $0x5b0] sm:$0xff] }
  0x8a   :  { %2035 = vmatpush.bf16.msrb.mxu3 %v3505_v34  ;;  %v3575_v34 = vld [vmem:[%s4621_s20 + $0x5f0] sm:$0xff] }
  0x8b   :  { %2007 = vmatpush.bf16.msrb.mxu1 %v3489_v44  ;;  %1994 = vmatmul.bf16.vlgmr.msrb.gmra.mxu0 %v2516_v47  ;;  %v3548_v44 = vld [vmem:[%s4621_s20 + $0x518] sm:$0xff] }
  0x8c   :  { %2042 = vmatpush.bf16.msra.mxu0 %v3520_v35  ;;  %2022 = vmatmul.bf16.vlgmr.msrb.gmra.mxu2 %v2524_v48  ;;  %v3559_v35 = vld [vmem:[%s4621_s20 + $0x570] sm:$0xff]  ;;  %v3556_v47 = vld [vmem:[%s4621_s20 + $0x558] sm:$0xff] }
  0x8d   :  { %2070 = vmatpush.bf16.msra.mxu2 %v3536_v36  ;;  %2036 = vmatmul.bf16.vlgmr.msrb.gmra.mxu3 %v2528_v50  ;;  %v3550_v36 = vld [vmem:[%s4621_s20 + $0x528] sm:$0xff]  ;;  %v3547_v48 = vld [vmem:[%s4621_s20 + $0x510] sm:$0xff] }
  0x8e   :  { %2084 = vmatpush.bf16.msra.mxu3 %v3544_v41  ;;  %2008 = vmatmul.bf16.vlgmr.msrb.gmra.mxu1 %v2520_v51  ;;  %v3565_v41 = vld [vmem:[%s4621_s20 + $0x5a0] sm:$0xff]  ;;  %v3571_v50 = vld [vmem:[%s4621_s20 + $0x5d0] sm:$0xff] }
  0x8f   :  { %2056 = vmatpush.bf16.msra.mxu1 %v3528_v49  ;;  %v3563_v49 = vld [vmem:[%s4621_s20 + $0x590] sm:$0xff] }
  0x90   :  { %2043 = vmatpush.bf16.msra.mxu0 %v3519_v52  ;;  %v3555_v51 = vld [vmem:[%s4621_s20 + $0x550] sm:$0xff]  ;;  %v3546_v52 = vld [vmem:[%s4621_s20 + $0x508] sm:$0xff] }
  0x91   :  { %2071 = vmatpush.bf16.msra.mxu2 %v3535_v53  ;;  %v88_v53 = vld [vmem:[%s4623_s23] sm:$0xff] }
  0x92   :  { %2085 = vmatpush.bf16.msra.mxu3 %v3543_v54  ;;  %v3562_v54 = vld [vmem:[%s4621_s20 + $0x588] sm:$0xff] }
  0x93   :  { %2057 = vmatpush.bf16.msra.mxu1 %v3527_v55  ;;  %v3570_v55 = vld [vmem:[%s4621_s20 + $0x5c8] sm:$0xff] }
  0x94   :  { %2044 = vmatpush.bf16.msra.mxu0 %v3518_v56  ;;  %v3554_v56 = vld [vmem:[%s4621_s20 + $0x548] sm:$0xff] }
  0x95   :  { %2072 = vmatpush.bf16.msra.mxu2 %v3534_v57  ;;  %v3612_v57 = vmov 0  }
  0x96   :  { %2086 = vmatpush.bf16.msra.mxu3 %v3542_v58  ;;  %3587 = vset.pattern.permute.xlu0 %v3612_v57  ;;  %v3545_v58 = vld [vmem:[%s4621_s20 + $0x500] sm:$0xff] }
  0x97   :  { %2058 = vmatpush.bf16.msra.mxu1 %v3526_v59  ;;  %3589 = vset.pattern.permute.xlu1 %v3612_v57  ;;  %v3561_v59 = vld [vmem:[%s4621_s20 + $0x580] sm:$0xff] }
  0x98   :  { %2045 = vmatpush.bf16.msra.mxu0 %v3517_v60  ;;  %v3569_v60 = vld [vmem:[%s4621_s20 + $0x5c0] sm:$0xff]  ;;  %2170 = vperm.xlu0 %3587, %v88_v53  }
  0x99   :  { %2073 = vmatpush.bf16.msra.mxu2 %v3533_v61  ;;  %v2547_v61 = vld [vmem:[%s4622_s26 + $0x50] sm:$0xf]  ;;  %3588 = vset.pattern.permute.xlu2 %v3612_v57 }
  0x9a   :  { %2087 = vmatpush.bf16.msra.mxu3 %v3541_v62  ;;  %v3382_v62 = vld [vmem:[%s4622_s26 + $0xb0] sm:$0xf0] }
  0x9b   :  { %2059 = vmatpush.bf16.msra.mxu1 %v3525_v63  ;;  %v2555_v63 = vld [vmem:[%s4622_s26 + $0x58] sm:$0xf] }
  0x9c   :  { %2046 = vmatpush.bf16.msra.mxu0 %v3516_v0  ;;  %v3383_v0 = vld [vmem:[%s4622_s26 + $0xb8] sm:$0xf0] }
  0x9d   :  { %2074 = vmatpush.bf16.msra.mxu2 %v3532_v1  ;;  %v3371_v1 = vld [vmem:[%s4622_s26 + $0x5c] sm:$0xf] }
  0x9e   :  { %2088 = vmatpush.bf16.msra.mxu3 %v3540_v2  ;;  %v2557_v2 = vld [vmem:[%s4622_s26 + $0xbc] sm:$0xf0] }
  0x9f   :  { %2060 = vmatpush.bf16.msra.mxu1 %v3524_v3  ;;  %v3580_v3 = vld [vmem:[%s4621_s20 + $0x618] sm:$0xff] }
  0xa0   :  { %2047 = vmatpush.bf16.msra.mxu0 %v3515_v4  ;;  %v3553_v4 = vld [vmem:[%s4621_s20 + $0x540] sm:$0xff] }
  0xa1   :  { %2075 = vmatpush.bf16.msra.mxu2 %v3531_v5  ;;  %v2548_v5 = vor.u32 %v3382_v62, %v2547_v61 }
  0xa2   :  { %2089 = vmatpush.bf16.msra.mxu3 %v3539_v6  ;;  %v3370_v6 = vld [vmem:[%s4622_s26 + $0x54] sm:$0xf] }
  0xa3   :  { %2061 = vmatpush.bf16.msra.mxu1 %v3523_v7  ;;  %v2549_v7 = vld [vmem:[%s4622_s26 + $0xb4] sm:$0xf0] }
  0xa4   :  { %2048 = vmatpush.bf16.msra.mxu0 %v3514_v8  ;;  %v2556_v8 = vor.u32 %v3383_v0, %v2555_v63 }
  0xa5   :  { %2076 = vmatpush.bf16.msra.mxu2 %v3530_v9  ;;  %v2560_v9 = vor.u32 %v3371_v1, %v2557_v2 }
  0xa6   :  { %2090 = vmatpush.bf16.msra.mxu3 %v3538_v10  ;;  %v2552_v10 = vor.u32 %v3370_v6, %v2549_v7 }
  0xa7   :  { %2062 = vmatpush.bf16.msra.mxu1 %v3522_v11  ;;  %v3579_v11 = vld [vmem:[%s4621_s20 + $0x610] sm:$0xff] }
  0xa8   :  { %2049 = vmatpush.bf16.msra.mxu0 %v3513_v12  ;;  %v89_v12 = vld [vmem:[%s4623_s23 + $0x8] sm:$0xff]  ;;  %v1827_v18 = vpop.f32.mrf.mxu0 }
  0xa9   :  { %2077 = vmatpush.bf16.msra.mxu2 %v3529_v13  ;;  %2175 = vperm.xlu0 %3587, %v89_v12   ;;  %v3578_v13 = vld [vmem:[%s4621_s20 + $0x608] sm:$0xff] }
  0xaa   :  { %2091 = vmatpush.bf16.msra.mxu3 %v3537_v14  ;;  %v3577_v14 = vld [vmem:[%s4621_s20 + $0x600] sm:$0xff] }
  0xab   :  { %2063 = vmatpush.bf16.msra.mxu1 %v3521_v24  ;;  %2050 = vmatmul.bf16.vlgmr.msra.gmra.mxu0 %v2532_v27  ;;  %v1841_v19 = vpop.f32.mrf.mxu1 }
  0xac   :  { %2098 = vmatpush.bf16.msrb.mxu0 %v3552_v15  ;;  %2078 = vmatmul.bf16.vlgmr.msra.gmra.mxu2 %v2540_v28  ;;  %v2563_v15 = vld [vmem:[%s4622_s26 + $0x60] sm:$0xf] }
  0xad   :  { %2126 = vmatpush.bf16.msrb.mxu2 %v3568_v16  ;;  %2092 = vmatmul.bf16.vlgmr.msra.gmra.mxu3 %v2544_v30  ;;  %v3384_v16 = vld [vmem:[%s4622_s26 + $0xc0] sm:$0xf0]  ;;  %v3590_v28 = vld [vmem:[%s4624_s21] ss:$0 sm:$0xff] }
  0xae   :  { %2140 = vmatpush.bf16.msrb.mxu3 %v3576_v21  ;;  %2064 = vmatmul.bf16.vlgmr.msra.gmra.mxu1 %v2536_v31  ;;  %v2564_v17 = vor.u32 %v3384_v16, %v2563_v15  ;;  %v1828_v31 = vadd.f32 %v3590_v28, %v1827_v18 }
  0xaf   :  { %2112 = vmatpush.bf16.msrb.mxu1 %v3560_v29  ;;  %v1855_v20 = vpop.f32.mrf.mxu2 }
  0xb0   :  { %2099 = vmatpush.bf16.msrb.mxu0 %v3551_v32  ;;  %v1829_v21 = vpop.f32.mrf.mxu0  ;;  %v1869_v22 = vpop.f32.mrf.mxu3 }
  0xb1   :  { %2127 = vmatpush.bf16.msrb.mxu2 %v3567_v33 }
  0xb2   :  { %2141 = vmatpush.bf16.msrb.mxu3 %v3575_v34  ;;  %v1842_v34 = vadd.f32 %v1841_v19, %v1828_v31 }
  0xb3   :  { %2113 = vmatpush.bf16.msrb.mxu1 %v3559_v35  ;;  %v1843_v23 = vpop.f32.mrf.mxu1 }
  0xb4   :  { %2100 = vmatpush.bf16.msrb.mxu0 %v3550_v36 }
  0xb5   :  { %2128 = vmatpush.bf16.msrb.mxu2 %v3566_v37  ;;  %v1856_v37 = vadd.f32 %v1855_v20, %v1842_v34 }
  0xb6   :  { %2142 = vmatpush.bf16.msrb.mxu3 %v3574_v38 }
  0xb7   :  { %2114 = vmatpush.bf16.msrb.mxu1 %v3558_v39  ;;  %v1857_v24 = vpop.f32.mrf.mxu2 }
  0xb8   :  { %2101 = vmatpush.bf16.msrb.mxu0 %v3549_v40  ;;  %v1871_v26 = vpop.f32.mrf.mxu3  ;;  %v1830_v40 = vadd.f32 %v3590_v28, %v1829_v21 }
  0xb9   :  { %2129 = vmatpush.bf16.msrb.mxu2 %v3565_v41  ;;  %v1870_v41 = vadd.f32 %v1869_v22, %v1856_v37 }
  0xba   :  { %2143 = vmatpush.bf16.msrb.mxu3 %v3573_v42 }
  0xbb   :  { %2115 = vmatpush.bf16.msrb.mxu1 %v3557_v43  ;;  %v1844_v43 = vadd.f32 %v1843_v23, %v1830_v40 }
  0xbc   :  { %2102 = vmatpush.bf16.msrb.mxu0 %v3548_v44 }
  0xbd   :  { %2130 = vmatpush.bf16.msrb.mxu2 %v3564_v45 }
  0xbe   :  { %2144 = vmatpush.bf16.msrb.mxu3 %v3572_v46 }
  0xbf   :  { %2116 = vmatpush.bf16.msrb.mxu1 %v3556_v47  ;;  %v1858_v47 = vadd.f32 %v1857_v24, %v1844_v43 }
  0xc0   :  { %2103 = vmatpush.bf16.msrb.mxu0 %v3547_v48 }
  0xc1   :  { %2131 = vmatpush.bf16.msrb.mxu2 %v3563_v49 }
  0xc2   :  { %2145 = vmatpush.bf16.msrb.mxu3 %v3571_v50  ;;  %v1872_v50 = vadd.f32 %v1871_v26, %v1858_v47 }
  0xc3   :  { %2117 = vmatpush.bf16.msrb.mxu1 %v3555_v51 }
  0xc4   :  { %2104 = vmatpush.bf16.msrb.mxu0 %v3546_v52 }
  0xc5   :  { %2132 = vmatpush.bf16.msrb.mxu2 %v3562_v54 }
  0xc6   :  { %2146 = vmatpush.bf16.msrb.mxu3 %v3570_v55 }
  0xc7   :  { %2118 = vmatpush.bf16.msrb.mxu1 %v3554_v56 }
  0xc8   :  { %2105 = vmatpush.bf16.msrb.mxu0 %v3545_v58  ;;  %v1883_v25 = vpop.f32.mrf.mxu0 }
  0xc9   :  { %2133 = vmatpush.bf16.msrb.mxu2 %v3561_v59  ;;  %v1884_v44 = vadd.f32 %v1883_v25, %v1870_v41 }
  0xca   :  { %2147 = vmatpush.bf16.msrb.mxu3 %v3569_v60 }
  0xcb   :  { %2119 = vmatpush.bf16.msrb.mxu1 %v3553_v4  ;;  %2106 = vmatmul.bf16.vlgmr.msrb.gmra.mxu0 %v2548_v5  ;;  %v1897_v27 = vpop.f32.mrf.mxu1 }
  0xcc   :  { %2158 = vmatpush.bf16.msra.mxu0 %v3580_v3  ;;  %2134 = vmatmul.bf16.vlgmr.msrb.gmra.mxu2 %v2556_v8  ;;  %v1898_v48 = vadd.f32 %v1897_v27, %v1884_v44  ;;  %v3591_v44 = vld [vmem:[%s4598_s5] ss:$0 sm:$0xff] }
  0xcd   :  { %2148 = vmatmul.bf16.vlgmr.msrb.gmra.mxu3 %v2560_v9 }
  0xce   :  { %2120 = vmatmul.bf16.vlgmr.msrb.gmra.mxu1 %v2552_v10 }
  0xcf   :  { %v1911_v29 = vpop.f32.mrf.mxu2 }
  0xd0   :  { %2159 = vmatpush.bf16.msra.mxu0 %v3579_v11  ;;  %v1885_v30 = vpop.f32.mrf.mxu0  ;;  %v1925_v32 = vpop.f32.mrf.mxu3  ;;  %v1912_v51 = vadd.f32 %v1911_v29, %v1898_v48 }
  0xd1   :  { %v1886_v54 = vadd.f32 %v1885_v30, %v1872_v50 }
  0xd2   :  { %v1926_v55 = vadd.f32 %v1925_v32, %v1912_v51 }
  0xd3   :  { %v1899_v33 = vpop.f32.mrf.mxu1 }
  0xd4   :  { %2160 = vmatpush.bf16.msra.mxu0 %v3578_v13  ;;  %v1900_v58 = vadd.f32 %v1899_v33, %v1886_v54 }
  0xd7   :  { %v1913_v35 = vpop.f32.mrf.mxu2 }
  0xd8   :  { %2161 = vmatpush.bf16.msra.mxu0 %v3577_v14  ;;  %v1927_v38 = vpop.f32.mrf.mxu3  ;;  %v1914_v60 = vadd.f32 %v1913_v35, %v1900_v58 }
  0xda   :  { %v1928_v0 = vadd.f32 %v1927_v38, %v1914_v60 }
  0xdb   :  { %3349 = vmatmul.msk.bf16.vlgmr.msra.gmra.mxu0 %vm1814_vm0, %v2564_v17 }
  0xe8   :  { %v1939_v36 = vpop.f32.mrf.mxu0 }
  0xe9   :  { %v1940_v59 = vadd.f32 %v1939_v36, %v1926_v55 }
  0xeb   :  { %v1953_v39 = vpop.f32.mrf.mxu1 }
  0xec   :  { %v1954_v62 = vadd.f32 %v1953_v39, %v1940_v59 }
  0xef   :  { %v1967_v42 = vpop.f32.mrf.mxu2 }
  0xf0   :  { %v1941_v45 = vpop.f32.mrf.mxu0  ;;  %v1981_v46 = vpop.f32.mrf.mxu3  ;;  %v1968_v1 = vadd.f32 %v1967_v42, %v1954_v62 }
  0xf1   :  { %v1942_v3 = vadd.f32 %v1941_v45, %v1928_v0 }
  0xf2   :  { %v1982_v5 = vadd.f32 %v1981_v46, %v1968_v1 }
  0xf3   :  { %v1955_v49 = vpop.f32.mrf.mxu1 }
  0xf4   :  { %v1956_v6 = vadd.f32 %v1955_v49, %v1942_v3 }
  0xf7   :  { %v1969_v52 = vpop.f32.mrf.mxu2 }
  0xf8   :  { %v1983_v56 = vpop.f32.mrf.mxu3  ;;  %v1970_v10 = vadd.f32 %v1969_v52, %v1956_v6 }
  0xfa   :  { %v1984_v14 = vadd.f32 %v1983_v56, %v1970_v10 }
 0x108   :  { %v1995_v53 = vpop.f32.mrf.mxu0 }
 0x109   :  { %v1996_v7 = vadd.f32 %v1995_v53, %v1982_v5  ;;  %v3592_v53 = vld [vmem:[%s4599_s6] ss:$0 sm:$0xff] }
 0x10a   :  { %v2171_v46 = vpop.permute.xlu0 %2170 }
 0x10b   :  { %v2009_v57 = vpop.f32.mrf.mxu1  ;;  %v2181_v51 = vmul.f32 %v3591_v44, %v2171_v46 }
 0x10c   :  { %v2010_v11 = vadd.f32 %v2009_v57, %v1996_v7 }
 0x10d   :  { %v2186_v56 = vadd.f32 %v3592_v53, %v2181_v51  ;;  %v3594_v51 = vld [vmem:[%s4601_s9] ss:$0 sm:$0xff] }
 0x10f   :  { %v2023_v61 = vpop.f32.mrf.mxu2  ;;  %v2195_v62 = vsel %vm2188_vm1, %v2186_v56, 0.0 }
 0x110   :  { %v1997_v63 = vpop.f32.mrf.mxu0  ;;  %v2037_v2 = vpop.f32.mrf.mxu3  ;;  %v2024_v15 = vadd.f32 %v2023_v61, %v2010_v11 }
 0x111   :  { %v1998_v16 = vadd.f32 %v1997_v63, %v1984_v14 }
 0x112   :  { %v2038_v18 = vadd.f32 %v2037_v2, %v2024_v15 }
 0x113   :  { %v2011_v4 = vpop.f32.mrf.mxu1 }
 0x114   :  { %v2012_v20 = vadd.f32 %v2011_v4, %v1998_v16 }
 0x117   :  { %v2025_v8 = vpop.f32.mrf.mxu2 }
 0x118   :  { %v2039_v12 = vpop.f32.mrf.mxu3  ;;  %v2026_v23 = vadd.f32 %v2025_v8, %v2012_v20 }
 0x11a   :  { %v2040_v26 = vadd.f32 %v2039_v12, %v2026_v23  ;;  %v494_v23 = vld [vmem:[%s4604_s11 + $0x18] sm:$0xff] }
 0x11b   :  { %v2176_v59 = vpop.permute.xlu0 %2175  ;;  %2322 = vmatpush.msra.mxu2 %v494_v23  ;;  %v507_v23 = vld [vmem:[%s4609_s16 + $0x10] sm:$0xff] }
 0x11c   :  { %v2182_v63 = vmul.f32 %v3591_v44, %v2176_v59 }
 0x11e   :  { %v2187_v1 = vadd.f32 %v3592_v53, %v2182_v63 }
 0x120   :  { %v2198_v2 = vsel %vm2188_vm1, %v2187_v1, 0.0 }
 0x128   :  { %v2051_v9 = vpop.f32.mrf.mxu0 }
 0x129   :  { %v2052_v21 = vadd.f32 %v2051_v9, %v2038_v18 }
 0x12b   :  { %v2065_v13 = vpop.f32.mrf.mxu1 }
 0x12c   :  { %v2066_v25 = vadd.f32 %v2065_v13, %v2052_v21 }
 0x12f   :  { %v2079_v17 = vpop.f32.mrf.mxu2 }
 0x130   :  { %v2053_v19 = vpop.f32.mrf.mxu0  ;;  %v2093_v22 = vpop.f32.mrf.mxu3  ;;  %v2080_v27 = vadd.f32 %v2079_v17, %v2066_v25  ;;  %v493_v25 = vld [vmem:[%s4604_s11 + $0x10] sm:$0xff] }
 0x131   :  { %v2054_v30 = vadd.f32 %v2053_v19, %v2040_v26  ;;  %v497_v26 = vld [vmem:[%s4605_s12 + $0x10] sm:$0xff]  ;;  %2323 = vmatpush.msra.mxu2 %v493_v25  ;;  %v505_v25 = vld [vmem:[%s4609_s16] sm:$0xff] }
 0x132   :  { %v2094_v31 = vadd.f32 %v2093_v22, %v2080_v27  ;;  %v492_v27 = vld [vmem:[%s4604_s11 + $0x8] sm:$0xff] }
 0x133   :  { %v2067_v24 = vpop.f32.mrf.mxu1  ;;  %2324 = vmatpush.msra.mxu2 %v492_v27 }
 0x134   :  { %v2068_v34 = vadd.f32 %v2067_v24, %v2054_v30  ;;  %v498_v24 = vld [vmem:[%s4605_s12 + $0x18] sm:$0xff]  ;;  %v495_v30 = vld [vmem:[%s4605_s12] sm:$0xff] }
 0x135   :  { %2293 = vmatpush.msra.mxu1 %v498_v24  ;;  %v506_v24 = vld [vmem:[%s4609_s16 + $0x8] sm:$0xff] }
 0x137   :  { %v2081_v28 = vpop.f32.mrf.mxu2  ;;  %2294 = vmatpush.msra.mxu1 %v497_v26  ;;  %v3598_v26 = vld [vmem:[%s4608_s15] ss:$0 sm:$0xff] }
 0x138   :  { %v2095_v32 = vpop.f32.mrf.mxu3  ;;  %v2082_v36 = vadd.f32 %v2081_v28, %v2068_v34  ;;  %v496_v28 = vld [vmem:[%s4605_s12 + $0x8] sm:$0xff] }
 0x139   :  { %2295 = vmatpush.msra.mxu1 %v496_v28 }
 0x13a   :  { %v2096_v40 = vadd.f32 %v2095_v32, %v2082_v36  ;;  %v503_v36 = vld [vmem:[%s4606_s14 + $0x18] sm:$0xff] }
 0x13b   :  { %2296 = vmatpush.msra.mxu1 %v495_v30  ;;  %2361 = vmatpush.msra.mxu3 %v503_v36 }
 0x148   :  { %v2107_v29 = vpop.f32.mrf.mxu0 }
 0x149   :  { %v2108_v35 = vadd.f32 %v2107_v29, %v2094_v31  ;;  %v491_v29 = vld [vmem:[%s4604_s11] sm:$0xff] }
 0x14a   :  { %2325 = vmatpush.msra.mxu2 %v491_v29 }
 0x14b   :  { %v2121_v33 = vpop.f32.mrf.mxu1 }
 0x14c   :  { %v2122_v39 = vadd.f32 %v2121_v33, %v2108_v35 }
 0x14f   :  { %v2135_v37 = vpop.f32.mrf.mxu2 }
 0x150   :  { %v2109_v38 = vpop.f32.mrf.mxu0  ;;  %v2136_v41 = vadd.f32 %v2135_v37, %v2122_v39  ;;  %v2149_v42 = vpop.f32.mrf.mxu3 }
 0x151   :  { %v2110_v43 = vadd.f32 %v2109_v38, %v2096_v40 }
 0x152   :  { %v2150_v47 = vadd.f32 %v2149_v42, %v2136_v41 }
 0x153   :  { %v2123_v45 = vpop.f32.mrf.mxu1 }
 0x154   :  { %v2124_v50 = vadd.f32 %v2123_v45, %v2110_v43 }
 0x157   :  { %v2137_v48 = vpop.f32.mrf.mxu2 }
 0x158   :  { %v2163_v49 = vpop.f32.mrf.mxu0  ;;  %v2138_v54 = vadd.f32 %v2137_v48, %v2124_v50  ;;  %v2151_v57 = vpop.f32.mrf.mxu3  ;;  %v3593_v50 = vld [vmem:[%s4600_s7] ss:$0 sm:$0xff] }
 0x159   :  { %v2164_v52 = vadd.f32 %v2163_v49, %v2150_v47 }
 0x15a   :  { %v2152_v58 = vadd.f32 %v2151_v57, %v2138_v54  ;;  %v3596_v57 = vld [vmem:[%s4603_s8] ss:$0 sm:$0xff] }
 0x15b   :  { %v2189_v55 = vsel %vm2188_vm1, %v2164_v52, 0.0 }
 0x15c   :  { %2190 = vadd.xlane.f32.xlu1 %v2189_v55 }
 0x160   :  { %v2165_v60 = vpop.f32.mrf.mxu0 }
 0x161   :  { %v2166_v61 = vadd.f32 %v2165_v60, %v2152_v58 }
 0x163   :  { %v2192_v0 = vsel %vm2188_vm1, %v2166_v61, 0.0 }
 0x164   :  { %2193 = vadd.xlane.f32.xlu2 %v2192_v0  ;;  %2196 = vadd.xlane.f32.xlu1 %v2195_v62 }
 0x16c   :  { %2199 = vadd.xlane.f32.xlu2 %v2198_v2 }
 0x1cf   :  { %v2191_v3 = vpop.xlane.xlu1 %2190 }
 0x1d7   :  { %v2194_v4 = vpop.xlane.xlu2 %2193  ;;  %v2197_v5 = vpop.xlane.xlu1 %2196 }
 0x1d8   :  { %v2201_v6 = vadd.f32 %v2197_v5, %v2191_v3 }
 0x1da   :  { %v2203_v7 = vmul.f32 0.015625, %v2201_v6 }
 0x1dc   :  { %v4471_v8 = vsub.f32 %v2164_v52, %v2203_v7  ;;  %v4473_v9 = vsub.f32 %v2186_v56, %v2203_v7  ;;  %v3595_v56 = vld [vmem:[%s4602_s10] ss:$0 sm:$0xff] }
 0x1de   :  { %v2217_v10 = vmul.f32 %v4473_v9, %v4473_v9  ;;  %v2209_v11 = vmul.f32 %v4471_v8, %v4471_v8 }
 0x1df   :  { %v2200_v12 = vpop.xlane.xlu2 %2199 }
 0x1e0   :  { %v2202_v13 = vadd.f32 %v2200_v12, %v2194_v4  ;;  %v2219_v14 = vsel %vm2188_vm1, %v2217_v10, 0.0  ;;  %v2211_v15 = vsel %vm2188_vm1, %v2209_v11, 0.0  ;;  %v500_v10 = vld [vmem:[%s4606_s14] sm:$0xff]  ;;  %v508_v11 = vld [vmem:[%s4609_s16 + $0x18] sm:$0xff] }
 0x1e1   :  { %2220 = vadd.xlane.f32.xlu1 %v2219_v14  ;;  %2212 = vadd.xlane.f32.xlu0 %v2211_v15 }
 0x1e2   :  { %v2204_v16 = vmul.f32 0.015625, %v2202_v13  ;;  %3581 = vmatpush.msrb.mxu1 %v508_v11  ;;  %2395 = vmatpush.msrb.mxu0 %v508_v11  ;;  %v3597_v13 = vld [vmem:[%s4607_s13] ss:$0 sm:$0xff] }
 0x1e4   :  { %v4481_v17 = vsub.f32 %v2166_v61, %v2204_v16  ;;  %v4483_v18 = vsub.f32 %v2187_v1, %v2204_v16  ;;  %2396 = vmatpush.msrb.mxu0 %v507_v23  ;;  %3582 = vmatpush.msrb.mxu1 %v507_v23 }
 0x1e6   :  { %v2210_v19 = vmul.f32 %v4481_v17, %v4481_v17  ;;  %v2218_v20 = vmul.f32 %v4483_v18, %v4483_v18  ;;  %2397 = vmatpush.msrb.mxu0 %v506_v24  ;;  %3583 = vmatpush.msrb.mxu1 %v506_v24 }
 0x1e8   :  { %v2214_v21 = vsel %vm2188_vm1, %v2210_v19, 0.0  ;;  %v2222_v22 = vsel %vm2188_vm1, %v2218_v20, 0.0  ;;  %2398 = vmatpush.msrb.mxu0 %v505_v25  ;;  %3584 = vmatpush.msrb.mxu1 %v505_v25 }
 0x1e9   :  { %2215 = vadd.xlane.f32.xlu2 %v2214_v21  ;;  %2223 = vadd.xlane.f32.xlu1 %v2222_v22 }
 0x254   :  { %v2221_v31 = vpop.xlane.xlu1 %2220  ;;  %v2213_v32 = vpop.xlane.xlu0 %2212 }
 0x255   :  { %v2225_v33 = vadd.f32 %v2221_v31, %v2213_v32 }
 0x257   :  { %v2227_v34 = vmul.f32 0.015625, %v2225_v33  ;;  %v2408_v33 = vlaneseq }
 0x259   :  { %v2229_v35 = vadd.f32 1e-05, %v2227_v34  ;;  %v2409_v34 = vand.u32 127, %v2408_v33 }
 0x25b   :  { %3600 = vrsqrt.f32 %v2229_v35  ;;  %vm2237_vm3 = vweird.f32 %v2229_v35  ;;  %vm2410_vm8 = vcmp.lt.s32.totalorder %v2409_v34, 6 }
 0x25c   :  { %v2216_v37 = vpop.xlane.xlu2 %2215  ;;  %v2224_v38 = vpop.xlane.xlu1 %2223 }
 0x25d   :  { %v2226_v39 = vadd.f32 %v2224_v38, %v2216_v37 }
 0x25f   :  { %v2228_v40 = vmul.f32 0.015625, %v2226_v39 }
 0x261   :  { %v3601_v41 = vpop.eup %3600  ;;  %v2230_v42 = vadd.f32 1e-05, %v2228_v40 }
 0x262   :  { %v2232_v43 = vmul.f32 %v3601_v41, %v2229_v35  ;;  %vm2238_vm2 = vweird.f32 %v3601_v41  ;;  %v3599_v35 = vld [vmem:[%s4610_s17] ss:$0 sm:$0xff] }
 0x263   :  { %3602 = vrsqrt.f32 %v2230_v42  ;;  %vm2239_vm4 = vmor %vm2237_vm3, %vm2238_vm2  ;;  %vm2247_vm6 = vweird.f32 %v2230_v42 }
 0x264   :  { %v2233_v44 = vmul.f32 %v3601_v41, %v2232_v43 }
 0x266   :  { %v2234_v45 = vmul.f32 0.5, %v2233_v44 }
 0x268   :  { %v2235_v46 = vsub.f32 1.5, %v2234_v45 }
 0x269   :  { %v3603_v47 = vpop.eup %3602 }
 0x26a   :  { %v2236_v48 = vmul.f32 %v3601_v41, %v2235_v46  ;;  %v2242_v49 = vmul.f32 %v3603_v47, %v2230_v42  ;;  %vm2248_vm5 = vweird.f32 %v3603_v47 }
 0x26b   :  { %vm2249_vm7 = vmor %vm2247_vm6, %vm2248_vm5 }
 0x26c   :  { %v2240_v52 = vsel %vm2239_vm4, %v3601_v41, %v2236_v48  ;;  %v2243_v53 = vmul.f32 %v3603_v47, %v2242_v49 }
 0x26d   :  { %v2251_v54 = vmul.f32 %v2240_v52, %v4471_v8  ;;  %v2263_v55 = vmul.f32 %v2240_v52, %v4473_v9  ;;  %v502_v8 = vld [vmem:[%s4606_s14 + $0x10] sm:$0xff]  ;;  %v501_v9 = vld [vmem:[%s4606_s14 + $0x8] sm:$0xff]  ;;  %v90_v52 = vld [vmem:[%s4612_s2] sm:$0xff] }
 0x26e   :  { %v2244_v58 = vmul.f32 0.5, %v2243_v53  ;;  %2362 = vmatpush.msra.mxu3 %v502_v8  ;;  %v91_v53 = vld [vmem:[%s4612_s2 + $0x8] sm:$0xff] }
 0x26f   :  { %v2256_v59 = vmul.f32 %v3593_v50, %v2251_v54  ;;  %v2268_v60 = vmul.f32 %v3594_v51, %v2263_v55 }
 0x270   :  { %v2245_v61 = vsub.f32 1.5, %v2244_v58  ;;  %2363 = vmatpush.msra.mxu3 %v501_v9  ;;  %v3613_v58 = vmov 0.0  }
 0x271   :  { %v2273_v62 = vadd.f32 %v3595_v56, %v2268_v60  ;;  %v2261_v63 = vadd.f32 %v3596_v57, %v2256_v59 }
 0x272   :  { %v2246_v0 = vmul.f32 %v3603_v47, %v2245_v61  ;;  %2364 = vmatpush.msra.mxu3 %v500_v10 }
 0x273   :  { %3350 = vmatmul.msk.f32.vlgmr.msra.gmra.mxu1 %vm2188_vm1, %v2273_v62  ;;  %3352 = vmatmul.msk.f32.vlgmr.msra.gmra.mxu2 %vm2188_vm1, %v2261_v63 }
 0x274   :  { %v2250_v1 = vsel %vm2249_vm7, %v3603_v47, %v2246_v0 }
 0x275   :  { %v2264_v2 = vmul.f32 %v2250_v1, %v4483_v18  ;;  %v2252_v3 = vmul.f32 %v2250_v1, %v4481_v17 }
 0x277   :  { %v2269_v4 = vmul.f32 %v3594_v51, %v2264_v2  ;;  %v2257_v5 = vmul.f32 %v3593_v50, %v2252_v3 }
 0x279   :  { %v2274_v6 = vadd.f32 %v3595_v56, %v2269_v4  ;;  %v2262_v7 = vadd.f32 %v3596_v57, %v2257_v5 }
 0x27b   :  { %3351 = vmatmul.msk.f32.gmra.mxu1 %vm2188_vm1, %v2274_v6  ;;  %3353 = vmatmul.msk.f32.gmra.mxu2 %vm2188_vm1, %v2262_v7 }
 0x2f0   :  { %v2298_v12 = vpop.f32.mrf.mxu1 }
 0x2f6   :  { %v2327_v14 = vpop.f32.mrf.mxu2 }
 0x2f7   :  { %v2328_v15 = vadd.f32 %v2327_v14, %v2298_v12 }
 0x2f8   :  { %v2301_v18 = vpop.f32.mrf.mxu1 }
 0x2f9   :  { %v2336_v16 = vadd.f32 %v3597_v13, %v2328_v15 }
 0x2fb   :  { %v2338_v17 = vmax.f32 %v2336_v16, 0.0 }
 0x2fd   :  { %3354 = vmatmul.msk.f32.vlgmr.msra.gmra.mxu3 %vm2188_vm1, %v2338_v17 }
 0x2fe   :  { %v2330_v19 = vpop.f32.mrf.mxu2 }
 0x2ff   :  { %v2331_v20 = vadd.f32 %v2330_v19, %v2301_v18 }
 0x301   :  { %v2337_v21 = vadd.f32 %v3597_v13, %v2331_v20 }
 0x303   :  { %v2339_v22 = vmax.f32 %v2337_v21, 0.0 }
 0x305   :  { %3355 = vmatmul.msk.f32.gmra.mxu3 %vm2188_vm1, %v2339_v22 }
 0x380   :  { %v2366_v27 = vpop.f32.mrf.mxu3 }
 0x381   :  { %v2367_v28 = vadd.f32 %v3598_v26, %v2366_v27 }
 0x383   :  { %v2372_v29 = vmax.f32 %v2367_v28, 0.0 }
 0x385   :  { %3356 = vmatmul.msk.f32.vlgmr.msrb.gmra.mxu0 %vm2188_vm1, %v2372_v29 }
 0x388   :  { %v2369_v30 = vpop.f32.mrf.mxu3 }
 0x389   :  { %v2370_v31 = vadd.f32 %v3598_v26, %v2369_v30 }
 0x38b   :  { %v2373_v32 = vmax.f32 %v2370_v31, 0.0 }
 0x38d   :  { %3357 = vmatmul.msk.f32.vlgmr.msrb.gmra.mxu1 %vm2188_vm1, %v2373_v32 }
 0x402   :  { %v2400_v36 = vpop.f32.mrf.mxu0 }
 0x403   :  { %v2401_v37 = vadd.f32 %v3599_v35, %v2400_v36 }
 0x405   :  { %2406 = vst [vmem:[%s4611_s18] sm:$0xff] %v2401_v37  ;;  %v2411_v38 = vsel %vm2410_vm8, %v2401_v37, -1e+30 }
 0x406   :  { %2413 = vmax.xlane.f32.xlu2 %v2411_v38 }
 0x40a   :  { %v2403_v39 = vpop.f32.mrf.mxu1 }
 0x40b   :  { %v2404_v40 = vadd.f32 %v3599_v35, %v2403_v39 }
 0x40d   :  { %2407 = vst [vmem:[%s4611_s18 + $0x8] sm:$0xff] %v2404_v40  ;;  %v2412_v41 = vsel %vm2410_vm8, %v2404_v40, -1e+30 }
 0x40e   :  { %2415 = vmax.xlane.f32.xlu1 %v2412_v41 }
 0x479   :  { %v2414_v42 = vpop.xlane.xlu2 %2413 }
 0x47a   :  { %v2417_v43 = vsub.f32 %v2411_v38, %v2414_v42 }
 0x47c   :  { %v2419_v44 = vmul.f32 1.442695, %v2417_v43 }
 0x47e   :  { %3604 = vpow2.f32 %v2419_v44 }
 0x481   :  { %v2416_v45 = vpop.xlane.xlu1 %2415 }
 0x482   :  { %v2418_v46 = vsub.f32 %v2412_v41, %v2416_v45 }
 0x484   :  { %v3605_v47 = vpop.eup %3604  ;;  %v2421_v48 = vmul.f32 1.442695, %v2418_v46 }
 0x485   :  { %v2423_v49 = vsel %vm2410_vm8, %v3605_v47, 0.0 }
 0x486   :  { %3606 = vpow2.f32 %v2421_v48  ;;  %2425 = vadd.xlane.f32.xlu2 %v2423_v49 }
 0x48c   :  { %v3607_v50 = vpop.eup %3606 }
 0x48d   :  { %v2424_v51 = vsel %vm2410_vm8, %v3607_v50, 0.0 }
 0x48e   :  { %2427 = vadd.xlane.f32.xlu1 %v2424_v51 }
 0x49e   :  { %2436 = vperm.xlu2 %3588, %v90_v52  }
 0x4a7   :  { %2439 = vperm.xlu1 %3589, %v91_v53  }
 0x4f9   :  { %v2426_v54 = vpop.xlane.xlu2 %2425 }
 0x4fa   :  { %3608 = vlog2.f32 %v2426_v54 }
 0x500   :  { %v3609_v55 = vpop.eup %3608 }
 0x501   :  { %v2430_v56 = vmul.f32 0.6931472, %v3609_v55  ;;  %v2437_v57 = vpop.permute.xlu2 %2436  ;;  %v2428_v62 = vpop.xlane.xlu1 %2427 }
 0x502   :  { %vm2441_vm9 = vcmp.eq.s32.totalorder %v2409_v34, %v2437_v57  ;;  %3610 = vlog2.f32 %v2428_v62 }
 0x503   :  { %v3358_v59 = vsel %vm2441_vm9, 1.0, %v3613_v58  ;;  %v2433_v60 = vsub.f32 %v2417_v43, %v2430_v56 }
 0x505   :  { %v2447_v61 = vmul.f32 %v3358_v59, %v2433_v60 }
 0x507   :  { %2449 = vadd.xlane.f32.xlu0 %v2447_v61 }
 0x508   :  { %v3611_v63 = vpop.eup %3610 }
 0x509   :  { %v2432_v0 = vmul.f32 0.6931472, %v3611_v63 }
 0x50b   :  { %v2434_v2 = vsub.f32 %v2418_v46, %v2432_v0 }
 0x519   :  { %v2440_v1 = vpop.permute.xlu1 %2439 }
 0x51a   :  { %vm2442_vm10 = vcmp.eq.s32.totalorder %v2409_v34, %v2440_v1 }
 0x51b   :  { %v3359_v3 = vsel %vm2442_vm10, 1.0, %v3613_v58 }
 0x51c   :  { %v2448_v4 = vmul.f32 %v3359_v3, %v2434_v2 }
 0x51e   :  { %2451 = vadd.xlane.f32.xlu2 %v2448_v4 }
 0x57a   :  { %v2450_v5 = vpop.xlane.xlu0 %2449 }
 0x57b   :  { %v2453_v6 = vsub.f32 0.0, %v2450_v5 }
 0x57d   :  { %2455 = vst [vmem:[%s4613_s19] sm:$0xff] %v2453_v6 }
 0x591   :  { %v2452_v7 = vpop.xlane.xlu2 %2451 }
 0x592   :  { %v2454_v8 = vsub.f32 0.0, %v2452_v7 }
 0x594   :  { %2456 = vst [vmem:[%s4613_s19 + $0x8] sm:$0xff] %v2454_v8 }

</bundles_post_ra>
